<compile_context>
chip_gen: v5e
topology: v5e:2x2
jax: 0.10.0
libtpu: 0.0.40
codegen_flags: <defaults>
</compile_context>

<pallas_src>
import math

import jax
import jax.numpy as jnp
from jax.experimental import pallas as pl
from jax.experimental.pallas import tpu as pltpu


# ----------------------------------------------------------------------------
# Model hyper-parameters (small, consistent with a BERT-like encoder config)
# ----------------------------------------------------------------------------
VOCAB_SIZE = 128
MAX_POS = 16
BERT_HIDDEN = 32          # bert_layer.model.config.hidden_size
PROJ_HIDDEN = 16          # config.hidden_size  (!= BERT_HIDDEN -> projection exists)
NUM_LAYERS = 2
NUM_HEADS = 4
HEAD_DIM = BERT_HIDDEN // NUM_HEADS
FFN_DIM = 64
LN_EPS = 1e-12

BATCH = 2
SEQ = 8

_VMEM_SPEC = pl.BlockSpec(memory_space=pltpu.MemorySpace.VMEM)


# ----------------------------------------------------------------------------
# Fused encoder kernel: embeddings-LN -> N transformer layers -> projection
# ----------------------------------------------------------------------------
def _encoder_kernel(
    x_ref,          # [B*S, H]  summed embeddings (word + pos + type)
    mask_ref,       # [B, S]    attention mask (1 = keep, 0 = pad), f32
    eg_ref, eb_ref,                       # [1, H] embedding LN gamma / beta
    wqkv_ref, bqkv_ref,                   # [L, H, 3H], [L, 1, 3H]
    wo_ref, bo_ref,                       # [L, H, H],  [L, 1, H]
    ln1g_ref, ln1b_ref,                   # [L, 1, H]
    w1_ref, b1_ref,                       # [L, H, F],  [L, 1, F]
    w2_ref, b2_ref,                       # [L, F, H],  [L, 1, H]
    ln2g_ref, ln2b_ref,                   # [L, 1, H]
    pw_ref, pb_ref,                       # [H, P], [1, P]
    o_ref,                                # [B*S, P]
):
    scale = 1.0 / math.sqrt(HEAD_DIM)

    def ln(x, g, b):
        mean = jnp.mean(x, axis=-1, keepdims=True)
        var = jnp.mean(jnp.square(x - mean), axis=-1, keepdims=True)
        return (x - mean) * jax.lax.rsqrt(var + LN_EPS) * g + b

    # Embedding LayerNorm.
    x = ln(x_ref[...].astype(jnp.float32), eg_ref[...], eb_ref[...])   # [BS, H]

    # HF-style additive extended attention mask, per key position.
    bias = (1.0 - mask_ref[...]) * -1e9                                # [B, S]

    # Transformer layers (static unrolled loop; NUM_LAYERS is tiny).
    for li in range(NUM_LAYERS):
        # --- fused Q/K/V projection: one [BS, H] @ [H, 3H] matmul ---
        qkv = (jnp.dot(x, wqkv_ref[li], preferred_element_type=jnp.float32)
               + bqkv_ref[li])                                          # [BS, 3H]
        q = qkv[:, 0 * BERT_HIDDEN:1 * BERT_HIDDEN]
        k = qkv[:, 1 * BERT_HIDDEN:2 * BERT_HIDDEN]
        v = qkv[:, 2 * BERT_HIDDEN:3 * BERT_HIDDEN]

        wo_l = wo_ref[li]                                               # [H, H]

        # --- multi-head attention, all heads in this single invocation.
        # Per-head output projection is accumulated directly:
        #   concat_h(ctx_h) @ wo == sum_h ctx_h @ wo[h*Dh:(h+1)*Dh, :]
        attn_rows = []
        for b in range(BATCH):
            r0, r1 = b * SEQ, (b + 1) * SEQ
            bias_b = bias[b:b + 1, :]                                   # [1, S]
            acc = None
            for hd in range(NUM_HEADS):
                c0, c1 = hd * HEAD_DIM, (hd + 1) * HEAD_DIM
                qh = q[r0:r1, c0:c1]                                    # [S, Dh]
                kh = k[r0:r1, c0:c1]
                vh = v[r0:r1, c0:c1]
                s = (jnp.dot(qh, kh.T, preferred_element_type=jnp.float32)
                     * scale + bias_b)                                  # [S, S]
                s = s - jnp.max(s, axis=-1, keepdims=True)
                p = jnp.exp(s)
                p = p / jnp.sum(p, axis=-1, keepdims=True)
                ctx_h = jnp.dot(p, vh, preferred_element_type=jnp.float32)   # [S, Dh]
                contrib = jnp.dot(ctx_h, wo_l[c0:c1, :],
                                  preferred_element_type=jnp.float32)        # [S, H]
                acc = contrib if acc is None else acc + contrib
            attn_rows.append(acc)                                       # [S, H]
        attn_out = jnp.concatenate(attn_rows, axis=0) + bo_ref[li]      # [BS, H]

        # --- residual + LayerNorm (fused, VMEM resident) ---
        x = ln(x + attn_out, ln1g_ref[li], ln1b_ref[li])

        # --- GELU FFN ---
        h1 = (jnp.dot(x, w1_ref[li], preferred_element_type=jnp.float32)
              + b1_ref[li])                                             # [BS, F]
        # TODO(synk): HF BERT uses exact erf GELU; tanh approximation is used
        # here for guaranteed Mosaic lowering (tiny numeric difference).
        h1 = jax.nn.gelu(h1)
        h2 = (jnp.dot(h1, w2_ref[li], preferred_element_type=jnp.float32)
              + b2_ref[li])                                             # [BS, H]

        # --- residual + LayerNorm ---
        x = ln(x + h2, ln2g_ref[li], ln2b_ref[li])

    # --- final projection (nn.Linear(bert_hidden_size, config.hidden_size)) ---
    out = jnp.dot(x, pw_ref[...], preferred_element_type=jnp.float32) + pb_ref[...]
    o_ref[...] = out.astype(o_ref.dtype)


# ----------------------------------------------------------------------------
# Parameter initialization (deterministic, synthetic — no checkpoint loading)
# Layer parameters are stacked along a leading [NUM_LAYERS] axis and Q/K/V
# weights are pre-concatenated into [H, 3H] so the kernel does a single fused
# QKV matmul per layer.
# ----------------------------------------------------------------------------
def init_params(key):
    std = 0.02

    def nrm(k, shape):
        return jax.random.normal(k, shape, dtype=jnp.float32) * std

    keys = jax.random.split(key, 8)
    params = {
        "word_emb": nrm(keys[0], (VOCAB_SIZE, BERT_HIDDEN)),
        "pos_emb": nrm(keys[1], (MAX_POS, BERT_HIDDEN)),
        "type_emb": nrm(keys[2], (2, BERT_HIDDEN)),
        "emb_ln_g": jnp.ones((1, BERT_HIDDEN), jnp.float32),
        "emb_ln_b": jnp.zeros((1, BERT_HIDDEN), jnp.float32),
        # Stacked per-layer parameters.
        "wqkv": nrm(keys[3], (NUM_LAYERS, BERT_HIDDEN, 3 * BERT_HIDDEN)),
        "bqkv": jnp.zeros((NUM_LAYERS, 1, 3 * BERT_HIDDEN), jnp.float32),
        "wo": nrm(keys[4], (NUM_LAYERS, BERT_HIDDEN, BERT_HIDDEN)),
        "bo": jnp.zeros((NUM_LAYERS, 1, BERT_HIDDEN), jnp.float32),
        "ln1_g": jnp.ones((NUM_LAYERS, 1, BERT_HIDDEN), jnp.float32),
        "ln1_b": jnp.zeros((NUM_LAYERS, 1, BERT_HIDDEN), jnp.float32),
        "w1": nrm(keys[5], (NUM_LAYERS, BERT_HIDDEN, FFN_DIM)),
        "b1": jnp.zeros((NUM_LAYERS, 1, FFN_DIM), jnp.float32),
        "w2": nrm(keys[6], (NUM_LAYERS, FFN_DIM, BERT_HIDDEN)),
        "b2": jnp.zeros((NUM_LAYERS, 1, BERT_HIDDEN), jnp.float32),
        "ln2_g": jnp.ones((NUM_LAYERS, 1, BERT_HIDDEN), jnp.float32),
        "ln2_b": jnp.zeros((NUM_LAYERS, 1, BERT_HIDDEN), jnp.float32),
        # Projection Linear.
        "proj_w": nrm(keys[7], (BERT_HIDDEN, PROJ_HIDDEN)),
        "proj_b": jnp.zeros((1, PROJ_HIDDEN), jnp.float32),
    }
    return params


# ----------------------------------------------------------------------------
# Forward pass: embedding gather in plain JAX (glue), everything else in the
# single fused Pallas kernel.
# ----------------------------------------------------------------------------
def encoder_forward(params, input_ids, attention_mask):
    """Equivalent of Encoder.forward: token_embeddings = bert(ids, mask)[0];
    then projection since config.hidden_size != bert_hidden_size."""
    B, S = input_ids.shape
    # --- bert_layer.model embeddings (glue: gathers done in plain JAX) ---
    x = (params["word_emb"][input_ids]
         + params["pos_emb"][jnp.arange(S)][None, :, :]
         + params["type_emb"][0][None, None, :]).reshape(B * S, BERT_HIDDEN)
    mask = attention_mask.astype(jnp.float32)

    out = pl.pallas_call(
        _encoder_kernel,
        out_shape=jax.ShapeDtypeStruct((B * S, PROJ_HIDDEN), jnp.float32),
        in_specs=[_VMEM_SPEC] * 18,
        out_specs=_VMEM_SPEC,
    )(
        x, mask,
        params["emb_ln_g"], params["emb_ln_b"],
        params["wqkv"], params["bqkv"],
        params["wo"], params["bo"],
        params["ln1_g"], params["ln1_b"],
        params["w1"], params["b1"],
        params["w2"], params["b2"],
        params["ln2_g"], params["ln2_b"],
        params["proj_w"], params["proj_b"],
    )
    return out.reshape(B, S, PROJ_HIDDEN)


# TODO(synk): resize_token_embeddings has no kernel equivalent (pure parameter
# surgery); only the forward pass is implemented here.


if __name__ == "__main__":
    key = jax.random.PRNGKey(0)
    pkey, ikey = jax.random.split(key)

    params = init_params(pkey)
    input_ids = jax.random.randint(ikey, (BATCH, SEQ), 0, VOCAB_SIZE, dtype=jnp.int32)
    attention_mask = jnp.ones((BATCH, SEQ), dtype=jnp.int32)

    out = jax.jit(encoder_forward)(params, input_ids, attention_mask)
    out = jax.block_until_ready(out)

    assert out.shape == (BATCH, SEQ, PROJ_HIDDEN), out.shape
    assert out.dtype == jnp.float32
    assert bool(jnp.all(jnp.isfinite(out)))
    print("KERNEL_OK")
</pallas_src>

<mosaic_0001>
module attributes {stable_mosaic.version = 11 : i64} {
  func.func @_encoder_kernel(%arg0: memref<16x32xf32, #tpu.memory_space<vmem>>, %arg1: memref<2x8xf32, #tpu.memory_space<vmem>>, %arg2: memref<1x32xf32, #tpu.memory_space<vmem>>, %arg3: memref<1x32xf32, #tpu.memory_space<vmem>>, %arg4: memref<2x32x96xf32, #tpu.memory_space<vmem>>, %arg5: memref<2x1x96xf32, #tpu.memory_space<vmem>>, %arg6: memref<2x32x32xf32, #tpu.memory_space<vmem>>, %arg7: memref<2x1x32xf32, #tpu.memory_space<vmem>>, %arg8: memref<2x1x32xf32, #tpu.memory_space<vmem>>, %arg9: memref<2x1x32xf32, #tpu.memory_space<vmem>>, %arg10: memref<2x32x64xf32, #tpu.memory_space<vmem>>, %arg11: memref<2x1x64xf32, #tpu.memory_space<vmem>>, %arg12: memref<2x64x32xf32, #tpu.memory_space<vmem>>, %arg13: memref<2x1x32xf32, #tpu.memory_space<vmem>>, %arg14: memref<2x1x32xf32, #tpu.memory_space<vmem>>, %arg15: memref<2x1x32xf32, #tpu.memory_space<vmem>>, %arg16: memref<32x16xf32, #tpu.memory_space<vmem>>, %arg17: memref<1x16xf32, #tpu.memory_space<vmem>>, %arg18: memref<16x16xf32, #tpu.memory_space<vmem>>) attributes {dimension_semantics = [], scalar_prefetch = 0 : i64, scratch_operands = 0 : i64, tpu.core_type = #tpu.core_type<tc>} {
    %c0 = arith.constant 0 : index
    %c0_0 = arith.constant 0 : index
    %0 = vector.load %arg0[%c0, %c0_0] : memref<16x32xf32, #tpu.memory_space<vmem>>, vector<16x32xf32>
    %c0_1 = arith.constant 0 : index
    %c0_2 = arith.constant 0 : index
    %1 = vector.load %arg2[%c0_1, %c0_2] : memref<1x32xf32, #tpu.memory_space<vmem>>, vector<1x32xf32>
    %c0_3 = arith.constant 0 : index
    %c0_4 = arith.constant 0 : index
    %2 = vector.load %arg3[%c0_3, %c0_4] : memref<1x32xf32, #tpu.memory_space<vmem>>, vector<1x32xf32>
    %cst = arith.constant dense<0.000000e+00> : vector<16xf32>
    %3 = vector.multi_reduction <add>, %0, %cst [1] : vector<16x32xf32> to vector<16xf32>
    %4 = vector.shape_cast %3 : vector<16xf32> to vector<16x1xf32>
    %cst_5 = arith.constant 3.200000e+01 : f32
    %5 = vector.broadcast %cst_5 : f32 to vector<16x1xf32>
    %6 = arith.divf %4, %5 : vector<16x1xf32>
    %7 = vector.broadcast %6 : vector<16x1xf32> to vector<16x32xf32>
    %8 = arith.subf %0, %7 : vector<16x32xf32>
    %9 = arith.mulf %8, %8 : vector<16x32xf32>
    %cst_6 = arith.constant dense<0.000000e+00> : vector<16xf32>
    %10 = vector.multi_reduction <add>, %9, %cst_6 [1] : vector<16x32xf32> to vector<16xf32>
    %11 = vector.shape_cast %10 : vector<16xf32> to vector<16x1xf32>
    %cst_7 = arith.constant 3.200000e+01 : f32
    %12 = vector.broadcast %cst_7 : f32 to vector<16x1xf32>
    %13 = arith.divf %11, %12 : vector<16x1xf32>
    %14 = vector.broadcast %6 : vector<16x1xf32> to vector<16x32xf32>
    %15 = arith.subf %0, %14 : vector<16x32xf32>
    %cst_8 = arith.constant 9.99999996E-13 : f32
    %16 = vector.broadcast %cst_8 : f32 to vector<16x1xf32>
    %17 = arith.addf %13, %16 : vector<16x1xf32>
    %18 = math.rsqrt %17 : vector<16x1xf32>
    %19 = vector.broadcast %18 : vector<16x1xf32> to vector<16x32xf32>
    %20 = arith.mulf %15, %19 : vector<16x32xf32>
    %21 = vector.broadcast %1 : vector<1x32xf32> to vector<16x32xf32>
    %22 = arith.mulf %20, %21 : vector<16x32xf32>
    %23 = vector.broadcast %2 : vector<1x32xf32> to vector<16x32xf32>
    %24 = arith.addf %22, %23 : vector<16x32xf32>
    %c0_9 = arith.constant 0 : index
    %c0_10 = arith.constant 0 : index
    %25 = vector.load %arg1[%c0_9, %c0_10] : memref<2x8xf32, #tpu.memory_space<vmem>>, vector<2x8xf32>
    %cst_11 = arith.constant 1.000000e+00 : f32
    %26 = vector.broadcast %cst_11 : f32 to vector<2x8xf32>
    %27 = arith.subf %26, %25 : vector<2x8xf32>
    %cst_12 = arith.constant -1.000000e+09 : f32
    %28 = vector.broadcast %cst_12 : f32 to vector<2x8xf32>
    %29 = arith.mulf %27, %28 : vector<2x8xf32>
    %c0_13 = arith.constant 0 : index
    %c0_14 = arith.constant 0 : index
    %c0_15 = arith.constant 0 : index
    %30 = vector.load %arg4[%c0_13, %c0_14, %c0_15] : memref<2x32x96xf32, #tpu.memory_space<vmem>>, vector<1x32x96xf32>
    %31 = vector.shape_cast %30 : vector<1x32x96xf32> to vector<32x96xf32>
    %cst_16 = arith.constant dense<0.000000e+00> : vector<16x96xf32>
    %32 = tpu.matmul %24, %31, %cst_16 {dimension_numbers = #tpu.dot_dimension_numbers<[1], [0], [0], [1], [0, 0, 1, 1], [], []>} : vector<16x32xf32>, vector<32x96xf32>, vector<16x96xf32> -> vector<16x96xf32>
    %c0_17 = arith.constant 0 : index
    %c0_18 = arith.constant 0 : index
    %c0_19 = arith.constant 0 : index
    %33 = vector.load %arg5[%c0_17, %c0_18, %c0_19] : memref<2x1x96xf32, #tpu.memory_space<vmem>>, vector<1x1x96xf32>
    %34 = vector.shape_cast %33 : vector<1x1x96xf32> to vector<1x96xf32>
    %35 = vector.broadcast %34 : vector<1x96xf32> to vector<16x96xf32>
    %36 = arith.addf %32, %35 : vector<16x96xf32>
    %37 = vector.extract_strided_slice %36 {offsets = [0, 0], sizes = [16, 32], strides = [1, 1]} : vector<16x96xf32> to vector<16x32xf32>
    %38 = vector.extract_strided_slice %36 {offsets = [0, 32], sizes = [16, 32], strides = [1, 1]} : vector<16x96xf32> to vector<16x32xf32>
    %39 = vector.extract_strided_slice %36 {offsets = [0, 64], sizes = [16, 32], strides = [1, 1]} : vector<16x96xf32> to vector<16x32xf32>
    %c0_20 = arith.constant 0 : index
    %c0_21 = arith.constant 0 : index
    %c0_22 = arith.constant 0 : index
    %40 = vector.load %arg6[%c0_20, %c0_21, %c0_22] : memref<2x32x32xf32, #tpu.memory_space<vmem>>, vector<1x32x32xf32>
    %41 = vector.shape_cast %40 : vector<1x32x32xf32> to vector<32x32xf32>
    %42 = vector.extract_strided_slice %29 {offsets = [0, 0], sizes = [1, 8], strides = [1, 1]} : vector<2x8xf32> to vector<1x8xf32>
    %43 = vector.extract_strided_slice %37 {offsets = [0, 0], sizes = [8, 8], strides = [1, 1]} : vector<16x32xf32> to vector<8x8xf32>
    %44 = vector.extract_strided_slice %38 {offsets = [0, 0], sizes = [8, 8], strides = [1, 1]} : vector<16x32xf32> to vector<8x8xf32>
    %45 = vector.extract_strided_slice %39 {offsets = [0, 0], sizes = [8, 8], strides = [1, 1]} : vector<16x32xf32> to vector<8x8xf32>
    %46 = tpu.transpose %44, [1, 0] : vector<8x8xf32> -> vector<8x8xf32>
    %cst_23 = arith.constant dense<0.000000e+00> : vector<8x8xf32>
    %47 = tpu.matmul %43, %46, %cst_23 {dimension_numbers = #tpu.dot_dimension_numbers<[1], [0], [0], [1], [0, 0, 1, 1], [], []>} : vector<8x8xf32>, vector<8x8xf32>, vector<8x8xf32> -> vector<8x8xf32>
    %cst_24 = arith.constant 0.353553385 : f32
    %48 = vector.broadcast %cst_24 : f32 to vector<8x8xf32>
    %49 = arith.mulf %47, %48 : vector<8x8xf32>
    %50 = vector.broadcast %42 : vector<1x8xf32> to vector<8x8xf32>
    %51 = arith.addf %49, %50 : vector<8x8xf32>
    %cst_25 = arith.constant dense<0xFF800000> : vector<8xf32>
    %52 = vector.multi_reduction <maximumf>, %51, %cst_25 [1] : vector<8x8xf32> to vector<8xf32>
    %53 = vector.shape_cast %52 : vector<8xf32> to vector<8x1xf32>
    %54 = vector.broadcast %53 : vector<8x1xf32> to vector<8x8xf32>
    %55 = arith.subf %51, %54 : vector<8x8xf32>
    %56 = math.exp %55 : vector<8x8xf32>
    %cst_26 = arith.constant dense<0.000000e+00> : vector<8xf32>
    %57 = vector.multi_reduction <add>, %56, %cst_26 [1] : vector<8x8xf32> to vector<8xf32>
    %58 = vector.shape_cast %57 : vector<8xf32> to vector<8x1xf32>
    %59 = vector.broadcast %58 : vector<8x1xf32> to vector<8x8xf32>
    %60 = arith.divf %56, %59 : vector<8x8xf32>
    %cst_27 = arith.constant dense<0.000000e+00> : vector<8x8xf32>
    %61 = tpu.matmul %60, %45, %cst_27 {dimension_numbers = #tpu.dot_dimension_numbers<[1], [0], [0], [1], [0, 0, 1, 1], [], []>} : vector<8x8xf32>, vector<8x8xf32>, vector<8x8xf32> -> vector<8x8xf32>
    %62 = vector.extract_strided_slice %41 {offsets = [0, 0], sizes = [8, 32], strides = [1, 1]} : vector<32x32xf32> to vector<8x32xf32>
    %cst_28 = arith.constant dense<0.000000e+00> : vector<8x32xf32>
    %63 = tpu.matmul %61, %62, %cst_28 {dimension_numbers = #tpu.dot_dimension_numbers<[1], [0], [0], [1], [0, 0, 1, 1], [], []>} : vector<8x8xf32>, vector<8x32xf32>, vector<8x32xf32> -> vector<8x32xf32>
    %64 = vector.extract_strided_slice %37 {offsets = [0, 8], sizes = [8, 8], strides = [1, 1]} : vector<16x32xf32> to vector<8x8xf32>
    %65 = vector.extract_strided_slice %38 {offsets = [0, 8], sizes = [8, 8], strides = [1, 1]} : vector<16x32xf32> to vector<8x8xf32>
    %66 = vector.extract_strided_slice %39 {offsets = [0, 8], sizes = [8, 8], strides = [1, 1]} : vector<16x32xf32> to vector<8x8xf32>
    %67 = tpu.transpose %65, [1, 0] : vector<8x8xf32> -> vector<8x8xf32>
    %cst_29 = arith.constant dense<0.000000e+00> : vector<8x8xf32>
    %68 = tpu.matmul %64, %67, %cst_29 {dimension_numbers = #tpu.dot_dimension_numbers<[1], [0], [0], [1], [0, 0, 1, 1], [], []>} : vector<8x8xf32>, vector<8x8xf32>, vector<8x8xf32> -> vector<8x8xf32>
    %cst_30 = arith.constant 0.353553385 : f32
    %69 = vector.broadcast %cst_30 : f32 to vector<8x8xf32>
    %70 = arith.mulf %68, %69 : vector<8x8xf32>
    %71 = vector.broadcast %42 : vector<1x8xf32> to vector<8x8xf32>
    %72 = arith.addf %70, %71 : vector<8x8xf32>
    %cst_31 = arith.constant dense<0xFF800000> : vector<8xf32>
    %73 = vector.multi_reduction <maximumf>, %72, %cst_31 [1] : vector<8x8xf32> to vector<8xf32>
    %74 = vector.shape_cast %73 : vector<8xf32> to vector<8x1xf32>
    %75 = vector.broadcast %74 : vector<8x1xf32> to vector<8x8xf32>
    %76 = arith.subf %72, %75 : vector<8x8xf32>
    %77 = math.exp %76 : vector<8x8xf32>
    %cst_32 = arith.constant dense<0.000000e+00> : vector<8xf32>
    %78 = vector.multi_reduction <add>, %77, %cst_32 [1] : vector<8x8xf32> to vector<8xf32>
    %79 = vector.shape_cast %78 : vector<8xf32> to vector<8x1xf32>
    %80 = vector.broadcast %79 : vector<8x1xf32> to vector<8x8xf32>
    %81 = arith.divf %77, %80 : vector<8x8xf32>
    %cst_33 = arith.constant dense<0.000000e+00> : vector<8x8xf32>
    %82 = tpu.matmul %81, %66, %cst_33 {dimension_numbers = #tpu.dot_dimension_numbers<[1], [0], [0], [1], [0, 0, 1, 1], [], []>} : vector<8x8xf32>, vector<8x8xf32>, vector<8x8xf32> -> vector<8x8xf32>
    %83 = vector.extract_strided_slice %41 {offsets = [8, 0], sizes = [8, 32], strides = [1, 1]} : vector<32x32xf32> to vector<8x32xf32>
    %cst_34 = arith.constant dense<0.000000e+00> : vector<8x32xf32>
    %84 = tpu.matmul %82, %83, %cst_34 {dimension_numbers = #tpu.dot_dimension_numbers<[1], [0], [0], [1], [0, 0, 1, 1], [], []>} : vector<8x8xf32>, vector<8x32xf32>, vector<8x32xf32> -> vector<8x32xf32>
    %85 = arith.addf %63, %84 : vector<8x32xf32>
    %86 = vector.extract_strided_slice %37 {offsets = [0, 16], sizes = [8, 8], strides = [1, 1]} : vector<16x32xf32> to vector<8x8xf32>
    %87 = vector.extract_strided_slice %38 {offsets = [0, 16], sizes = [8, 8], strides = [1, 1]} : vector<16x32xf32> to vector<8x8xf32>
    %88 = vector.extract_strided_slice %39 {offsets = [0, 16], sizes = [8, 8], strides = [1, 1]} : vector<16x32xf32> to vector<8x8xf32>
    %89 = tpu.transpose %87, [1, 0] : vector<8x8xf32> -> vector<8x8xf32>
    %cst_35 = arith.constant dense<0.000000e+00> : vector<8x8xf32>
    %90 = tpu.matmul %86, %89, %cst_35 {dimension_numbers = #tpu.dot_dimension_numbers<[1], [0], [0], [1], [0, 0, 1, 1], [], []>} : vector<8x8xf32>, vector<8x8xf32>, vector<8x8xf32> -> vector<8x8xf32>
    %cst_36 = arith.constant 0.353553385 : f32
    %91 = vector.broadcast %cst_36 : f32 to vector<8x8xf32>
    %92 = arith.mulf %90, %91 : vector<8x8xf32>
    %93 = vector.broadcast %42 : vector<1x8xf32> to vector<8x8xf32>
    %94 = arith.addf %92, %93 : vector<8x8xf32>
    %cst_37 = arith.constant dense<0xFF800000> : vector<8xf32>
    %95 = vector.multi_reduction <maximumf>, %94, %cst_37 [1] : vector<8x8xf32> to vector<8xf32>
    %96 = vector.shape_cast %95 : vector<8xf32> to vector<8x1xf32>
    %97 = vector.broadcast %96 : vector<8x1xf32> to vector<8x8xf32>
    %98 = arith.subf %94, %97 : vector<8x8xf32>
    %99 = math.exp %98 : vector<8x8xf32>
    %cst_38 = arith.constant dense<0.000000e+00> : vector<8xf32>
    %100 = vector.multi_reduction <add>, %99, %cst_38 [1] : vector<8x8xf32> to vector<8xf32>
    %101 = vector.shape_cast %100 : vector<8xf32> to vector<8x1xf32>
    %102 = vector.broadcast %101 : vector<8x1xf32> to vector<8x8xf32>
    %103 = arith.divf %99, %102 : vector<8x8xf32>
    %cst_39 = arith.constant dense<0.000000e+00> : vector<8x8xf32>
    %104 = tpu.matmul %103, %88, %cst_39 {dimension_numbers = #tpu.dot_dimension_numbers<[1], [0], [0], [1], [0, 0, 1, 1], [], []>} : vector<8x8xf32>, vector<8x8xf32>, vector<8x8xf32> -> vector<8x8xf32>
    %105 = vector.extract_strided_slice %41 {offsets = [16, 0], sizes = [8, 32], strides = [1, 1]} : vector<32x32xf32> to vector<8x32xf32>
    %cst_40 = arith.constant dense<0.000000e+00> : vector<8x32xf32>
    %106 = tpu.matmul %104, %105, %cst_40 {dimension_numbers = #tpu.dot_dimension_numbers<[1], [0], [0], [1], [0, 0, 1, 1], [], []>} : vector<8x8xf32>, vector<8x32xf32>, vector<8x32xf32> -> vector<8x32xf32>
    %107 = arith.addf %85, %106 : vector<8x32xf32>
    %108 = vector.extract_strided_slice %37 {offsets = [0, 24], sizes = [8, 8], strides = [1, 1]} : vector<16x32xf32> to vector<8x8xf32>
    %109 = vector.extract_strided_slice %38 {offsets = [0, 24], sizes = [8, 8], strides = [1, 1]} : vector<16x32xf32> to vector<8x8xf32>
    %110 = vector.extract_strided_slice %39 {offsets = [0, 24], sizes = [8, 8], strides = [1, 1]} : vector<16x32xf32> to vector<8x8xf32>
    %111 = tpu.transpose %109, [1, 0] : vector<8x8xf32> -> vector<8x8xf32>
    %cst_41 = arith.constant dense<0.000000e+00> : vector<8x8xf32>
    %112 = tpu.matmul %108, %111, %cst_41 {dimension_numbers = #tpu.dot_dimension_numbers<[1], [0], [0], [1], [0, 0, 1, 1], [], []>} : vector<8x8xf32>, vector<8x8xf32>, vector<8x8xf32> -> vector<8x8xf32>
    %cst_42 = arith.constant 0.353553385 : f32
    %113 = vector.broadcast %cst_42 : f32 to vector<8x8xf32>
    %114 = arith.mulf %112, %113 : vector<8x8xf32>
    %115 = vector.broadcast %42 : vector<1x8xf32> to vector<8x8xf32>
    %116 = arith.addf %114, %115 : vector<8x8xf32>
    %cst_43 = arith.constant dense<0xFF800000> : vector<8xf32>
    %117 = vector.multi_reduction <maximumf>, %116, %cst_43 [1] : vector<8x8xf32> to vector<8xf32>
    %118 = vector.shape_cast %117 : vector<8xf32> to vector<8x1xf32>
    %119 = vector.broadcast %118 : vector<8x1xf32> to vector<8x8xf32>
    %120 = arith.subf %116, %119 : vector<8x8xf32>
    %121 = math.exp %120 : vector<8x8xf32>
    %cst_44 = arith.constant dense<0.000000e+00> : vector<8xf32>
    %122 = vector.multi_reduction <add>, %121, %cst_44 [1] : vector<8x8xf32> to vector<8xf32>
    %123 = vector.shape_cast %122 : vector<8xf32> to vector<8x1xf32>
    %124 = vector.broadcast %123 : vector<8x1xf32> to vector<8x8xf32>
    %125 = arith.divf %121, %124 : vector<8x8xf32>
    %cst_45 = arith.constant dense<0.000000e+00> : vector<8x8xf32>
    %126 = tpu.matmul %125, %110, %cst_45 {dimension_numbers = #tpu.dot_dimension_numbers<[1], [0], [0], [1], [0, 0, 1, 1], [], []>} : vector<8x8xf32>, vector<8x8xf32>, vector<8x8xf32> -> vector<8x8xf32>
    %127 = vector.extract_strided_slice %41 {offsets = [24, 0], sizes = [8, 32], strides = [1, 1]} : vector<32x32xf32> to vector<8x32xf32>
    %cst_46 = arith.constant dense<0.000000e+00> : vector<8x32xf32>
    %128 = tpu.matmul %126, %127, %cst_46 {dimension_numbers = #tpu.dot_dimension_numbers<[1], [0], [0], [1], [0, 0, 1, 1], [], []>} : vector<8x8xf32>, vector<8x32xf32>, vector<8x32xf32> -> vector<8x32xf32>
    %129 = arith.addf %107, %128 : vector<8x32xf32>
    %130 = vector.extract_strided_slice %29 {offsets = [1, 0], sizes = [1, 8], strides = [1, 1]} : vector<2x8xf32> to vector<1x8xf32>
    %131 = vector.extract_strided_slice %37 {offsets = [8, 0], sizes = [8, 8], strides = [1, 1]} : vector<16x32xf32> to vector<8x8xf32>
    %132 = vector.extract_strided_slice %38 {offsets = [8, 0], sizes = [8, 8], strides = [1, 1]} : vector<16x32xf32> to vector<8x8xf32>
    %133 = vector.extract_strided_slice %39 {offsets = [8, 0], sizes = [8, 8], strides = [1, 1]} : vector<16x32xf32> to vector<8x8xf32>
    %134 = tpu.transpose %132, [1, 0] : vector<8x8xf32> -> vector<8x8xf32>
    %cst_47 = arith.constant dense<0.000000e+00> : vector<8x8xf32>
    %135 = tpu.matmul %131, %134, %cst_47 {dimension_numbers = #tpu.dot_dimension_numbers<[1], [0], [0], [1], [0, 0, 1, 1], [], []>} : vector<8x8xf32>, vector<8x8xf32>, vector<8x8xf32> -> vector<8x8xf32>
    %cst_48 = arith.constant 0.353553385 : f32
    %136 = vector.broadcast %cst_48 : f32 to vector<8x8xf32>
    %137 = arith.mulf %135, %136 : vector<8x8xf32>
    %138 = vector.broadcast %130 : vector<1x8xf32> to vector<8x8xf32>
    %139 = arith.addf %137, %138 : vector<8x8xf32>
    %cst_49 = arith.constant dense<0xFF800000> : vector<8xf32>
    %140 = vector.multi_reduction <maximumf>, %139, %cst_49 [1] : vector<8x8xf32> to vector<8xf32>
    %141 = vector.shape_cast %140 : vector<8xf32> to vector<8x1xf32>
    %142 = vector.broadcast %141 : vector<8x1xf32> to vector<8x8xf32>
    %143 = arith.subf %139, %142 : vector<8x8xf32>
    %144 = math.exp %143 : vector<8x8xf32>
    %cst_50 = arith.constant dense<0.000000e+00> : vector<8xf32>
    %145 = vector.multi_reduction <add>, %144, %cst_50 [1] : vector<8x8xf32> to vector<8xf32>
    %146 = vector.shape_cast %145 : vector<8xf32> to vector<8x1xf32>
    %147 = vector.broadcast %146 : vector<8x1xf32> to vector<8x8xf32>
    %148 = arith.divf %144, %147 : vector<8x8xf32>
    %cst_51 = arith.constant dense<0.000000e+00> : vector<8x8xf32>
    %149 = tpu.matmul %148, %133, %cst_51 {dimension_numbers = #tpu.dot_dimension_numbers<[1], [0], [0], [1], [0, 0, 1, 1], [], []>} : vector<8x8xf32>, vector<8x8xf32>, vector<8x8xf32> -> vector<8x8xf32>
    %150 = vector.extract_strided_slice %41 {offsets = [0, 0], sizes = [8, 32], strides = [1, 1]} : vector<32x32xf32> to vector<8x32xf32>
    %cst_52 = arith.constant dense<0.000000e+00> : vector<8x32xf32>
    %151 = tpu.matmul %149, %150, %cst_52 {dimension_numbers = #tpu.dot_dimension_numbers<[1], [0], [0], [1], [0, 0, 1, 1], [], []>} : vector<8x8xf32>, vector<8x32xf32>, vector<8x32xf32> -> vector<8x32xf32>
    %152 = vector.extract_strided_slice %37 {offsets = [8, 8], sizes = [8, 8], strides = [1, 1]} : vector<16x32xf32> to vector<8x8xf32>
    %153 = vector.extract_strided_slice %38 {offsets = [8, 8], sizes = [8, 8], strides = [1, 1]} : vector<16x32xf32> to vector<8x8xf32>
    %154 = vector.extract_strided_slice %39 {offsets = [8, 8], sizes = [8, 8], strides = [1, 1]} : vector<16x32xf32> to vector<8x8xf32>
    %155 = tpu.transpose %153, [1, 0] : vector<8x8xf32> -> vector<8x8xf32>
    %cst_53 = arith.constant dense<0.000000e+00> : vector<8x8xf32>
    %156 = tpu.matmul %152, %155, %cst_53 {dimension_numbers = #tpu.dot_dimension_numbers<[1], [0], [0], [1], [0, 0, 1, 1], [], []>} : vector<8x8xf32>, vector<8x8xf32>, vector<8x8xf32> -> vector<8x8xf32>
    %cst_54 = arith.constant 0.353553385 : f32
    %157 = vector.broadcast %cst_54 : f32 to vector<8x8xf32>
    %158 = arith.mulf %156, %157 : vector<8x8xf32>
    %159 = vector.broadcast %130 : vector<1x8xf32> to vector<8x8xf32>
    %160 = arith.addf %158, %159 : vector<8x8xf32>
    %cst_55 = arith.constant dense<0xFF800000> : vector<8xf32>
    %161 = vector.multi_reduction <maximumf>, %160, %cst_55 [1] : vector<8x8xf32> to vector<8xf32>
    %162 = vector.shape_cast %161 : vector<8xf32> to vector<8x1xf32>
    %163 = vector.broadcast %162 : vector<8x1xf32> to vector<8x8xf32>
    %164 = arith.subf %160, %163 : vector<8x8xf32>
    %165 = math.exp %164 : vector<8x8xf32>
    %cst_56 = arith.constant dense<0.000000e+00> : vector<8xf32>
    %166 = vector.multi_reduction <add>, %165, %cst_56 [1] : vector<8x8xf32> to vector<8xf32>
    %167 = vector.shape_cast %166 : vector<8xf32> to vector<8x1xf32>
    %168 = vector.broadcast %167 : vector<8x1xf32> to vector<8x8xf32>
    %169 = arith.divf %165, %168 : vector<8x8xf32>
    %cst_57 = arith.constant dense<0.000000e+00> : vector<8x8xf32>
    %170 = tpu.matmul %169, %154, %cst_57 {dimension_numbers = #tpu.dot_dimension_numbers<[1], [0], [0], [1], [0, 0, 1, 1], [], []>} : vector<8x8xf32>, vector<8x8xf32>, vector<8x8xf32> -> vector<8x8xf32>
    %171 = vector.extract_strided_slice %41 {offsets = [8, 0], sizes = [8, 32], strides = [1, 1]} : vector<32x32xf32> to vector<8x32xf32>
    %cst_58 = arith.constant dense<0.000000e+00> : vector<8x32xf32>
    %172 = tpu.matmul %170, %171, %cst_58 {dimension_numbers = #tpu.dot_dimension_numbers<[1], [0], [0], [1], [0, 0, 1, 1], [], []>} : vector<8x8xf32>, vector<8x32xf32>, vector<8x32xf32> -> vector<8x32xf32>
    %173 = arith.addf %151, %172 : vector<8x32xf32>
    %174 = vector.extract_strided_slice %37 {offsets = [8, 16], sizes = [8, 8], strides = [1, 1]} : vector<16x32xf32> to vector<8x8xf32>
    %175 = vector.extract_strided_slice %38 {offsets = [8, 16], sizes = [8, 8], strides = [1, 1]} : vector<16x32xf32> to vector<8x8xf32>
    %176 = vector.extract_strided_slice %39 {offsets = [8, 16], sizes = [8, 8], strides = [1, 1]} : vector<16x32xf32> to vector<8x8xf32>
    %177 = tpu.transpose %175, [1, 0] : vector<8x8xf32> -> vector<8x8xf32>
    %cst_59 = arith.constant dense<0.000000e+00> : vector<8x8xf32>
    %178 = tpu.matmul %174, %177, %cst_59 {dimension_numbers = #tpu.dot_dimension_numbers<[1], [0], [0], [1], [0, 0, 1, 1], [], []>} : vector<8x8xf32>, vector<8x8xf32>, vector<8x8xf32> -> vector<8x8xf32>
    %cst_60 = arith.constant 0.353553385 : f32
    %179 = vector.broadcast %cst_60 : f32 to vector<8x8xf32>
    %180 = arith.mulf %178, %179 : vector<8x8xf32>
    %181 = vector.broadcast %130 : vector<1x8xf32> to vector<8x8xf32>
    %182 = arith.addf %180, %181 : vector<8x8xf32>
    %cst_61 = arith.constant dense<0xFF800000> : vector<8xf32>
    %183 = vector.multi_reduction <maximumf>, %182, %cst_61 [1] : vector<8x8xf32> to vector<8xf32>
    %184 = vector.shape_cast %183 : vector<8xf32> to vector<8x1xf32>
    %185 = vector.broadcast %184 : vector<8x1xf32> to vector<8x8xf32>
    %186 = arith.subf %182, %185 : vector<8x8xf32>
    %187 = math.exp %186 : vector<8x8xf32>
    %cst_62 = arith.constant dense<0.000000e+00> : vector<8xf32>
    %188 = vector.multi_reduction <add>, %187, %cst_62 [1] : vector<8x8xf32> to vector<8xf32>
    %189 = vector.shape_cast %188 : vector<8xf32> to vector<8x1xf32>
    %190 = vector.broadcast %189 : vector<8x1xf32> to vector<8x8xf32>
    %191 = arith.divf %187, %190 : vector<8x8xf32>
    %cst_63 = arith.constant dense<0.000000e+00> : vector<8x8xf32>
    %192 = tpu.matmul %191, %176, %cst_63 {dimension_numbers = #tpu.dot_dimension_numbers<[1], [0], [0], [1], [0, 0, 1, 1], [], []>} : vector<8x8xf32>, vector<8x8xf32>, vector<8x8xf32> -> vector<8x8xf32>
    %193 = vector.extract_strided_slice %41 {offsets = [16, 0], sizes = [8, 32], strides = [1, 1]} : vector<32x32xf32> to vector<8x32xf32>
    %cst_64 = arith.constant dense<0.000000e+00> : vector<8x32xf32>
    %194 = tpu.matmul %192, %193, %cst_64 {dimension_numbers = #tpu.dot_dimension_numbers<[1], [0], [0], [1], [0, 0, 1, 1], [], []>} : vector<8x8xf32>, vector<8x32xf32>, vector<8x32xf32> -> vector<8x32xf32>
    %195 = arith.addf %173, %194 : vector<8x32xf32>
    %196 = vector.extract_strided_slice %37 {offsets = [8, 24], sizes = [8, 8], strides = [1, 1]} : vector<16x32xf32> to vector<8x8xf32>
    %197 = vector.extract_strided_slice %38 {offsets = [8, 24], sizes = [8, 8], strides = [1, 1]} : vector<16x32xf32> to vector<8x8xf32>
    %198 = vector.extract_strided_slice %39 {offsets = [8, 24], sizes = [8, 8], strides = [1, 1]} : vector<16x32xf32> to vector<8x8xf32>
    %199 = tpu.transpose %197, [1, 0] : vector<8x8xf32> -> vector<8x8xf32>
    %cst_65 = arith.constant dense<0.000000e+00> : vector<8x8xf32>
    %200 = tpu.matmul %196, %199, %cst_65 {dimension_numbers = #tpu.dot_dimension_numbers<[1], [0], [0], [1], [0, 0, 1, 1], [], []>} : vector<8x8xf32>, vector<8x8xf32>, vector<8x8xf32> -> vector<8x8xf32>
    %cst_66 = arith.constant 0.353553385 : f32
    %201 = vector.broadcast %cst_66 : f32 to vector<8x8xf32>
    %202 = arith.mulf %200, %201 : vector<8x8xf32>
    %203 = vector.broadcast %130 : vector<1x8xf32> to vector<8x8xf32>
    %204 = arith.addf %202, %203 : vector<8x8xf32>
    %cst_67 = arith.constant dense<0xFF800000> : vector<8xf32>
    %205 = vector.multi_reduction <maximumf>, %204, %cst_67 [1] : vector<8x8xf32> to vector<8xf32>
    %206 = vector.shape_cast %205 : vector<8xf32> to vector<8x1xf32>
    %207 = vector.broadcast %206 : vector<8x1xf32> to vector<8x8xf32>
    %208 = arith.subf %204, %207 : vector<8x8xf32>
    %209 = math.exp %208 : vector<8x8xf32>
    %cst_68 = arith.constant dense<0.000000e+00> : vector<8xf32>
    %210 = vector.multi_reduction <add>, %209, %cst_68 [1] : vector<8x8xf32> to vector<8xf32>
    %211 = vector.shape_cast %210 : vector<8xf32> to vector<8x1xf32>
    %212 = vector.broadcast %211 : vector<8x1xf32> to vector<8x8xf32>
    %213 = arith.divf %209, %212 : vector<8x8xf32>
    %cst_69 = arith.constant dense<0.000000e+00> : vector<8x8xf32>
    %214 = tpu.matmul %213, %198, %cst_69 {dimension_numbers = #tpu.dot_dimension_numbers<[1], [0], [0], [1], [0, 0, 1, 1], [], []>} : vector<8x8xf32>, vector<8x8xf32>, vector<8x8xf32> -> vector<8x8xf32>
    %215 = vector.extract_strided_slice %41 {offsets = [24, 0], sizes = [8, 32], strides = [1, 1]} : vector<32x32xf32> to vector<8x32xf32>
    %cst_70 = arith.constant dense<0.000000e+00> : vector<8x32xf32>
    %216 = tpu.matmul %214, %215, %cst_70 {dimension_numbers = #tpu.dot_dimension_numbers<[1], [0], [0], [1], [0, 0, 1, 1], [], []>} : vector<8x8xf32>, vector<8x32xf32>, vector<8x32xf32> -> vector<8x32xf32>
    %217 = arith.addf %195, %216 : vector<8x32xf32>
    %218 = tpu.concatenate %129, %217 in 0 : vector<8x32xf32>, vector<8x32xf32> -> vector<16x32xf32>
    %c0_71 = arith.constant 0 : index
    %c0_72 = arith.constant 0 : index
    %c0_73 = arith.constant 0 : index
    %219 = vector.load %arg7[%c0_71, %c0_72, %c0_73] : memref<2x1x32xf32, #tpu.memory_space<vmem>>, vector<1x1x32xf32>
    %220 = vector.shape_cast %219 : vector<1x1x32xf32> to vector<1x32xf32>
    %221 = vector.broadcast %220 : vector<1x32xf32> to vector<16x32xf32>
    %222 = arith.addf %218, %221 : vector<16x32xf32>
    %223 = arith.addf %24, %222 : vector<16x32xf32>
    %c0_74 = arith.constant 0 : index
    %c0_75 = arith.constant 0 : index
    %c0_76 = arith.constant 0 : index
    %224 = vector.load %arg8[%c0_74, %c0_75, %c0_76] : memref<2x1x32xf32, #tpu.memory_space<vmem>>, vector<1x1x32xf32>
    %225 = vector.shape_cast %224 : vector<1x1x32xf32> to vector<1x32xf32>
    %c0_77 = arith.constant 0 : index
    %c0_78 = arith.constant 0 : index
    %c0_79 = arith.constant 0 : index
    %226 = vector.load %arg9[%c0_77, %c0_78, %c0_79] : memref<2x1x32xf32, #tpu.memory_space<vmem>>, vector<1x1x32xf32>
    %227 = vector.shape_cast %226 : vector<1x1x32xf32> to vector<1x32xf32>
    %cst_80 = arith.constant dense<0.000000e+00> : vector<16xf32>
    %228 = vector.multi_reduction <add>, %223, %cst_80 [1] : vector<16x32xf32> to vector<16xf32>
    %229 = vector.shape_cast %228 : vector<16xf32> to vector<16x1xf32>
    %cst_81 = arith.constant 3.200000e+01 : f32
    %230 = vector.broadcast %cst_81 : f32 to vector<16x1xf32>
    %231 = arith.divf %229, %230 : vector<16x1xf32>
    %232 = vector.broadcast %231 : vector<16x1xf32> to vector<16x32xf32>
    %233 = arith.subf %223, %232 : vector<16x32xf32>
    %234 = arith.mulf %233, %233 : vector<16x32xf32>
    %cst_82 = arith.constant dense<0.000000e+00> : vector<16xf32>
    %235 = vector.multi_reduction <add>, %234, %cst_82 [1] : vector<16x32xf32> to vector<16xf32>
    %236 = vector.shape_cast %235 : vector<16xf32> to vector<16x1xf32>
    %cst_83 = arith.constant 3.200000e+01 : f32
    %237 = vector.broadcast %cst_83 : f32 to vector<16x1xf32>
    %238 = arith.divf %236, %237 : vector<16x1xf32>
    %239 = vector.broadcast %231 : vector<16x1xf32> to vector<16x32xf32>
    %240 = arith.subf %223, %239 : vector<16x32xf32>
    %cst_84 = arith.constant 9.99999996E-13 : f32
    %241 = vector.broadcast %cst_84 : f32 to vector<16x1xf32>
    %242 = arith.addf %238, %241 : vector<16x1xf32>
    %243 = math.rsqrt %242 : vector<16x1xf32>
    %244 = vector.broadcast %243 : vector<16x1xf32> to vector<16x32xf32>
    %245 = arith.mulf %240, %244 : vector<16x32xf32>
    %246 = vector.broadcast %225 : vector<1x32xf32> to vector<16x32xf32>
    %247 = arith.mulf %245, %246 : vector<16x32xf32>
    %248 = vector.broadcast %227 : vector<1x32xf32> to vector<16x32xf32>
    %249 = arith.addf %247, %248 : vector<16x32xf32>
    %c0_85 = arith.constant 0 : index
    %c0_86 = arith.constant 0 : index
    %c0_87 = arith.constant 0 : index
    %250 = vector.load %arg10[%c0_85, %c0_86, %c0_87] : memref<2x32x64xf32, #tpu.memory_space<vmem>>, vector<1x32x64xf32>
    %251 = vector.shape_cast %250 : vector<1x32x64xf32> to vector<32x64xf32>
    %cst_88 = arith.constant dense<0.000000e+00> : vector<16x64xf32>
    %252 = tpu.matmul %249, %251, %cst_88 {dimension_numbers = #tpu.dot_dimension_numbers<[1], [0], [0], [1], [0, 0, 1, 1], [], []>} : vector<16x32xf32>, vector<32x64xf32>, vector<16x64xf32> -> vector<16x64xf32>
    %c0_89 = arith.constant 0 : index
    %c0_90 = arith.constant 0 : index
    %c0_91 = arith.constant 0 : index
    %253 = vector.load %arg11[%c0_89, %c0_90, %c0_91] : memref<2x1x64xf32, #tpu.memory_space<vmem>>, vector<1x1x64xf32>
    %254 = vector.shape_cast %253 : vector<1x1x64xf32> to vector<1x64xf32>
    %255 = vector.broadcast %254 : vector<1x64xf32> to vector<16x64xf32>
    %256 = arith.addf %252, %255 : vector<16x64xf32>
    %257 = arith.mulf %256, %256 : vector<16x64xf32>
    %258 = arith.mulf %256, %257 : vector<16x64xf32>
    %cst_92 = arith.constant 4.471500e-02 : f32
    %259 = vector.broadcast %cst_92 : f32 to vector<16x64xf32>
    %260 = arith.mulf %259, %258 : vector<16x64xf32>
    %261 = arith.addf %256, %260 : vector<16x64xf32>
    %cst_93 = arith.constant 0.797884583 : f32
    %262 = vector.broadcast %cst_93 : f32 to vector<16x64xf32>
    %263 = arith.mulf %262, %261 : vector<16x64xf32>
    %264 = math.tanh %263 : vector<16x64xf32>
    %cst_94 = arith.constant 1.000000e+00 : f32
    %265 = vector.broadcast %cst_94 : f32 to vector<16x64xf32>
    %266 = arith.addf %265, %264 : vector<16x64xf32>
    %cst_95 = arith.constant 5.000000e-01 : f32
    %267 = vector.broadcast %cst_95 : f32 to vector<16x64xf32>
    %268 = arith.mulf %267, %266 : vector<16x64xf32>
    %269 = arith.mulf %256, %268 : vector<16x64xf32>
    %c0_96 = arith.constant 0 : index
    %c0_97 = arith.constant 0 : index
    %c0_98 = arith.constant 0 : index
    %270 = vector.load %arg12[%c0_96, %c0_97, %c0_98] : memref<2x64x32xf32, #tpu.memory_space<vmem>>, vector<1x64x32xf32>
    %271 = vector.shape_cast %270 : vector<1x64x32xf32> to vector<64x32xf32>
    %cst_99 = arith.constant dense<0.000000e+00> : vector<16x32xf32>
    %272 = tpu.matmul %269, %271, %cst_99 {dimension_numbers = #tpu.dot_dimension_numbers<[1], [0], [0], [1], [0, 0, 1, 1], [], []>} : vector<16x64xf32>, vector<64x32xf32>, vector<16x32xf32> -> vector<16x32xf32>
    %c0_100 = arith.constant 0 : index
    %c0_101 = arith.constant 0 : index
    %c0_102 = arith.constant 0 : index
    %273 = vector.load %arg13[%c0_100, %c0_101, %c0_102] : memref<2x1x32xf32, #tpu.memory_space<vmem>>, vector<1x1x32xf32>
    %274 = vector.shape_cast %273 : vector<1x1x32xf32> to vector<1x32xf32>
    %275 = vector.broadcast %274 : vector<1x32xf32> to vector<16x32xf32>
    %276 = arith.addf %272, %275 : vector<16x32xf32>
    %277 = arith.addf %249, %276 : vector<16x32xf32>
    %c0_103 = arith.constant 0 : index
    %c0_104 = arith.constant 0 : index
    %c0_105 = arith.constant 0 : index
    %278 = vector.load %arg14[%c0_103, %c0_104, %c0_105] : memref<2x1x32xf32, #tpu.memory_space<vmem>>, vector<1x1x32xf32>
    %279 = vector.shape_cast %278 : vector<1x1x32xf32> to vector<1x32xf32>
    %c0_106 = arith.constant 0 : index
    %c0_107 = arith.constant 0 : index
    %c0_108 = arith.constant 0 : index
    %280 = vector.load %arg15[%c0_106, %c0_107, %c0_108] : memref<2x1x32xf32, #tpu.memory_space<vmem>>, vector<1x1x32xf32>
    %281 = vector.shape_cast %280 : vector<1x1x32xf32> to vector<1x32xf32>
    %cst_109 = arith.constant dense<0.000000e+00> : vector<16xf32>
    %282 = vector.multi_reduction <add>, %277, %cst_109 [1] : vector<16x32xf32> to vector<16xf32>
    %283 = vector.shape_cast %282 : vector<16xf32> to vector<16x1xf32>
    %cst_110 = arith.constant 3.200000e+01 : f32
    %284 = vector.broadcast %cst_110 : f32 to vector<16x1xf32>
    %285 = arith.divf %283, %284 : vector<16x1xf32>
    %286 = vector.broadcast %285 : vector<16x1xf32> to vector<16x32xf32>
    %287 = arith.subf %277, %286 : vector<16x32xf32>
    %288 = arith.mulf %287, %287 : vector<16x32xf32>
    %cst_111 = arith.constant dense<0.000000e+00> : vector<16xf32>
    %289 = vector.multi_reduction <add>, %288, %cst_111 [1] : vector<16x32xf32> to vector<16xf32>
    %290 = vector.shape_cast %289 : vector<16xf32> to vector<16x1xf32>
    %cst_112 = arith.constant 3.200000e+01 : f32
    %291 = vector.broadcast %cst_112 : f32 to vector<16x1xf32>
    %292 = arith.divf %290, %291 : vector<16x1xf32>
    %293 = vector.broadcast %285 : vector<16x1xf32> to vector<16x32xf32>
    %294 = arith.subf %277, %293 : vector<16x32xf32>
    %cst_113 = arith.constant 9.99999996E-13 : f32
    %295 = vector.broadcast %cst_113 : f32 to vector<16x1xf32>
    %296 = arith.addf %292, %295 : vector<16x1xf32>
    %297 = math.rsqrt %296 : vector<16x1xf32>
    %298 = vector.broadcast %297 : vector<16x1xf32> to vector<16x32xf32>
    %299 = arith.mulf %294, %298 : vector<16x32xf32>
    %300 = vector.broadcast %279 : vector<1x32xf32> to vector<16x32xf32>
    %301 = arith.mulf %299, %300 : vector<16x32xf32>
    %302 = vector.broadcast %281 : vector<1x32xf32> to vector<16x32xf32>
    %303 = arith.addf %301, %302 : vector<16x32xf32>
    %c1 = arith.constant 1 : index
    %c0_114 = arith.constant 0 : index
    %c0_115 = arith.constant 0 : index
    %304 = vector.load %arg4[%c1, %c0_114, %c0_115] : memref<2x32x96xf32, #tpu.memory_space<vmem>>, vector<1x32x96xf32>
    %305 = vector.shape_cast %304 : vector<1x32x96xf32> to vector<32x96xf32>
    %cst_116 = arith.constant dense<0.000000e+00> : vector<16x96xf32>
    %306 = tpu.matmul %303, %305, %cst_116 {dimension_numbers = #tpu.dot_dimension_numbers<[1], [0], [0], [1], [0, 0, 1, 1], [], []>} : vector<16x32xf32>, vector<32x96xf32>, vector<16x96xf32> -> vector<16x96xf32>
    %c1_117 = arith.constant 1 : index
    %c0_118 = arith.constant 0 : index
    %c0_119 = arith.constant 0 : index
    %307 = vector.load %arg5[%c1_117, %c0_118, %c0_119] : memref<2x1x96xf32, #tpu.memory_space<vmem>>, vector<1x1x96xf32>
    %308 = vector.shape_cast %307 : vector<1x1x96xf32> to vector<1x96xf32>
    %309 = vector.broadcast %308 : vector<1x96xf32> to vector<16x96xf32>
    %310 = arith.addf %306, %309 : vector<16x96xf32>
    %311 = vector.extract_strided_slice %310 {offsets = [0, 0], sizes = [16, 32], strides = [1, 1]} : vector<16x96xf32> to vector<16x32xf32>
    %312 = vector.extract_strided_slice %310 {offsets = [0, 32], sizes = [16, 32], strides = [1, 1]} : vector<16x96xf32> to vector<16x32xf32>
    %313 = vector.extract_strided_slice %310 {offsets = [0, 64], sizes = [16, 32], strides = [1, 1]} : vector<16x96xf32> to vector<16x32xf32>
    %c1_120 = arith.constant 1 : index
    %c0_121 = arith.constant 0 : index
    %c0_122 = arith.constant 0 : index
    %314 = vector.load %arg6[%c1_120, %c0_121, %c0_122] : memref<2x32x32xf32, #tpu.memory_space<vmem>>, vector<1x32x32xf32>
    %315 = vector.shape_cast %314 : vector<1x32x32xf32> to vector<32x32xf32>
    %316 = vector.extract_strided_slice %29 {offsets = [0, 0], sizes = [1, 8], strides = [1, 1]} : vector<2x8xf32> to vector<1x8xf32>
    %317 = vector.extract_strided_slice %311 {offsets = [0, 0], sizes = [8, 8], strides = [1, 1]} : vector<16x32xf32> to vector<8x8xf32>
    %318 = vector.extract_strided_slice %312 {offsets = [0, 0], sizes = [8, 8], strides = [1, 1]} : vector<16x32xf32> to vector<8x8xf32>
    %319 = vector.extract_strided_slice %313 {offsets = [0, 0], sizes = [8, 8], strides = [1, 1]} : vector<16x32xf32> to vector<8x8xf32>
    %320 = tpu.transpose %318, [1, 0] : vector<8x8xf32> -> vector<8x8xf32>
    %cst_123 = arith.constant dense<0.000000e+00> : vector<8x8xf32>
    %321 = tpu.matmul %317, %320, %cst_123 {dimension_numbers = #tpu.dot_dimension_numbers<[1], [0], [0], [1], [0, 0, 1, 1], [], []>} : vector<8x8xf32>, vector<8x8xf32>, vector<8x8xf32> -> vector<8x8xf32>
    %cst_124 = arith.constant 0.353553385 : f32
    %322 = vector.broadcast %cst_124 : f32 to vector<8x8xf32>
    %323 = arith.mulf %321, %322 : vector<8x8xf32>
    %324 = vector.broadcast %316 : vector<1x8xf32> to vector<8x8xf32>
    %325 = arith.addf %323, %324 : vector<8x8xf32>
    %cst_125 = arith.constant dense<0xFF800000> : vector<8xf32>
    %326 = vector.multi_reduction <maximumf>, %325, %cst_125 [1] : vector<8x8xf32> to vector<8xf32>
    %327 = vector.shape_cast %326 : vector<8xf32> to vector<8x1xf32>
    %328 = vector.broadcast %327 : vector<8x1xf32> to vector<8x8xf32>
    %329 = arith.subf %325, %328 : vector<8x8xf32>
    %330 = math.exp %329 : vector<8x8xf32>
    %cst_126 = arith.constant dense<0.000000e+00> : vector<8xf32>
    %331 = vector.multi_reduction <add>, %330, %cst_126 [1] : vector<8x8xf32> to vector<8xf32>
    %332 = vector.shape_cast %331 : vector<8xf32> to vector<8x1xf32>
    %333 = vector.broadcast %332 : vector<8x1xf32> to vector<8x8xf32>
    %334 = arith.divf %330, %333 : vector<8x8xf32>
    %cst_127 = arith.constant dense<0.000000e+00> : vector<8x8xf32>
    %335 = tpu.matmul %334, %319, %cst_127 {dimension_numbers = #tpu.dot_dimension_numbers<[1], [0], [0], [1], [0, 0, 1, 1], [], []>} : vector<8x8xf32>, vector<8x8xf32>, vector<8x8xf32> -> vector<8x8xf32>
    %336 = vector.extract_strided_slice %315 {offsets = [0, 0], sizes = [8, 32], strides = [1, 1]} : vector<32x32xf32> to vector<8x32xf32>
    %cst_128 = arith.constant dense<0.000000e+00> : vector<8x32xf32>
    %337 = tpu.matmul %335, %336, %cst_128 {dimension_numbers = #tpu.dot_dimension_numbers<[1], [0], [0], [1], [0, 0, 1, 1], [], []>} : vector<8x8xf32>, vector<8x32xf32>, vector<8x32xf32> -> vector<8x32xf32>
    %338 = vector.extract_strided_slice %311 {offsets = [0, 8], sizes = [8, 8], strides = [1, 1]} : vector<16x32xf32> to vector<8x8xf32>
    %339 = vector.extract_strided_slice %312 {offsets = [0, 8], sizes = [8, 8], strides = [1, 1]} : vector<16x32xf32> to vector<8x8xf32>
    %340 = vector.extract_strided_slice %313 {offsets = [0, 8], sizes = [8, 8], strides = [1, 1]} : vector<16x32xf32> to vector<8x8xf32>
    %341 = tpu.transpose %339, [1, 0] : vector<8x8xf32> -> vector<8x8xf32>
    %cst_129 = arith.constant dense<0.000000e+00> : vector<8x8xf32>
    %342 = tpu.matmul %338, %341, %cst_129 {dimension_numbers = #tpu.dot_dimension_numbers<[1], [0], [0], [1], [0, 0, 1, 1], [], []>} : vector<8x8xf32>, vector<8x8xf32>, vector<8x8xf32> -> vector<8x8xf32>
    %cst_130 = arith.constant 0.353553385 : f32
    %343 = vector.broadcast %cst_130 : f32 to vector<8x8xf32>
    %344 = arith.mulf %342, %343 : vector<8x8xf32>
    %345 = vector.broadcast %316 : vector<1x8xf32> to vector<8x8xf32>
    %346 = arith.addf %344, %345 : vector<8x8xf32>
    %cst_131 = arith.constant dense<0xFF800000> : vector<8xf32>
    %347 = vector.multi_reduction <maximumf>, %346, %cst_131 [1] : vector<8x8xf32> to vector<8xf32>
    %348 = vector.shape_cast %347 : vector<8xf32> to vector<8x1xf32>
    %349 = vector.broadcast %348 : vector<8x1xf32> to vector<8x8xf32>
    %350 = arith.subf %346, %349 : vector<8x8xf32>
    %351 = math.exp %350 : vector<8x8xf32>
    %cst_132 = arith.constant dense<0.000000e+00> : vector<8xf32>
    %352 = vector.multi_reduction <add>, %351, %cst_132 [1] : vector<8x8xf32> to vector<8xf32>
    %353 = vector.shape_cast %352 : vector<8xf32> to vector<8x1xf32>
    %354 = vector.broadcast %353 : vector<8x1xf32> to vector<8x8xf32>
    %355 = arith.divf %351, %354 : vector<8x8xf32>
    %cst_133 = arith.constant dense<0.000000e+00> : vector<8x8xf32>
    %356 = tpu.matmul %355, %340, %cst_133 {dimension_numbers = #tpu.dot_dimension_numbers<[1], [0], [0], [1], [0, 0, 1, 1], [], []>} : vector<8x8xf32>, vector<8x8xf32>, vector<8x8xf32> -> vector<8x8xf32>
    %357 = vector.extract_strided_slice %315 {offsets = [8, 0], sizes = [8, 32], strides = [1, 1]} : vector<32x32xf32> to vector<8x32xf32>
    %cst_134 = arith.constant dense<0.000000e+00> : vector<8x32xf32>
    %358 = tpu.matmul %356, %357, %cst_134 {dimension_numbers = #tpu.dot_dimension_numbers<[1], [0], [0], [1], [0, 0, 1, 1], [], []>} : vector<8x8xf32>, vector<8x32xf32>, vector<8x32xf32> -> vector<8x32xf32>
    %359 = arith.addf %337, %358 : vector<8x32xf32>
    %360 = vector.extract_strided_slice %311 {offsets = [0, 16], sizes = [8, 8], strides = [1, 1]} : vector<16x32xf32> to vector<8x8xf32>
    %361 = vector.extract_strided_slice %312 {offsets = [0, 16], sizes = [8, 8], strides = [1, 1]} : vector<16x32xf32> to vector<8x8xf32>
    %362 = vector.extract_strided_slice %313 {offsets = [0, 16], sizes = [8, 8], strides = [1, 1]} : vector<16x32xf32> to vector<8x8xf32>
    %363 = tpu.transpose %361, [1, 0] : vector<8x8xf32> -> vector<8x8xf32>
    %cst_135 = arith.constant dense<0.000000e+00> : vector<8x8xf32>
    %364 = tpu.matmul %360, %363, %cst_135 {dimension_numbers = #tpu.dot_dimension_numbers<[1], [0], [0], [1], [0, 0, 1, 1], [], []>} : vector<8x8xf32>, vector<8x8xf32>, vector<8x8xf32> -> vector<8x8xf32>
    %cst_136 = arith.constant 0.353553385 : f32
    %365 = vector.broadcast %cst_136 : f32 to vector<8x8xf32>
    %366 = arith.mulf %364, %365 : vector<8x8xf32>
    %367 = vector.broadcast %316 : vector<1x8xf32> to vector<8x8xf32>
    %368 = arith.addf %366, %367 : vector<8x8xf32>
    %cst_137 = arith.constant dense<0xFF800000> : vector<8xf32>
    %369 = vector.multi_reduction <maximumf>, %368, %cst_137 [1] : vector<8x8xf32> to vector<8xf32>
    %370 = vector.shape_cast %369 : vector<8xf32> to vector<8x1xf32>
    %371 = vector.broadcast %370 : vector<8x1xf32> to vector<8x8xf32>
    %372 = arith.subf %368, %371 : vector<8x8xf32>
    %373 = math.exp %372 : vector<8x8xf32>
    %cst_138 = arith.constant dense<0.000000e+00> : vector<8xf32>
    %374 = vector.multi_reduction <add>, %373, %cst_138 [1] : vector<8x8xf32> to vector<8xf32>
    %375 = vector.shape_cast %374 : vector<8xf32> to vector<8x1xf32>
    %376 = vector.broadcast %375 : vector<8x1xf32> to vector<8x8xf32>
    %377 = arith.divf %373, %376 : vector<8x8xf32>
    %cst_139 = arith.constant dense<0.000000e+00> : vector<8x8xf32>
    %378 = tpu.matmul %377, %362, %cst_139 {dimension_numbers = #tpu.dot_dimension_numbers<[1], [0], [0], [1], [0, 0, 1, 1], [], []>} : vector<8x8xf32>, vector<8x8xf32>, vector<8x8xf32> -> vector<8x8xf32>
    %379 = vector.extract_strided_slice %315 {offsets = [16, 0], sizes = [8, 32], strides = [1, 1]} : vector<32x32xf32> to vector<8x32xf32>
    %cst_140 = arith.constant dense<0.000000e+00> : vector<8x32xf32>
    %380 = tpu.matmul %378, %379, %cst_140 {dimension_numbers = #tpu.dot_dimension_numbers<[1], [0], [0], [1], [0, 0, 1, 1], [], []>} : vector<8x8xf32>, vector<8x32xf32>, vector<8x32xf32> -> vector<8x32xf32>
    %381 = arith.addf %359, %380 : vector<8x32xf32>
    %382 = vector.extract_strided_slice %311 {offsets = [0, 24], sizes = [8, 8], strides = [1, 1]} : vector<16x32xf32> to vector<8x8xf32>
    %383 = vector.extract_strided_slice %312 {offsets = [0, 24], sizes = [8, 8], strides = [1, 1]} : vector<16x32xf32> to vector<8x8xf32>
    %384 = vector.extract_strided_slice %313 {offsets = [0, 24], sizes = [8, 8], strides = [1, 1]} : vector<16x32xf32> to vector<8x8xf32>
    %385 = tpu.transpose %383, [1, 0] : vector<8x8xf32> -> vector<8x8xf32>
    %cst_141 = arith.constant dense<0.000000e+00> : vector<8x8xf32>
    %386 = tpu.matmul %382, %385, %cst_141 {dimension_numbers = #tpu.dot_dimension_numbers<[1], [0], [0], [1], [0, 0, 1, 1], [], []>} : vector<8x8xf32>, vector<8x8xf32>, vector<8x8xf32> -> vector<8x8xf32>
    %cst_142 = arith.constant 0.353553385 : f32
    %387 = vector.broadcast %cst_142 : f32 to vector<8x8xf32>
    %388 = arith.mulf %386, %387 : vector<8x8xf32>
    %389 = vector.broadcast %316 : vector<1x8xf32> to vector<8x8xf32>
    %390 = arith.addf %388, %389 : vector<8x8xf32>
    %cst_143 = arith.constant dense<0xFF800000> : vector<8xf32>
    %391 = vector.multi_reduction <maximumf>, %390, %cst_143 [1] : vector<8x8xf32> to vector<8xf32>
    %392 = vector.shape_cast %391 : vector<8xf32> to vector<8x1xf32>
    %393 = vector.broadcast %392 : vector<8x1xf32> to vector<8x8xf32>
    %394 = arith.subf %390, %393 : vector<8x8xf32>
    %395 = math.exp %394 : vector<8x8xf32>
    %cst_144 = arith.constant dense<0.000000e+00> : vector<8xf32>
    %396 = vector.multi_reduction <add>, %395, %cst_144 [1] : vector<8x8xf32> to vector<8xf32>
    %397 = vector.shape_cast %396 : vector<8xf32> to vector<8x1xf32>
    %398 = vector.broadcast %397 : vector<8x1xf32> to vector<8x8xf32>
    %399 = arith.divf %395, %398 : vector<8x8xf32>
    %cst_145 = arith.constant dense<0.000000e+00> : vector<8x8xf32>
    %400 = tpu.matmul %399, %384, %cst_145 {dimension_numbers = #tpu.dot_dimension_numbers<[1], [0], [0], [1], [0, 0, 1, 1], [], []>} : vector<8x8xf32>, vector<8x8xf32>, vector<8x8xf32> -> vector<8x8xf32>
    %401 = vector.extract_strided_slice %315 {offsets = [24, 0], sizes = [8, 32], strides = [1, 1]} : vector<32x32xf32> to vector<8x32xf32>
    %cst_146 = arith.constant dense<0.000000e+00> : vector<8x32xf32>
    %402 = tpu.matmul %400, %401, %cst_146 {dimension_numbers = #tpu.dot_dimension_numbers<[1], [0], [0], [1], [0, 0, 1, 1], [], []>} : vector<8x8xf32>, vector<8x32xf32>, vector<8x32xf32> -> vector<8x32xf32>
    %403 = arith.addf %381, %402 : vector<8x32xf32>
    %404 = vector.extract_strided_slice %29 {offsets = [1, 0], sizes = [1, 8], strides = [1, 1]} : vector<2x8xf32> to vector<1x8xf32>
    %405 = vector.extract_strided_slice %311 {offsets = [8, 0], sizes = [8, 8], strides = [1, 1]} : vector<16x32xf32> to vector<8x8xf32>
    %406 = vector.extract_strided_slice %312 {offsets = [8, 0], sizes = [8, 8], strides = [1, 1]} : vector<16x32xf32> to vector<8x8xf32>
    %407 = vector.extract_strided_slice %313 {offsets = [8, 0], sizes = [8, 8], strides = [1, 1]} : vector<16x32xf32> to vector<8x8xf32>
    %408 = tpu.transpose %406, [1, 0] : vector<8x8xf32> -> vector<8x8xf32>
    %cst_147 = arith.constant dense<0.000000e+00> : vector<8x8xf32>
    %409 = tpu.matmul %405, %408, %cst_147 {dimension_numbers = #tpu.dot_dimension_numbers<[1], [0], [0], [1], [0, 0, 1, 1], [], []>} : vector<8x8xf32>, vector<8x8xf32>, vector<8x8xf32> -> vector<8x8xf32>
    %cst_148 = arith.constant 0.353553385 : f32
    %410 = vector.broadcast %cst_148 : f32 to vector<8x8xf32>
    %411 = arith.mulf %409, %410 : vector<8x8xf32>
    %412 = vector.broadcast %404 : vector<1x8xf32> to vector<8x8xf32>
    %413 = arith.addf %411, %412 : vector<8x8xf32>
    %cst_149 = arith.constant dense<0xFF800000> : vector<8xf32>
    %414 = vector.multi_reduction <maximumf>, %413, %cst_149 [1] : vector<8x8xf32> to vector<8xf32>
    %415 = vector.shape_cast %414 : vector<8xf32> to vector<8x1xf32>
    %416 = vector.broadcast %415 : vector<8x1xf32> to vector<8x8xf32>
    %417 = arith.subf %413, %416 : vector<8x8xf32>
    %418 = math.exp %417 : vector<8x8xf32>
    %cst_150 = arith.constant dense<0.000000e+00> : vector<8xf32>
    %419 = vector.multi_reduction <add>, %418, %cst_150 [1] : vector<8x8xf32> to vector<8xf32>
    %420 = vector.shape_cast %419 : vector<8xf32> to vector<8x1xf32>
    %421 = vector.broadcast %420 : vector<8x1xf32> to vector<8x8xf32>
    %422 = arith.divf %418, %421 : vector<8x8xf32>
    %cst_151 = arith.constant dense<0.000000e+00> : vector<8x8xf32>
    %423 = tpu.matmul %422, %407, %cst_151 {dimension_numbers = #tpu.dot_dimension_numbers<[1], [0], [0], [1], [0, 0, 1, 1], [], []>} : vector<8x8xf32>, vector<8x8xf32>, vector<8x8xf32> -> vector<8x8xf32>
    %424 = vector.extract_strided_slice %315 {offsets = [0, 0], sizes = [8, 32], strides = [1, 1]} : vector<32x32xf32> to vector<8x32xf32>
    %cst_152 = arith.constant dense<0.000000e+00> : vector<8x32xf32>
    %425 = tpu.matmul %423, %424, %cst_152 {dimension_numbers = #tpu.dot_dimension_numbers<[1], [0], [0], [1], [0, 0, 1, 1], [], []>} : vector<8x8xf32>, vector<8x32xf32>, vector<8x32xf32> -> vector<8x32xf32>
    %426 = vector.extract_strided_slice %311 {offsets = [8, 8], sizes = [8, 8], strides = [1, 1]} : vector<16x32xf32> to vector<8x8xf32>
    %427 = vector.extract_strided_slice %312 {offsets = [8, 8], sizes = [8, 8], strides = [1, 1]} : vector<16x32xf32> to vector<8x8xf32>
    %428 = vector.extract_strided_slice %313 {offsets = [8, 8], sizes = [8, 8], strides = [1, 1]} : vector<16x32xf32> to vector<8x8xf32>
    %429 = tpu.transpose %427, [1, 0] : vector<8x8xf32> -> vector<8x8xf32>
    %cst_153 = arith.constant dense<0.000000e+00> : vector<8x8xf32>
    %430 = tpu.matmul %426, %429, %cst_153 {dimension_numbers = #tpu.dot_dimension_numbers<[1], [0], [0], [1], [0, 0, 1, 1], [], []>} : vector<8x8xf32>, vector<8x8xf32>, vector<8x8xf32> -> vector<8x8xf32>
    %cst_154 = arith.constant 0.353553385 : f32
    %431 = vector.broadcast %cst_154 : f32 to vector<8x8xf32>
    %432 = arith.mulf %430, %431 : vector<8x8xf32>
    %433 = vector.broadcast %404 : vector<1x8xf32> to vector<8x8xf32>
    %434 = arith.addf %432, %433 : vector<8x8xf32>
    %cst_155 = arith.constant dense<0xFF800000> : vector<8xf32>
    %435 = vector.multi_reduction <maximumf>, %434, %cst_155 [1] : vector<8x8xf32> to vector<8xf32>
    %436 = vector.shape_cast %435 : vector<8xf32> to vector<8x1xf32>
    %437 = vector.broadcast %436 : vector<8x1xf32> to vector<8x8xf32>
    %438 = arith.subf %434, %437 : vector<8x8xf32>
    %439 = math.exp %438 : vector<8x8xf32>
    %cst_156 = arith.constant dense<0.000000e+00> : vector<8xf32>
    %440 = vector.multi_reduction <add>, %439, %cst_156 [1] : vector<8x8xf32> to vector<8xf32>
    %441 = vector.shape_cast %440 : vector<8xf32> to vector<8x1xf32>
    %442 = vector.broadcast %441 : vector<8x1xf32> to vector<8x8xf32>
    %443 = arith.divf %439, %442 : vector<8x8xf32>
    %cst_157 = arith.constant dense<0.000000e+00> : vector<8x8xf32>
    %444 = tpu.matmul %443, %428, %cst_157 {dimension_numbers = #tpu.dot_dimension_numbers<[1], [0], [0], [1], [0, 0, 1, 1], [], []>} : vector<8x8xf32>, vector<8x8xf32>, vector<8x8xf32> -> vector<8x8xf32>
    %445 = vector.extract_strided_slice %315 {offsets = [8, 0], sizes = [8, 32], strides = [1, 1]} : vector<32x32xf32> to vector<8x32xf32>
    %cst_158 = arith.constant dense<0.000000e+00> : vector<8x32xf32>
    %446 = tpu.matmul %444, %445, %cst_158 {dimension_numbers = #tpu.dot_dimension_numbers<[1], [0], [0], [1], [0, 0, 1, 1], [], []>} : vector<8x8xf32>, vector<8x32xf32>, vector<8x32xf32> -> vector<8x32xf32>
    %447 = arith.addf %425, %446 : vector<8x32xf32>
    %448 = vector.extract_strided_slice %311 {offsets = [8, 16], sizes = [8, 8], strides = [1, 1]} : vector<16x32xf32> to vector<8x8xf32>
    %449 = vector.extract_strided_slice %312 {offsets = [8, 16], sizes = [8, 8], strides = [1, 1]} : vector<16x32xf32> to vector<8x8xf32>
    %450 = vector.extract_strided_slice %313 {offsets = [8, 16], sizes = [8, 8], strides = [1, 1]} : vector<16x32xf32> to vector<8x8xf32>
    %451 = tpu.transpose %449, [1, 0] : vector<8x8xf32> -> vector<8x8xf32>
    %cst_159 = arith.constant dense<0.000000e+00> : vector<8x8xf32>
    %452 = tpu.matmul %448, %451, %cst_159 {dimension_numbers = #tpu.dot_dimension_numbers<[1], [0], [0], [1], [0, 0, 1, 1], [], []>} : vector<8x8xf32>, vector<8x8xf32>, vector<8x8xf32> -> vector<8x8xf32>
    %cst_160 = arith.constant 0.353553385 : f32
    %453 = vector.broadcast %cst_160 : f32 to vector<8x8xf32>
    %454 = arith.mulf %452, %453 : vector<8x8xf32>
    %455 = vector.broadcast %404 : vector<1x8xf32> to vector<8x8xf32>
    %456 = arith.addf %454, %455 : vector<8x8xf32>
    %cst_161 = arith.constant dense<0xFF800000> : vector<8xf32>
    %457 = vector.multi_reduction <maximumf>, %456, %cst_161 [1] : vector<8x8xf32> to vector<8xf32>
    %458 = vector.shape_cast %457 : vector<8xf32> to vector<8x1xf32>
    %459 = vector.broadcast %458 : vector<8x1xf32> to vector<8x8xf32>
    %460 = arith.subf %456, %459 : vector<8x8xf32>
    %461 = math.exp %460 : vector<8x8xf32>
    %cst_162 = arith.constant dense<0.000000e+00> : vector<8xf32>
    %462 = vector.multi_reduction <add>, %461, %cst_162 [1] : vector<8x8xf32> to vector<8xf32>
    %463 = vector.shape_cast %462 : vector<8xf32> to vector<8x1xf32>
    %464 = vector.broadcast %463 : vector<8x1xf32> to vector<8x8xf32>
    %465 = arith.divf %461, %464 : vector<8x8xf32>
    %cst_163 = arith.constant dense<0.000000e+00> : vector<8x8xf32>
    %466 = tpu.matmul %465, %450, %cst_163 {dimension_numbers = #tpu.dot_dimension_numbers<[1], [0], [0], [1], [0, 0, 1, 1], [], []>} : vector<8x8xf32>, vector<8x8xf32>, vector<8x8xf32> -> vector<8x8xf32>
    %467 = vector.extract_strided_slice %315 {offsets = [16, 0], sizes = [8, 32], strides = [1, 1]} : vector<32x32xf32> to vector<8x32xf32>
    %cst_164 = arith.constant dense<0.000000e+00> : vector<8x32xf32>
    %468 = tpu.matmul %466, %467, %cst_164 {dimension_numbers = #tpu.dot_dimension_numbers<[1], [0], [0], [1], [0, 0, 1, 1], [], []>} : vector<8x8xf32>, vector<8x32xf32>, vector<8x32xf32> -> vector<8x32xf32>
    %469 = arith.addf %447, %468 : vector<8x32xf32>
    %470 = vector.extract_strided_slice %311 {offsets = [8, 24], sizes = [8, 8], strides = [1, 1]} : vector<16x32xf32> to vector<8x8xf32>
    %471 = vector.extract_strided_slice %312 {offsets = [8, 24], sizes = [8, 8], strides = [1, 1]} : vector<16x32xf32> to vector<8x8xf32>
    %472 = vector.extract_strided_slice %313 {offsets = [8, 24], sizes = [8, 8], strides = [1, 1]} : vector<16x32xf32> to vector<8x8xf32>
    %473 = tpu.transpose %471, [1, 0] : vector<8x8xf32> -> vector<8x8xf32>
    %cst_165 = arith.constant dense<0.000000e+00> : vector<8x8xf32>
    %474 = tpu.matmul %470, %473, %cst_165 {dimension_numbers = #tpu.dot_dimension_numbers<[1], [0], [0], [1], [0, 0, 1, 1], [], []>} : vector<8x8xf32>, vector<8x8xf32>, vector<8x8xf32> -> vector<8x8xf32>
    %cst_166 = arith.constant 0.353553385 : f32
    %475 = vector.broadcast %cst_166 : f32 to vector<8x8xf32>
    %476 = arith.mulf %474, %475 : vector<8x8xf32>
    %477 = vector.broadcast %404 : vector<1x8xf32> to vector<8x8xf32>
    %478 = arith.addf %476, %477 : vector<8x8xf32>
    %cst_167 = arith.constant dense<0xFF800000> : vector<8xf32>
    %479 = vector.multi_reduction <maximumf>, %478, %cst_167 [1] : vector<8x8xf32> to vector<8xf32>
    %480 = vector.shape_cast %479 : vector<8xf32> to vector<8x1xf32>
    %481 = vector.broadcast %480 : vector<8x1xf32> to vector<8x8xf32>
    %482 = arith.subf %478, %481 : vector<8x8xf32>
    %483 = math.exp %482 : vector<8x8xf32>
    %cst_168 = arith.constant dense<0.000000e+00> : vector<8xf32>
    %484 = vector.multi_reduction <add>, %483, %cst_168 [1] : vector<8x8xf32> to vector<8xf32>
    %485 = vector.shape_cast %484 : vector<8xf32> to vector<8x1xf32>
    %486 = vector.broadcast %485 : vector<8x1xf32> to vector<8x8xf32>
    %487 = arith.divf %483, %486 : vector<8x8xf32>
    %cst_169 = arith.constant dense<0.000000e+00> : vector<8x8xf32>
    %488 = tpu.matmul %487, %472, %cst_169 {dimension_numbers = #tpu.dot_dimension_numbers<[1], [0], [0], [1], [0, 0, 1, 1], [], []>} : vector<8x8xf32>, vector<8x8xf32>, vector<8x8xf32> -> vector<8x8xf32>
    %489 = vector.extract_strided_slice %315 {offsets = [24, 0], sizes = [8, 32], strides = [1, 1]} : vector<32x32xf32> to vector<8x32xf32>
    %cst_170 = arith.constant dense<0.000000e+00> : vector<8x32xf32>
    %490 = tpu.matmul %488, %489, %cst_170 {dimension_numbers = #tpu.dot_dimension_numbers<[1], [0], [0], [1], [0, 0, 1, 1], [], []>} : vector<8x8xf32>, vector<8x32xf32>, vector<8x32xf32> -> vector<8x32xf32>
    %491 = arith.addf %469, %490 : vector<8x32xf32>
    %492 = tpu.concatenate %403, %491 in 0 : vector<8x32xf32>, vector<8x32xf32> -> vector<16x32xf32>
    %c1_171 = arith.constant 1 : index
    %c0_172 = arith.constant 0 : index
    %c0_173 = arith.constant 0 : index
    %493 = vector.load %arg7[%c1_171, %c0_172, %c0_173] : memref<2x1x32xf32, #tpu.memory_space<vmem>>, vector<1x1x32xf32>
    %494 = vector.shape_cast %493 : vector<1x1x32xf32> to vector<1x32xf32>
    %495 = vector.broadcast %494 : vector<1x32xf32> to vector<16x32xf32>
    %496 = arith.addf %492, %495 : vector<16x32xf32>
    %497 = arith.addf %303, %496 : vector<16x32xf32>
    %c1_174 = arith.constant 1 : index
    %c0_175 = arith.constant 0 : index
    %c0_176 = arith.constant 0 : index
    %498 = vector.load %arg8[%c1_174, %c0_175, %c0_176] : memref<2x1x32xf32, #tpu.memory_space<vmem>>, vector<1x1x32xf32>
    %499 = vector.shape_cast %498 : vector<1x1x32xf32> to vector<1x32xf32>
    %c1_177 = arith.constant 1 : index
    %c0_178 = arith.constant 0 : index
    %c0_179 = arith.constant 0 : index
    %500 = vector.load %arg9[%c1_177, %c0_178, %c0_179] : memref<2x1x32xf32, #tpu.memory_space<vmem>>, vector<1x1x32xf32>
    %501 = vector.shape_cast %500 : vector<1x1x32xf32> to vector<1x32xf32>
    %cst_180 = arith.constant dense<0.000000e+00> : vector<16xf32>
    %502 = vector.multi_reduction <add>, %497, %cst_180 [1] : vector<16x32xf32> to vector<16xf32>
    %503 = vector.shape_cast %502 : vector<16xf32> to vector<16x1xf32>
    %cst_181 = arith.constant 3.200000e+01 : f32
    %504 = vector.broadcast %cst_181 : f32 to vector<16x1xf32>
    %505 = arith.divf %503, %504 : vector<16x1xf32>
    %506 = vector.broadcast %505 : vector<16x1xf32> to vector<16x32xf32>
    %507 = arith.subf %497, %506 : vector<16x32xf32>
    %508 = arith.mulf %507, %507 : vector<16x32xf32>
    %cst_182 = arith.constant dense<0.000000e+00> : vector<16xf32>
    %509 = vector.multi_reduction <add>, %508, %cst_182 [1] : vector<16x32xf32> to vector<16xf32>
    %510 = vector.shape_cast %509 : vector<16xf32> to vector<16x1xf32>
    %cst_183 = arith.constant 3.200000e+01 : f32
    %511 = vector.broadcast %cst_183 : f32 to vector<16x1xf32>
    %512 = arith.divf %510, %511 : vector<16x1xf32>
    %513 = vector.broadcast %505 : vector<16x1xf32> to vector<16x32xf32>
    %514 = arith.subf %497, %513 : vector<16x32xf32>
    %cst_184 = arith.constant 9.99999996E-13 : f32
    %515 = vector.broadcast %cst_184 : f32 to vector<16x1xf32>
    %516 = arith.addf %512, %515 : vector<16x1xf32>
    %517 = math.rsqrt %516 : vector<16x1xf32>
    %518 = vector.broadcast %517 : vector<16x1xf32> to vector<16x32xf32>
    %519 = arith.mulf %514, %518 : vector<16x32xf32>
    %520 = vector.broadcast %499 : vector<1x32xf32> to vector<16x32xf32>
    %521 = arith.mulf %519, %520 : vector<16x32xf32>
    %522 = vector.broadcast %501 : vector<1x32xf32> to vector<16x32xf32>
    %523 = arith.addf %521, %522 : vector<16x32xf32>
    %c1_185 = arith.constant 1 : index
    %c0_186 = arith.constant 0 : index
    %c0_187 = arith.constant 0 : index
    %524 = vector.load %arg10[%c1_185, %c0_186, %c0_187] : memref<2x32x64xf32, #tpu.memory_space<vmem>>, vector<1x32x64xf32>
    %525 = vector.shape_cast %524 : vector<1x32x64xf32> to vector<32x64xf32>
    %cst_188 = arith.constant dense<0.000000e+00> : vector<16x64xf32>
    %526 = tpu.matmul %523, %525, %cst_188 {dimension_numbers = #tpu.dot_dimension_numbers<[1], [0], [0], [1], [0, 0, 1, 1], [], []>} : vector<16x32xf32>, vector<32x64xf32>, vector<16x64xf32> -> vector<16x64xf32>
    %c1_189 = arith.constant 1 : index
    %c0_190 = arith.constant 0 : index
    %c0_191 = arith.constant 0 : index
    %527 = vector.load %arg11[%c1_189, %c0_190, %c0_191] : memref<2x1x64xf32, #tpu.memory_space<vmem>>, vector<1x1x64xf32>
    %528 = vector.shape_cast %527 : vector<1x1x64xf32> to vector<1x64xf32>
    %529 = vector.broadcast %528 : vector<1x64xf32> to vector<16x64xf32>
    %530 = arith.addf %526, %529 : vector<16x64xf32>
    %531 = arith.mulf %530, %530 : vector<16x64xf32>
    %532 = arith.mulf %530, %531 : vector<16x64xf32>
    %cst_192 = arith.constant 4.471500e-02 : f32
    %533 = vector.broadcast %cst_192 : f32 to vector<16x64xf32>
    %534 = arith.mulf %533, %532 : vector<16x64xf32>
    %535 = arith.addf %530, %534 : vector<16x64xf32>
    %cst_193 = arith.constant 0.797884583 : f32
    %536 = vector.broadcast %cst_193 : f32 to vector<16x64xf32>
    %537 = arith.mulf %536, %535 : vector<16x64xf32>
    %538 = math.tanh %537 : vector<16x64xf32>
    %cst_194 = arith.constant 1.000000e+00 : f32
    %539 = vector.broadcast %cst_194 : f32 to vector<16x64xf32>
    %540 = arith.addf %539, %538 : vector<16x64xf32>
    %cst_195 = arith.constant 5.000000e-01 : f32
    %541 = vector.broadcast %cst_195 : f32 to vector<16x64xf32>
    %542 = arith.mulf %541, %540 : vector<16x64xf32>
    %543 = arith.mulf %530, %542 : vector<16x64xf32>
    %c1_196 = arith.constant 1 : index
    %c0_197 = arith.constant 0 : index
    %c0_198 = arith.constant 0 : index
    %544 = vector.load %arg12[%c1_196, %c0_197, %c0_198] : memref<2x64x32xf32, #tpu.memory_space<vmem>>, vector<1x64x32xf32>
    %545 = vector.shape_cast %544 : vector<1x64x32xf32> to vector<64x32xf32>
    %cst_199 = arith.constant dense<0.000000e+00> : vector<16x32xf32>
    %546 = tpu.matmul %543, %545, %cst_199 {dimension_numbers = #tpu.dot_dimension_numbers<[1], [0], [0], [1], [0, 0, 1, 1], [], []>} : vector<16x64xf32>, vector<64x32xf32>, vector<16x32xf32> -> vector<16x32xf32>
    %c1_200 = arith.constant 1 : index
    %c0_201 = arith.constant 0 : index
    %c0_202 = arith.constant 0 : index
    %547 = vector.load %arg13[%c1_200, %c0_201, %c0_202] : memref<2x1x32xf32, #tpu.memory_space<vmem>>, vector<1x1x32xf32>
    %548 = vector.shape_cast %547 : vector<1x1x32xf32> to vector<1x32xf32>
    %549 = vector.broadcast %548 : vector<1x32xf32> to vector<16x32xf32>
    %550 = arith.addf %546, %549 : vector<16x32xf32>
    %551 = arith.addf %523, %550 : vector<16x32xf32>
    %c1_203 = arith.constant 1 : index
    %c0_204 = arith.constant 0 : index
    %c0_205 = arith.constant 0 : index
    %552 = vector.load %arg14[%c1_203, %c0_204, %c0_205] : memref<2x1x32xf32, #tpu.memory_space<vmem>>, vector<1x1x32xf32>
    %553 = vector.shape_cast %552 : vector<1x1x32xf32> to vector<1x32xf32>
    %c1_206 = arith.constant 1 : index
    %c0_207 = arith.constant 0 : index
    %c0_208 = arith.constant 0 : index
    %554 = vector.load %arg15[%c1_206, %c0_207, %c0_208] : memref<2x1x32xf32, #tpu.memory_space<vmem>>, vector<1x1x32xf32>
    %555 = vector.shape_cast %554 : vector<1x1x32xf32> to vector<1x32xf32>
    %cst_209 = arith.constant dense<0.000000e+00> : vector<16xf32>
    %556 = vector.multi_reduction <add>, %551, %cst_209 [1] : vector<16x32xf32> to vector<16xf32>
    %557 = vector.shape_cast %556 : vector<16xf32> to vector<16x1xf32>
    %cst_210 = arith.constant 3.200000e+01 : f32
    %558 = vector.broadcast %cst_210 : f32 to vector<16x1xf32>
    %559 = arith.divf %557, %558 : vector<16x1xf32>
    %560 = vector.broadcast %559 : vector<16x1xf32> to vector<16x32xf32>
    %561 = arith.subf %551, %560 : vector<16x32xf32>
    %562 = arith.mulf %561, %561 : vector<16x32xf32>
    %cst_211 = arith.constant dense<0.000000e+00> : vector<16xf32>
    %563 = vector.multi_reduction <add>, %562, %cst_211 [1] : vector<16x32xf32> to vector<16xf32>
    %564 = vector.shape_cast %563 : vector<16xf32> to vector<16x1xf32>
    %cst_212 = arith.constant 3.200000e+01 : f32
    %565 = vector.broadcast %cst_212 : f32 to vector<16x1xf32>
    %566 = arith.divf %564, %565 : vector<16x1xf32>
    %567 = vector.broadcast %559 : vector<16x1xf32> to vector<16x32xf32>
    %568 = arith.subf %551, %567 : vector<16x32xf32>
    %cst_213 = arith.constant 9.99999996E-13 : f32
    %569 = vector.broadcast %cst_213 : f32 to vector<16x1xf32>
    %570 = arith.addf %566, %569 : vector<16x1xf32>
    %571 = math.rsqrt %570 : vector<16x1xf32>
    %572 = vector.broadcast %571 : vector<16x1xf32> to vector<16x32xf32>
    %573 = arith.mulf %568, %572 : vector<16x32xf32>
    %574 = vector.broadcast %553 : vector<1x32xf32> to vector<16x32xf32>
    %575 = arith.mulf %573, %574 : vector<16x32xf32>
    %576 = vector.broadcast %555 : vector<1x32xf32> to vector<16x32xf32>
    %577 = arith.addf %575, %576 : vector<16x32xf32>
    %c0_214 = arith.constant 0 : index
    %c0_215 = arith.constant 0 : index
    %578 = vector.load %arg16[%c0_214, %c0_215] : memref<32x16xf32, #tpu.memory_space<vmem>>, vector<32x16xf32>
    %cst_216 = arith.constant dense<0.000000e+00> : vector<16x16xf32>
    %579 = tpu.matmul %577, %578, %cst_216 {dimension_numbers = #tpu.dot_dimension_numbers<[1], [0], [0], [1], [0, 0, 1, 1], [], []>} : vector<16x32xf32>, vector<32x16xf32>, vector<16x16xf32> -> vector<16x16xf32>
    %c0_217 = arith.constant 0 : index
    %c0_218 = arith.constant 0 : index
    %580 = vector.load %arg17[%c0_217, %c0_218] : memref<1x16xf32, #tpu.memory_space<vmem>>, vector<1x16xf32>
    %581 = vector.broadcast %580 : vector<1x16xf32> to vector<16x16xf32>
    %582 = arith.addf %579, %581 : vector<16x16xf32>
    %c0_219 = arith.constant 0 : index
    %c0_220 = arith.constant 0 : index
    %583 = vector.load %arg18[%c0_219, %c0_220] : memref<16x16xf32, #tpu.memory_space<vmem>>, vector<16x16xf32>
    tpu.vector_store %arg18[%c0_219, %c0_220], %582 {strides = array<i32>} : memref<16x16xf32, #tpu.memory_space<vmem>>, vector<16x16xf32>,
    return
  }
}

</mosaic_0001>

<bundles_post_ra>
// kernel: encoder_forward.1
= control target key start
LH: loop header
LB: loop body
LE: loop exit
PB: predicated region body
PF: predicated region fallthrough
CT: control target
= control target key end

     0   :  { %s3363_s0 = inlined_call_operand.vmem [shape: f32[16,32], index: 0, kind: input, shape index: {}]   ;;  %s3364_s1 = inlined_call_operand.vmem [shape: f32[2,8], index: 1, kind: input, shape index: {}]   ;;  %s3365_s2 = inlined_call_operand.vmem [shape: f32[1,32], index: 2, kind: input, shape index: {}]   ;;  %s3366_s3 = inlined_call_operand.vmem [shape: f32[1,32], index: 3, kind: input, shape index: {}]   ;;  %s3367_s4 = inlined_call_operand.vmem [shape: f32[2,32,96], index: 4, kind: input, shape index: {}]   ;;  %s3368_s5 = inlined_call_operand.vmem [shape: f32[2,1,96], index: 5, kind: input, shape index: {}]   ;;  %s3369_s6 = inlined_call_operand.vmem [shape: f32[2,32,32], index: 6, kind: input, shape index: {}]   ;;  %s3370_s7 = inlined_call_operand.vmem [shape: f32[2,1,32], index: 7, kind: input, shape index: {}]   ;;  %s3371_s8 = inlined_call_operand.vmem [shape: f32[2,1,32], index: 8, kind: input, shape index: {}]   ;;  %s3372_s9 = inlined_call_operand.vmem [shape: f32[2,1,32], index: 9, kind: input, shape index: {}]   ;;  %s3373_s10 = inlined_call_operand.vmem [shape: f32[2,32,64], index: 10, kind: input, shape index: {}]   ;;  %s3374_s11 = inlined_call_operand.vmem [shape: f32[2,1,64], index: 11, kind: input, shape index: {}]   ;;  %s3375_s12 = inlined_call_operand.vmem [shape: f32[2,64,32], index: 12, kind: input, shape index: {}]   ;;  %s3376_s13 = inlined_call_operand.vmem [shape: f32[2,1,32], index: 13, kind: input, shape index: {}]   ;;  %s3377_s14 = inlined_call_operand.vmem [shape: f32[2,1,32], index: 14, kind: input, shape index: {}]   ;;  %s3378_s15 = inlined_call_operand.vmem [shape: f32[2,1,32], index: 15, kind: input, shape index: {}]   ;;  %s3379_s16 = inlined_call_operand.vmem [shape: f32[32,16], index: 16, kind: input, shape index: {}]   ;;  %s3380_s17 = inlined_call_operand.vmem [shape: f32[1,16], index: 17, kind: input, shape index: {}]   ;;  %s3381_s18 = inlined_call_operand.hbm [shape: f32[16,16], index: 18, kind: output, shape index: {}]  }
   0x1   :  { %3391 = sst [smem:[#allocation5_spill]] %s3363_s0 }
   0x2   :  { %3392 = sst [smem:[#allocation6_spill]] %s3364_s1 }
   0x3   :  { %3393 = sst [smem:[#allocation7_spill]] %s3365_s2 }
   0x4   :  { %s3394_s29 = sld [smem:[#allocation5_spill]]  ;;  %vm64_vm0 = vcmask 261120  }
   0xa   :  { %v60_v0 = vld [vmem:[%s3394_s29] sm:$0xff] }
   0xb   :  { %v65_v1 = vsel %vm64_vm0, %v60_v0, 0.0 }
   0xc   :  { %66 = vadd.xlane.f32.xlu0 %v65_v1 }
   0xd   :  { %23 = vsyncpa [#allocation3], 0  ;;  %v2633_v2 = vmov 32.0   ;;  %v132_v14 = vld [vmem:[%s3367_s4 + $0x18] sm:$0xff]  ;;  %v131_v15 = vld [vmem:[%s3367_s4 + $0x10] sm:$0xff]  ;;  %s3395_s25 = sld [smem:[#allocation7_spill]] }
   0xe   :  { %2513 = vrcp.f32 %v2633_v2  ;;  %155 = vmatpush.msra.mxu0 %v132_v14  ;;  %v130_v16 = vld [vmem:[%s3367_s4 + $0x8] sm:$0xff]  ;;  %v129_v17 = vld [vmem:[%s3367_s4] sm:$0xff]  ;;  %s2634_s0 = smov 88   ;;  %s2636_s19 = smov 96   ;;  %vm173_vm5 = vcmask 64512  }
   0xf   :  { %v2772_v30 = vld [vmem:[%s3366_s3] ss:$0 sm:$0xff]  ;;  %s3387_s3 = smov 64   ;;  %s3396_s21 = sld [smem:[#allocation6_spill]] }
  0x10   :  { %156 = vmatpush.msra.mxu0 %v131_v15  ;;  %v2783_v33 = vld [vmem:[%s3368_s5] ss:$0 sm:$0xff]  ;;  %s2637_s22 = smov 56   ;;  %s2638_s2 = smov 80  }
  0x11   :  { %s2639_s23 = smov 120   ;;  %s2640_s26 = smov 112  }
  0x12   :  { %157 = vmatpush.msra.mxu0 %v130_v16  ;;  %s2641_s27 = smov 48   ;;  %s3385_s28 = smov 104   ;;  %v61_v16 = vld [vmem:[%s3394_s29 + $0x8] sm:$0xff] }
  0x13   :  { %v2767_v27 = vld [vmem:[%s3395_s25] ss:$0 sm:$0xff]  ;;  %s3383_s29 = smov 40   ;;  %s3389_s24 = smov 72  }
  0x14   :  { %v2514_v3 = vpop.eup %2513  ;;  %158 = vmatpush.msra.mxu0 %v129_v17  ;;  %v68_v17 = vsel %vm64_vm0, %v61_v16, 0.0  ;;  %s3398_s20 = smov 64   ;;  %s3400_s25 = smov 40  }
  0x15   :  { %v72_v4 = vmul.f32 32.0, %v2514_v3  ;;  %vm76_vm1 = vweird.f32 %v2514_v3  ;;  %v126_v39 = vld [vmem:[%s3396_s21] sm:$0x3] }
  0x16   :  { %v127_v40 = vsub.f32 1.0, %v126_v39 }
  0x17   :  { %v73_v5 = vsub.f32 1.0, %v72_v4 }
  0x18   :  { %v2801_v41 = vmul.f32 -1e+09, %v127_v40 }
  0x19   :  { %v74_v6 = vmul.f32 %v2514_v3, %v73_v5 }
  0x1a   :  { %v2804_v42 = vperm.slane %v2801_v41, 0 }
  0x1b   :  { %v75_v7 = vadd.f32 %v2514_v3, %v74_v6 }
  0x1d   :  { %v2747_v8 = vsel %vm76_vm1, %v2514_v3, %v75_v7  ;;  %v2821_v3 = vld [vmem:[%s3369_s6] sm:$0xff] }
  0x1e   :  { %372 = vmatpush.msra.mxu3 %v2821_v3 }
  0x7f   :  { %v67_v9 = vpop.xlane.xlu0 %66 }
  0x80   :  { %v78_v10 = vmul.f32 %v2747_v8, %v67_v9 }
  0x82   :  { %v80_v11 = vsub.f32 %v60_v0, %v78_v10  ;;  %v2836_v10 = vld [vmem:[%s3369_s6 + $0x8] sm:$0xff] }
  0x84   :  { %v82_v12 = vmul.f32 %v80_v11, %v80_v11 }
  0x86   :  { %v84_v13 = vsel %vm64_vm0, %v82_v12, 0.0 }
  0x87   :  { %85 = vadd.xlane.f32.xlu0 %v84_v13 }
  0xfa   :  { %v86_v18 = vpop.xlane.xlu0 %85 }
  0xfb   :  { %v90_v19 = vmul.f32 %v86_v18, %v2747_v8 }
  0xfd   :  { %v92_v20 = vadd.f32 1e-12, %v90_v19 }
  0xff   :  { %2515 = vrsqrt.f32 %v92_v20  ;;  %vm100_vm3 = vweird.f32 %v92_v20 }
 0x105   :  { %v2516_v21 = vpop.eup %2515 }
 0x106   :  { %v95_v22 = vmul.f32 %v2516_v21, %v92_v20  ;;  %vm101_vm2 = vweird.f32 %v2516_v21 }
 0x107   :  { %vm102_vm4 = vmor %vm100_vm3, %vm101_vm2 }
 0x108   :  { %v96_v23 = vmul.f32 %v2516_v21, %v95_v22 }
 0x10a   :  { %v97_v24 = vmul.f32 0.5, %v96_v23 }
 0x10c   :  { %v98_v25 = vsub.f32 1.5, %v97_v24 }
 0x10e   :  { %v99_v26 = vmul.f32 %v2516_v21, %v98_v25 }
 0x110   :  { %v103_v28 = vsel %vm102_vm4, %v2516_v21, %v99_v26 }
 0x111   :  { %v114_v29 = vmul.f32 %v103_v28, %v80_v11 }
 0x113   :  { %v119_v31 = vmul.f32 %v2767_v27, %v114_v29 }
 0x115   :  { %v2776_v32 = vadd.f32 %v2772_v30, %v119_v31 }
 0x117   :  { %2373 = vmatmul.msk.f32.vlgmr.msra.gmra.mxu0 %vm64_vm0, %v2776_v32 }
 0x194   :  { %v160_v34 = vpop.f32.mrf.mxu0 }
 0x195   :  { %v2786_v35 = vadd.f32 %v2783_v33, %v160_v34 }
 0x197   :  { %253 = vrot.lane.b32.xlu0 %v2786_v35, %s2634_s0  ;;  %225 = vrot.lane.b32.xlu2 %v2786_v35, %s3387_s3 }
 0x198   :  { %171 = vrot.lane.b32.xlu1 %v2786_v35, %s2636_s19 }
 0x1f1   :  { %v226_v36 = vpop.permute.xlu2 %225 }
 0x1f2   :  { %246 = vmatpush.msra.mxu2 %v226_v36 }
 0x209   :  { %v254_v37 = vpop.permute.xlu0 %253 }
 0x20a   :  { %v172_v38 = vpop.permute.xlu1 %171  ;;  %2378 = vmatpush.xpose.msk.msrb.mxu2 %vm173_vm5, %v254_v37 }
 0x20b   :  { %2375 = vmatpush.xpose.msk.msra.mxu1 %vm173_vm5, %v172_v38 }
 0x20e   :  { %2376 = vmatmul.msk.f32.vlgmr.msra.gmra.mxu1 %vm173_vm5, %v2786_v35 }
 0x20f   :  { %349 = vmatpush.msrb.mxu1 %v2836_v10 }
 0x28b   :  { %v195_v43 = vpop.f32.mrf.mxu1 }
 0x28c   :  { %v198_v44 = vmul.f32 0.35355338, %v195_v43 }
 0x28e   :  { %v200_v45 = vadd.f32 %v2804_v42, %v198_v44 }
 0x290   :  { %v201_v46 = vsel %vm173_vm5, %v200_v45, -inf }
 0x291   :  { %202 = vmax.xlane.f32.xlu1 %v201_v46 }
 0x2aa   :  { %305 = vrot.lane.b32.xlu1 %v2786_v35, %s2637_s22 }
 0x2b2   :  { %379 = vrot.lane.b32.xlu1 %v2786_v35, %s2638_s2 }
 0x304   :  { %v203_v47 = vpop.xlane.xlu1 %202 }
 0x305   :  { %v204_v48 = vsub.f32 %v200_v45, %v203_v47 }
 0x307   :  { %v205_v49 = vmul.f32 1.442695, %v204_v48 }
 0x309   :  { %2517 = vpow2.f32 %v205_v49 }
 0x30f   :  { %v2518_v50 = vpop.eup %2517 }
 0x310   :  { %v207_v51 = vsel %vm173_vm5, %v2518_v50, 0.0 }
 0x311   :  { %208 = vadd.xlane.f32.xlu2 %v207_v51 }
 0x31c   :  { %v306_v63 = vpop.permute.xlu1 %305 }
 0x324   :  { %v380_v2 = vpop.permute.xlu1 %379 }
 0x329   :  { %251 = vrot.lane.b32.xlu2 %v2786_v35, %s2639_s23 }
 0x384   :  { %v209_v52 = vpop.xlane.xlu2 %208 }
 0x385   :  { %2519 = vrcp.f32 %v209_v52  ;;  %v221_v56 = vand.u32 2147483648, %v209_v52  ;;  %v219_v58 = vand.u32 2147483647, %v209_v52  ;;  %vm215_vm7 = vweird.f32 %v209_v52 }
 0x387   :  { %v222_v60 = vor.u32 1.1754944e-38, %v221_v56  ;;  %vm220_vm9 = vcmp.eq.f32.partialorder %v219_v58, 8.507059e+37 }
 0x38b   :  { %v2520_v53 = vpop.eup %2519 }
 0x38c   :  { %v211_v54 = vmul.f32 %v2520_v53, %v209_v52  ;;  %vm216_vm6 = vweird.f32 %v2520_v53  ;;  %v252_v1 = vpop.permute.xlu2 %251 }
 0x38d   :  { %vm217_vm8 = vmor %vm215_vm7, %vm216_vm6 }
 0x38e   :  { %v212_v55 = vsub.f32 1.0, %v211_v54 }
 0x390   :  { %v213_v57 = vmul.f32 %v2520_v53, %v212_v55 }
 0x392   :  { %v214_v59 = vadd.f32 %v2520_v53, %v213_v57 }
 0x394   :  { %v218_v61 = vsel %vm217_vm8, %v2520_v53, %v214_v59 }
 0x395   :  { %v223_v62 = vsel %vm220_vm9, %v222_v60, %v218_v61 }
 0x396   :  { %v224_v0 = vmul.f32 %v2518_v50, %v223_v62 }
 0x398   :  { %2377 = vmatmul.msk.f32.vlgmr.msra.gmra.mxu2 %vm173_vm5, %v224_v0 }
 0x399   :  { %326 = vmatpush.msra.mxu2 %v306_v63 }
 0x3a0   :  { %2379 = vmatmul.msk.f32.vlgmr.msrb.gmra.mxu2 %vm173_vm5, %v252_v1 }
 0x3a1   :  { %2383 = vmatpush.xpose.msk.msrb.mxu2 %vm173_vm5, %v380_v2 }
 0x41b   :  { %v248_v4 = vpop.f32.mrf.mxu2 }
 0x41c   :  { %2382 = vmatmul.msk.f32.vlgmr.msra.gmra.mxu3 %vm173_vm5, %v248_v4 }
 0x423   :  { %v276_v5 = vpop.f32.mrf.mxu2 }
 0x424   :  { %v279_v6 = vmul.f32 0.35355338, %v276_v5 }
 0x426   :  { %v280_v7 = vadd.f32 %v279_v6, %v2804_v42 }
 0x428   :  { %v281_v9 = vsel %vm173_vm5, %v280_v7, -inf }
 0x429   :  { %282 = vmax.xlane.f32.xlu0 %v281_v9 }
 0x43d   :  { %377 = vrot.lane.b32.xlu0 %v2786_v35, %s2640_s26 }
 0x445   :  { %431 = vrot.lane.b32.xlu0 %v2786_v35, %s2641_s27 }
 0x44d   :  { %481 = vrot.lane.b32.xlu0 %v2786_v35, %s3385_s28 }
 0x49c   :  { %v283_v11 = vpop.xlane.xlu0 %282 }
 0x49d   :  { %v284_v12 = vsub.f32 %v280_v7, %v283_v11 }
 0x49f   :  { %v285_v13 = vmul.f32 1.442695, %v284_v12 }
 0x4a1   :  { %2521 = vpow2.f32 %v285_v13 }
 0x4a7   :  { %v2522_v14 = vpop.eup %2521 }
 0x4a8   :  { %v287_v15 = vsel %vm173_vm5, %v2522_v14, 0.0 }
 0x4a9   :  { %288 = vadd.xlane.f32.xlu2 %v287_v15 }
 0x4af   :  { %v378_v18 = vpop.permute.xlu0 %377 }
 0x4b1   :  { %69 = vadd.xlane.f32.xlu2 %v68_v17 }
 0x4b7   :  { %v432_v19 = vpop.permute.xlu0 %431 }
 0x4b8   :  { %452 = vmatpush.msra.mxu1 %v432_v19 }
 0x4bf   :  { %v482_v5 = vpop.permute.xlu0 %481 }
 0x51c   :  { %v289_v20 = vpop.xlane.xlu2 %288 }
 0x51d   :  { %2523 = vrcp.f32 %v289_v20  ;;  %v301_v26 = vand.u32 2147483648, %v289_v20  ;;  %v299_v31 = vand.u32 2147483647, %v289_v20  ;;  %vm295_vm11 = vweird.f32 %v289_v20 }
 0x51f   :  { %v302_v37 = vor.u32 1.1754944e-38, %v301_v26  ;;  %vm300_vm13 = vcmp.eq.f32.partialorder %v299_v31, 8.507059e+37 }
 0x523   :  { %v2524_v21 = vpop.eup %2523 }
 0x524   :  { %v291_v22 = vmul.f32 %v2524_v21, %v289_v20  ;;  %v70_v23 = vpop.xlane.xlu2 %69  ;;  %vm296_vm10 = vweird.f32 %v2524_v21 }
 0x525   :  { %v79_v24 = vmul.f32 %v2747_v8, %v70_v23  ;;  %vm297_vm12 = vmor %vm295_vm11, %vm296_vm10 }
 0x526   :  { %v292_v25 = vsub.f32 1.0, %v291_v22 }
 0x527   :  { %v81_v28 = vsub.f32 %v61_v16, %v79_v24 }
 0x528   :  { %v293_v29 = vmul.f32 %v2524_v21, %v292_v25 }
 0x529   :  { %v83_v34 = vmul.f32 %v81_v28, %v81_v28 }
 0x52a   :  { %v294_v36 = vadd.f32 %v2524_v21, %v293_v29 }
 0x52b   :  { %v87_v38 = vsel %vm64_vm0, %v83_v34, 0.0 }
 0x52c   :  { %v298_v39 = vsel %vm297_vm12, %v2524_v21, %v294_v36  ;;  %88 = vadd.xlane.f32.xlu2 %v87_v38 }
 0x52d   :  { %v303_v40 = vsel %vm300_vm13, %v302_v37, %v298_v39  ;;  %v2892_v37 = vpop.f32.mrf.mxu3 }
 0x52e   :  { %v304_v43 = vmul.f32 %v2522_v14, %v303_v40  ;;  %v2898_v40 = vperm.slane %v2801_v41, 1 }
 0x530   :  { %2380 = vmatmul.msk.f32.vlgmr.msra.gmra.mxu2 %vm173_vm5, %v304_v43 }
 0x538   :  { %2384 = vmatmul.msk.f32.vlgmr.msrb.gmra.mxu2 %vm173_vm5, %v378_v18 }
 0x59f   :  { %v89_v44 = vpop.xlane.xlu2 %88 }
 0x5a0   :  { %v91_v45 = vmul.f32 %v89_v44, %v2747_v8 }
 0x5a2   :  { %v93_v46 = vadd.f32 1e-12, %v91_v45 }
 0x5a4   :  { %2525 = vrsqrt.f32 %v93_v46  ;;  %vm110_vm14 = vweird.f32 %v93_v46 }
 0x5aa   :  { %v2526_v47 = vpop.eup %2525 }
 0x5ab   :  { %v105_v48 = vmul.f32 %v2526_v47, %v93_v46  ;;  %vm111_vm15 = vweird.f32 %v2526_v47 }
 0x5ac   :  { %vm112_vm1 = vmor %vm110_vm14, %vm111_vm15 }
 0x5ad   :  { %v106_v49 = vmul.f32 %v2526_v47, %v105_v48 }
 0x5af   :  { %v107_v50 = vmul.f32 0.5, %v106_v49 }
 0x5b1   :  { %v108_v51 = vsub.f32 1.5, %v107_v50 }
 0x5b3   :  { %v109_v52 = vmul.f32 %v2526_v47, %v108_v51  ;;  %v328_v53 = vpop.f32.mrf.mxu2 }
 0x5b4   :  { %2381 = vmatmul.msk.f32.vlgmr.msrb.gmra.mxu1 %vm173_vm5, %v328_v53 }
 0x5b5   :  { %v113_v54 = vsel %vm112_vm1, %v2526_v47, %v109_v52 }
 0x5b6   :  { %v115_v55 = vmul.f32 %v113_v54, %v81_v28 }
 0x5b8   :  { %v120_v56 = vmul.f32 %v2767_v27, %v115_v55 }
 0x5ba   :  { %v2852_v57 = vadd.f32 %v2772_v30, %v120_v56 }
 0x5bb   :  { %v402_v58 = vpop.f32.mrf.mxu2 }
 0x5bc   :  { %v405_v59 = vmul.f32 0.35355338, %v402_v58  ;;  %2374 = vmatmul.msk.f32.gmra.mxu0 %vm64_vm0, %v2852_v57 }
 0x5be   :  { %v406_v60 = vadd.f32 %v405_v59, %v2804_v42 }
 0x5c0   :  { %v407_v61 = vsel %vm173_vm5, %v406_v60, -inf }
 0x5c1   :  { %408 = vmax.xlane.f32.xlu1 %v407_v61 }
 0x5da   :  { %535 = vrot.lane.b32.xlu1 %v2786_v35, %s3383_s29 }
 0x631   :  { %v2878_v22 = vpop.f32.mrf.mxu1 }
 0x634   :  { %v409_v62 = vpop.xlane.xlu1 %408 }
 0x635   :  { %v410_v63 = vsub.f32 %v406_v60, %v409_v62 }
 0x637   :  { %v411_v27 = vmul.f32 1.442695, %v410_v63 }
 0x639   :  { %2527 = vpow2.f32 %v411_v27  ;;  %v163_v30 = vpop.f32.mrf.mxu0 }
 0x63a   :  { %v2861_v0 = vadd.f32 %v2783_v33, %v163_v30  ;;  %v168_v33 = vld [vmem:[%s3369_s6 + $0x10] sm:$0xff] }
 0x63b   :  { %475 = vmatpush.msrb.mxu3 %v168_v33 }
 0x63c   :  { %586 = vrot.lane.b32.xlu0 %v2861_v0, %s2636_s19  ;;  %667 = vrot.lane.b32.xlu1 %v2861_v0, %s2634_s0 }
 0x63f   :  { %v2528_v1 = vpop.eup %2527 }
 0x640   :  { %v413_v2 = vsel %vm173_vm5, %v2528_v1, 0.0 }
 0x641   :  { %414 = vadd.xlane.f32.xlu2 %v413_v2 }
 0x64c   :  { %v536_v4 = vpop.permute.xlu1 %535 }
 0x64d   :  { %556 = vmatpush.msra.mxu2 %v536_v4 }
 0x659   :  { %483 = vrot.lane.b32.xlu2 %v2786_v35, %s3389_s24 }
 0x6ae   :  { %v587_v6 = vpop.permute.xlu0 %586  ;;  %v668_v7 = vpop.permute.xlu1 %667 }
 0x6af   :  { %2391 = vmatpush.xpose.msk.msra.mxu3 %vm173_vm5, %v587_v6  ;;  %2394 = vmatpush.xpose.msk.msrb.mxu2 %vm173_vm5, %v668_v7 }
 0x6b4   :  { %v415_v9 = vpop.xlane.xlu2 %414 }
 0x6b5   :  { %2529 = vrcp.f32 %v415_v9  ;;  %v427_v14 = vand.u32 2147483648, %v415_v9  ;;  %v425_v16 = vand.u32 2147483647, %v415_v9  ;;  %vm421_vm3 = vweird.f32 %v415_v9 }
 0x6b7   :  { %v428_v18 = vor.u32 1.1754944e-38, %v427_v14  ;;  %vm426_vm6 = vcmp.eq.f32.partialorder %v425_v16, 8.507059e+37 }
 0x6bb   :  { %v2530_v11 = vpop.eup %2529 }
 0x6bc   :  { %v417_v12 = vmul.f32 %v2530_v11, %v415_v9  ;;  %v484_v13 = vpop.permute.xlu2 %483  ;;  %vm422_vm2 = vweird.f32 %v2530_v11 }
 0x6bd   :  { %2387 = vmatpush.xpose.msk.msrb.mxu0 %vm173_vm5, %v484_v13  ;;  %vm423_vm4 = vmor %vm421_vm3, %vm422_vm2 }
 0x6be   :  { %v418_v35 = vsub.f32 1.0, %v417_v12 }
 0x6c0   :  { %v419_v15 = vmul.f32 %v2530_v11, %v418_v35  ;;  %2388 = vmatmul.msk.f32.vlgmr.msrb.gmra.mxu0 %vm173_vm5, %v482_v5 }
 0x6c2   :  { %v420_v17 = vadd.f32 %v2530_v11, %v419_v15 }
 0x6c4   :  { %v424_v19 = vsel %vm423_vm4, %v2530_v11, %v420_v17 }
 0x6c5   :  { %v429_v20 = vsel %vm426_vm6, %v428_v18, %v424_v19 }
 0x6c6   :  { %v430_v21 = vmul.f32 %v2528_v1, %v429_v20  ;;  %v2917_v1 = vld [vmem:[%s3369_s6 + $0x18] sm:$0xff] }
 0x6c7   :  { %579 = vmatpush.msrb.mxu1 %v2917_v1 }
 0x6c8   :  { %2385 = vmatmul.msk.f32.vlgmr.msra.gmra.mxu1 %vm173_vm5, %v430_v21 }
 0x73d   :  { %v506_v23 = vpop.f32.mrf.mxu0 }
 0x73e   :  { %v509_v24 = vmul.f32 0.35355338, %v506_v23 }
 0x740   :  { %v510_v25 = vadd.f32 %v509_v24, %v2804_v42 }
 0x742   :  { %v511_v26 = vsel %vm173_vm5, %v510_v25, -inf }
 0x743   :  { %512 = vmax.xlane.f32.xlu0 %v511_v26  ;;  %v375_v26 = vadd.f32 %v2892_v37, %v2878_v22 }
 0x745   :  { %v454_v28 = vpop.f32.mrf.mxu1 }
 0x746   :  { %2386 = vmatmul.msk.f32.vlgmr.msrb.gmra.mxu3 %vm173_vm5, %v454_v28 }
 0x747   :  { %763 = vmatpush.msrb.mxu3 %v2836_v10 }
 0x74e   :  { %2392 = vmatmul.msk.f32.vlgmr.msra.gmra.mxu3 %vm173_vm5, %v2861_v0 }
 0x74f   :  { %889 = vmatpush.msra.mxu3 %v168_v33 }
 0x757   :  { %665 = vrot.lane.b32.xlu0 %v2861_v0, %s2639_s23 }
 0x75f   :  { %639 = vrot.lane.b32.xlu0 %v2861_v0, %s3387_s3  ;;  %s3399_s3 = smov 104  }
 0x767   :  { %897 = vrot.lane.b32.xlu0 %v2861_v0, %s3389_s24 }
 0x7b6   :  { %v513_v29 = vpop.xlane.xlu0 %512 }
 0x7b7   :  { %v514_v31 = vsub.f32 %v510_v25, %v513_v29  ;;  %v2937_v29 = vld [vmem:[%s3370_s7] ss:$0 sm:$0xff] }
 0x7b9   :  { %v515_v34 = vmul.f32 1.442695, %v514_v31 }
 0x7bb   :  { %2531 = vpow2.f32 %v515_v34 }
 0x7c1   :  { %v2532_v36 = vpop.eup %2531 }
 0x7c2   :  { %v517_v10 = vsel %vm173_vm5, %v2532_v36, 0.0 }
 0x7c3   :  { %518 = vadd.xlane.f32.xlu2 %v517_v10 }
 0x7c9   :  { %v2895_v38 = vpop.f32.mrf.mxu3  ;;  %v666_v39 = vpop.permute.xlu0 %665 }
 0x7ca   :  { %v480_v28 = vadd.f32 %v2895_v38, %v375_v26 }
 0x7d1   :  { %v609_v43 = vpop.f32.mrf.mxu3  ;;  %v640_v44 = vpop.permute.xlu0 %639 }
 0x7d2   :  { %v612_v45 = vmul.f32 0.35355338, %v609_v43  ;;  %660 = vmatpush.msra.mxu0 %v640_v44 }
 0x7d4   :  { %786 = vmatpush.msrb.mxu0 %v2821_v3  ;;  %v614_v46 = vadd.f32 %v2898_v40, %v612_v45 }
 0x7d6   :  { %v615_v47 = vsel %vm173_vm5, %v614_v46, -inf }
 0x7d7   :  { %616 = vmax.xlane.f32.xlu1 %v615_v47 }
 0x7d9   :  { %v898_v20 = vpop.permute.xlu0 %897 }
 0x7db   :  { %791 = vrot.lane.b32.xlu2 %v2861_v0, %s2640_s26 }
 0x7e3   :  { %895 = vrot.lane.b32.xlu2 %v2861_v0, %s3385_s28 }
 0x7f0   :  { %793 = vrot.lane.b32.xlu1 %v2861_v0, %s2638_s2 }
 0x836   :  { %v519_v41 = vpop.xlane.xlu2 %518 }
 0x837   :  { %2533 = vrcp.f32 %v519_v41  ;;  %v531_v3 = vand.u32 2147483648, %v519_v41  ;;  %v529_v52 = vand.u32 2147483647, %v519_v41  ;;  %vm525_vm8 = vweird.f32 %v519_v41 }
 0x839   :  { %v532_v54 = vor.u32 1.1754944e-38, %v531_v3  ;;  %vm530_vm10 = vcmp.eq.f32.partialorder %v529_v52, 8.507059e+37 }
 0x83d   :  { %v2534_v48 = vpop.eup %2533 }
 0x83e   :  { %v521_v49 = vmul.f32 %v2534_v48, %v519_v41  ;;  %vm526_vm7 = vweird.f32 %v2534_v48  ;;  %v792_v30 = vpop.permute.xlu2 %791 }
 0x83f   :  { %vm527_vm9 = vmor %vm525_vm8, %vm526_vm7 }
 0x840   :  { %v522_v50 = vsub.f32 1.0, %v521_v49 }
 0x842   :  { %v523_v51 = vmul.f32 %v2534_v48, %v522_v50 }
 0x844   :  { %v524_v53 = vadd.f32 %v2534_v48, %v523_v51 }
 0x846   :  { %v528_v55 = vsel %vm527_vm9, %v2534_v48, %v524_v53  ;;  %v896_v37 = vpop.permute.xlu2 %895 }
 0x847   :  { %v533_v56 = vsel %vm530_vm10, %v532_v54, %v528_v55 }
 0x848   :  { %v534_v58 = vmul.f32 %v2532_v36, %v533_v56 }
 0x84a   :  { %2389 = vmatmul.msk.f32.vlgmr.msra.gmra.mxu2 %vm173_vm5, %v534_v58  ;;  %v617_v59 = vpop.xlane.xlu1 %616 }
 0x84b   :  { %v618_v60 = vsub.f32 %v614_v46, %v617_v59 }
 0x84d   :  { %v619_v61 = vmul.f32 1.442695, %v618_v60 }
 0x84f   :  { %2535 = vpow2.f32 %v619_v61 }
 0x852   :  { %2395 = vmatmul.msk.f32.vlgmr.msrb.gmra.mxu2 %vm173_vm5, %v666_v39 }
 0x855   :  { %v2536_v62 = vpop.eup %2535 }
 0x856   :  { %v621_v63 = vsel %vm173_vm5, %v2536_v62, 0.0 }
 0x857   :  { %622 = vadd.xlane.f32.xlu1 %v621_v63 }
 0x862   :  { %v794_v27 = vpop.permute.xlu1 %793 }
 0x863   :  { %2399 = vmatpush.xpose.msk.msra.mxu2 %vm173_vm5, %v794_v27 }
 0x866   :  { %2400 = vmatmul.msk.f32.vlgmr.msra.gmra.mxu2 %vm173_vm5, %v792_v30 }
 0x8ca   :  { %v623_v2 = vpop.xlane.xlu1 %622 }
 0x8cb   :  { %2537 = vrcp.f32 %v623_v2  ;;  %v635_v7 = vand.u32 2147483648, %v623_v2  ;;  %v633_v12 = vand.u32 2147483647, %v623_v2  ;;  %vm629_vm12 = vweird.f32 %v623_v2 }
 0x8cd   :  { %v558_v4 = vpop.f32.mrf.mxu2  ;;  %v636_v15 = vor.u32 1.1754944e-38, %v635_v7  ;;  %vm634_vm14 = vcmp.eq.f32.partialorder %v633_v12, 8.507059e+37 }
 0x8ce   :  { %2390 = vmatmul.msk.f32.vlgmr.msrb.gmra.mxu1 %vm173_vm5, %v558_v4 }
 0x8d1   :  { %v2538_v33 = vpop.eup %2537 }
 0x8d2   :  { %v625_v5 = vmul.f32 %v2538_v33, %v623_v2  ;;  %vm630_vm11 = vweird.f32 %v2538_v33 }
 0x8d3   :  { %vm631_vm13 = vmor %vm629_vm12, %vm630_vm11 }
 0x8d4   :  { %v626_v6 = vsub.f32 1.0, %v625_v5 }
 0x8d5   :  { %v690_v9 = vpop.f32.mrf.mxu2 }
 0x8d6   :  { %v627_v11 = vmul.f32 %v2538_v33, %v626_v6  ;;  %v693_v13 = vmul.f32 0.35355338, %v690_v9 }
 0x8d8   :  { %v628_v35 = vadd.f32 %v2538_v33, %v627_v11  ;;  %v694_v14 = vadd.f32 %v693_v13, %v2898_v40 }
 0x8da   :  { %v632_v16 = vsel %vm631_vm13, %v2538_v33, %v628_v35  ;;  %v695_v17 = vsel %vm173_vm5, %v694_v14, -inf }
 0x8db   :  { %v637_v18 = vsel %vm634_vm14, %v636_v15, %v632_v16  ;;  %696 = vmax.xlane.f32.xlu0 %v695_v17 }
 0x8dc   :  { %v638_v19 = vmul.f32 %v2536_v62, %v637_v18 }
 0x8de   :  { %2393 = vmatmul.msk.f32.vlgmr.msra.gmra.mxu0 %vm173_vm5, %v638_v19 }
 0x8df   :  { %2403 = vmatpush.xpose.msk.msra.mxu0 %vm173_vm5, %v898_v20 }
 0x8e9   :  { %v816_v21 = vpop.f32.mrf.mxu2 }
 0x8ea   :  { %v819_v23 = vmul.f32 0.35355338, %v816_v21 }
 0x8ec   :  { %v820_v24 = vadd.f32 %v819_v23, %v2898_v40 }
 0x8ee   :  { %v821_v25 = vsel %vm173_vm5, %v820_v24, -inf }
 0x8ef   :  { %845 = vrot.lane.b32.xlu0 %v2861_v0, %s2641_s27  ;;  %822 = vmax.xlane.f32.xlu2 %v821_v25 }
 0x8f7   :  { %949 = vrot.lane.b32.xlu0 %v2861_v0, %s3383_s29 }
 0x94b   :  { %v581_v31 = vpop.f32.mrf.mxu1 }
 0x94c   :  { %v584_v34 = vadd.f32 %v581_v31, %v480_v28 }
 0x94e   :  { %v1003_v36 = vadd.f32 %v2937_v29, %v584_v34  ;;  %v697_v10 = vpop.xlane.xlu0 %696 }
 0x94f   :  { %v698_v39 = vsub.f32 %v694_v14, %v697_v10 }
 0x950   :  { %v1005_v43 = vadd.f32 %v1003_v36, %v2776_v32 }
 0x951   :  { %v699_v44 = vmul.f32 1.442695, %v698_v39 }
 0x952   :  { %v1009_v45 = vsel %vm64_vm0, %v1005_v43, 0.0 }
 0x953   :  { %2539 = vpow2.f32 %v699_v44  ;;  %1010 = vadd.xlane.f32.xlu2 %v1009_v45 }
 0x959   :  { %v2540_v22 = vpop.eup %2539 }
 0x95a   :  { %v701_v38 = vsel %vm173_vm5, %v2540_v22, 0.0 }
 0x95b   :  { %702 = vadd.xlane.f32.xlu1 %v701_v38  ;;  %v662_v46 = vpop.f32.mrf.mxu0 }
 0x95c   :  { %2398 = vmatmul.msk.f32.vlgmr.msrb.gmra.mxu0 %vm173_vm5, %v662_v46  ;;  %v1065_v46 = vld [vmem:[%s3373_s10 + $0x10] sm:$0xff] }
 0x961   :  { %v846_v47 = vpop.permute.xlu0 %845 }
 0x962   :  { %v823_v41 = vpop.xlane.xlu2 %822 }
 0x963   :  { %v824_v48 = vsub.f32 %v820_v24, %v823_v41 }
 0x964   :  { %2404 = vmatmul.msk.f32.vlgmr.msra.gmra.mxu0 %vm173_vm5, %v896_v37 }
 0x965   :  { %v825_v49 = vmul.f32 1.442695, %v824_v48  ;;  %v1063_v48 = vld [vmem:[%s3373_s10] sm:$0xff] }
 0x967   :  { %2541 = vpow2.f32 %v825_v49  ;;  %v2979_v49 = vld [vmem:[%s3371_s8] ss:$0 sm:$0xff] }
 0x969   :  { %v950_v32 = vpop.permute.xlu0 %949 }
 0x96a   :  { %970 = vmatpush.msrb.mxu2 %v950_v32 }
 0x96d   :  { %v2542_v50 = vpop.eup %2541 }
 0x96e   :  { %v827_v3 = vsel %vm173_vm5, %v2542_v50, 0.0 }
 0x96f   :  { %828 = vadd.xlane.f32.xlu1 %v827_v3 }
 0x988   :  { %719 = vrot.lane.b32.xlu1 %v2861_v0, %s2637_s22 }
 0x9c6   :  { %v1011_v51 = vpop.xlane.xlu2 %1010 }
 0x9c7   :  { %v1015_v52 = vmul.f32 %v1011_v51, %v2747_v8  ;;  %v2987_v51 = vld [vmem:[%s3372_s9] ss:$0 sm:$0xff] }
 0x9c9   :  { %v2949_v53 = vsub.f32 %v1005_v43, %v1015_v52 }
 0x9cb   :  { %v1019_v54 = vmul.f32 %v2949_v53, %v2949_v53 }
 0x9cd   :  { %v1021_v55 = vsel %vm64_vm0, %v1019_v54, 0.0 }
 0x9ce   :  { %1022 = vadd.xlane.f32.xlu1 %v1021_v55  ;;  %v703_v56 = vpop.xlane.xlu1 %702 }
 0x9cf   :  { %2543 = vrcp.f32 %v703_v56  ;;  %v715_v7 = vand.u32 2147483648, %v703_v56  ;;  %vm709_vm1 = vweird.f32 %v703_v56  ;;  %v713_v9 = vand.u32 2147483647, %v703_v56 }
 0x9d1   :  { %v716_v13 = vor.u32 1.1754944e-38, %v715_v7  ;;  %vm714_vm3 = vcmp.eq.f32.partialorder %v713_v9, 8.507059e+37  ;;  %v1121_v7 = vld [vmem:[%s3375_s12 + $0x18] sm:$0xff]  ;;  %v1120_v9 = vld [vmem:[%s3375_s12 + $0x10] sm:$0xff] }
 0x9d5   :  { %v2544_v59 = vpop.eup %2543 }
 0x9d6   :  { %v705_v0 = vmul.f32 %v2544_v59, %v703_v56  ;;  %vm710_vm15 = vweird.f32 %v2544_v59 }
 0x9d7   :  { %vm711_vm2 = vmor %vm709_vm1, %vm710_vm15  ;;  %vm1130_vm1 = vcmask 523264  }
 0x9d8   :  { %v706_v30 = vsub.f32 1.0, %v705_v0 }
 0x9d9   :  { %v2954_v58 = vpop.f32.mrf.mxu0 }
 0x9da   :  { %v707_v4 = vmul.f32 %v2544_v59, %v706_v30 }
 0x9dc   :  { %v708_v5 = vadd.f32 %v2544_v59, %v707_v4  ;;  %v1124_v4 = vld [vmem:[%s3375_s12 + $0x30] sm:$0xff] }
 0x9de   :  { %v712_v11 = vsel %vm711_vm2, %v2544_v59, %v708_v5 }
 0x9df   :  { %v717_v35 = vsel %vm714_vm3, %v716_v13, %v712_v11 }
 0x9e0   :  { %v718_v18 = vmul.f32 %v2540_v22, %v717_v35  ;;  %v1066_v22 = vld [vmem:[%s3373_s10 + $0x18] sm:$0xff]  ;;  %v1118_v35 = vld [vmem:[%s3375_s12] sm:$0xff] }
 0x9e1   :  { %v920_v60 = vpop.f32.mrf.mxu0 }
 0x9e2   :  { %v923_v61 = vmul.f32 0.35355338, %v920_v60  ;;  %v829_v62 = vpop.xlane.xlu1 %828 }
 0x9e3   :  { %2545 = vrcp.f32 %v829_v62  ;;  %v841_v15 = vand.u32 2147483648, %v829_v62  ;;  %vm835_vm6 = vweird.f32 %v829_v62  ;;  %v839_v16 = vand.u32 2147483647, %v829_v62 }
 0x9e4   :  { %v924_v63 = vadd.f32 %v923_v61, %v2898_v40 }
 0x9e5   :  { %v842_v20 = vor.u32 1.1754944e-38, %v841_v15  ;;  %vm840_vm8 = vcmp.eq.f32.partialorder %v839_v16, 8.507059e+37  ;;  %v3020_v15 = vld [vmem:[%s3374_s11] ss:$0 sm:$0xff] }
 0x9e6   :  { %v925_v27 = vsel %vm173_vm5, %v924_v63, -inf }
 0x9e7   :  { %926 = vmax.xlane.f32.xlu2 %v925_v27 }
 0x9e9   :  { %v2546_v2 = vpop.eup %2545 }
 0x9ea   :  { %v831_v33 = vmul.f32 %v2546_v2, %v829_v62  ;;  %vm836_vm4 = vweird.f32 %v2546_v2 }
 0x9eb   :  { %vm837_vm7 = vmor %vm835_vm6, %vm836_vm4 }
 0x9ec   :  { %v832_v6 = vsub.f32 1.0, %v831_v33  ;;  %v1123_v33 = vld [vmem:[%s3375_s12 + $0x28] sm:$0xff] }
 0x9ee   :  { %v833_v12 = vmul.f32 %v2546_v2, %v832_v6  ;;  %v1122_v6 = vld [vmem:[%s3375_s12 + $0x20] sm:$0xff] }
 0x9f0   :  { %v834_v14 = vadd.f32 %v2546_v2, %v833_v12  ;;  %v1119_v12 = vld [vmem:[%s3375_s12 + $0x8] sm:$0xff] }
 0x9f2   :  { %v838_v19 = vsel %vm837_vm7, %v2546_v2, %v834_v14  ;;  %v1125_v2 = vld [vmem:[%s3375_s12 + $0x38] sm:$0xff] }
 0x9f3   :  { %v843_v21 = vsel %vm840_vm8, %v842_v20, %v838_v19  ;;  %1145 = vmatpush.msrb.mxu0 %v1125_v2 }
 0x9f4   :  { %v844_v23 = vmul.f32 %v2542_v50, %v843_v21 }
 0x9f5   :  { %1146 = vmatpush.msrb.mxu0 %v1124_v4 }
 0x9f7   :  { %1147 = vmatpush.msrb.mxu0 %v1123_v33 }
 0x9f9   :  { %1148 = vmatpush.msrb.mxu0 %v1122_v6 }
 0x9fa   :  { %v720_v17 = vpop.permute.xlu1 %719 }
 0x9fb   :  { %740 = vmatpush.msra.mxu1 %v720_v17  ;;  %1149 = vmatpush.msrb.mxu0 %v1121_v7 }
 0x9fc   :  { %2396 = vmatmul.msk.f32.vlgmr.msra.gmra.mxu1 %vm173_vm5, %v718_v18 }
 0x9fd   :  { %866 = vmatpush.msrb.mxu1 %v846_v47  ;;  %v1064_v47 = vld [vmem:[%s3373_s10 + $0x8] sm:$0xff]  ;;  %1150 = vmatpush.msrb.mxu0 %v1120_v9 }
 0x9ff   :  { %993 = vmatpush.msra.mxu1 %v2917_v1  ;;  %1151 = vmatpush.msrb.mxu0 %v1119_v12 }
 0xa01   :  { %1152 = vmatpush.msrb.mxu0 %v1118_v35 }
 0xa04   :  { %2401 = vmatmul.msk.f32.vlgmr.msrb.gmra.mxu1 %vm173_vm5, %v844_v23 }
 0xa41   :  { %v1023_v24 = vpop.xlane.xlu1 %1022 }
 0xa42   :  { %v1027_v25 = vmul.f32 %v1023_v24, %v2747_v8 }
 0xa44   :  { %v1029_v31 = vadd.f32 1e-12, %v1027_v25 }
 0xa46   :  { %vm1037_vm10 = vweird.f32 %v1029_v31 }
 0xa5a   :  { %v927_v26 = vpop.xlane.xlu2 %926 }
 0xa5b   :  { %v928_v28 = vsub.f32 %v924_v63, %v927_v26 }
 0xa5d   :  { %v929_v34 = vmul.f32 1.442695, %v928_v28 }
 0xa5f   :  { %2547 = vpow2.f32 %v929_v34 }
 0xa60   :  { %2549 = vrsqrt.f32 %v1029_v31 }
 0xa65   :  { %v2548_v36 = vpop.eup %2547 }
 0xa66   :  { %v2550_v10 = vpop.eup %2549  ;;  %v931_v39 = vsel %vm173_vm5, %v2548_v36, 0.0 }
 0xa67   :  { %932 = vadd.xlane.f32.xlu2 %v931_v39  ;;  %v1032_v43 = vmul.f32 %v2550_v10, %v1029_v31  ;;  %vm1038_vm9 = vweird.f32 %v2550_v10  ;;  %v3028_v31 = vld [vmem:[%s3376_s13] ss:$0 sm:$0xff] }
 0xa68   :  { %vm1039_vm11 = vmor %vm1037_vm10, %vm1038_vm9 }
 0xa69   :  { %v1033_v1 = vmul.f32 %v2550_v10, %v1032_v43 }
 0xa6b   :  { %v1034_v44 = vmul.f32 0.5, %v1033_v1 }
 0xa6d   :  { %v1035_v45 = vsub.f32 1.5, %v1034_v44 }
 0xa6f   :  { %v1036_v37 = vmul.f32 %v2550_v10, %v1035_v45 }
 0xa71   :  { %v1040_v41 = vsel %vm1039_vm11, %v2550_v10, %v1036_v37 }
 0xa72   :  { %v1051_v32 = vmul.f32 %v1040_v41, %v2949_v53 }
 0xa74   :  { %v1056_v3 = vmul.f32 %v2979_v49, %v1051_v32 }
 0xa76   :  { %v1061_v52 = vadd.f32 %v2987_v51, %v1056_v3 }
 0xa79   :  { %v742_v38 = vpop.f32.mrf.mxu1 }
 0xa7a   :  { %2397 = vmatmul.msk.f32.vlgmr.msrb.gmra.mxu3 %vm173_vm5, %v742_v38 }
 0xa7b   :  { %1089 = vmatpush.msrb.mxu3 %v1066_v22 }
 0xa7d   :  { %1090 = vmatpush.msrb.mxu3 %v1065_v46 }
 0xa7f   :  { %1091 = vmatpush.msrb.mxu3 %v1064_v47 }
 0xa81   :  { %v868_v50 = vpop.f32.mrf.mxu1  ;;  %1092 = vmatpush.msrb.mxu3 %v1063_v48 }
 0xa82   :  { %2402 = vmatmul.msk.f32.vlgmr.msra.gmra.mxu3 %vm173_vm5, %v868_v50 }
 0xa8a   :  { %2407 = vmatmul.msk.f32.vlgmr.msrb.gmra.mxu3 %vm64_vm0, %v1061_v52 }
 0xada   :  { %v933_v54 = vpop.xlane.xlu2 %932 }
 0xadb   :  { %2551 = vrcp.f32 %v933_v54  ;;  %v945_v59 = vand.u32 2147483648, %v933_v54  ;;  %v943_v61 = vand.u32 2147483647, %v933_v54  ;;  %vm939_vm13 = vweird.f32 %v933_v54 }
 0xadd   :  { %v946_v0 = vor.u32 1.1754944e-38, %v945_v59  ;;  %vm944_vm15 = vcmp.eq.f32.partialorder %v943_v61, 8.507059e+37 }
 0xae1   :  { %v2552_v55 = vpop.eup %2551 }
 0xae2   :  { %v935_v56 = vmul.f32 %v2552_v55, %v933_v54  ;;  %vm940_vm12 = vweird.f32 %v2552_v55  ;;  %v2413_v54 = vld [vmem:[%s3367_s4 + $0x30] sm:$0xff] }
 0xae3   :  { %vm941_vm14 = vmor %vm939_vm13, %vm940_vm12 }
 0xae4   :  { %v936_v53 = vsub.f32 1.0, %v935_v56  ;;  %v2412_v56 = vld [vmem:[%s3367_s4 + $0x28] sm:$0xff] }
 0xae6   :  { %v937_v60 = vmul.f32 %v2552_v55, %v936_v53  ;;  %v2411_v53 = vld [vmem:[%s3367_s4 + $0x20] sm:$0xff] }
 0xae8   :  { %v938_v62 = vadd.f32 %v2552_v55, %v937_v60 }
 0xaea   :  { %v942_v63 = vsel %vm941_vm14, %v2552_v55, %v938_v62 }
 0xaeb   :  { %v947_v27 = vsel %vm944_vm15, %v946_v0, %v942_v63 }
 0xaec   :  { %v948_v30 = vmul.f32 %v2548_v36, %v947_v27 }
 0xaee   :  { %2405 = vmatmul.msk.f32.vlgmr.msrb.gmra.mxu2 %vm173_vm5, %v948_v30 }
 0xafd   :  { %v765_v5 = vpop.f32.mrf.mxu3 }
 0xafe   :  { %v789_v11 = vadd.f32 %v2954_v58, %v765_v5 }
 0xb05   :  { %v891_v13 = vpop.f32.mrf.mxu3 }
 0xb06   :  { %v894_v14 = vadd.f32 %v891_v13, %v789_v11 }
 0xb0d   :  { %v1094_v16 = vpop.f32.mrf.mxu3 }
 0xb0e   :  { %v1095_v58 = vadd.f32 %v3020_v15, %v1094_v16  ;;  %v3058_v16 = vld [vmem:[%s3377_s14] ss:$0 sm:$0xff] }
 0xb10   :  { %v1100_v17 = vmul.f32 %v1095_v58, %v1095_v58 }
 0xb12   :  { %v1102_v18 = vmul.f32 %v1100_v17, %v1095_v58 }
 0xb14   :  { %v1104_v19 = vmul.f32 0.044715, %v1102_v18 }
 0xb16   :  { %v1106_v20 = vadd.f32 %v1104_v19, %v1095_v58 }
 0xb18   :  { %v1108_v21 = vmul.f32 0.7978846, %v1106_v20 }
 0xb1a   :  { %2553 = vtanh.f32 %v1108_v21 }
 0xb20   :  { %v2554_v23 = vpop.eup %2553 }
 0xb21   :  { %v1112_v24 = vadd.f32 1.0, %v2554_v23 }
 0xb23   :  { %v1114_v25 = vmul.f32 0.5, %v1112_v24  ;;  %v3076_v24 = vld [vmem:[%s3368_s5 + $0x1] ss:$0 sm:$0xff]  ;;  %s3397_s5 = smov 72  }
 0xb25   :  { %v1116_v26 = vmul.f32 %v1114_v25, %v1095_v58 }
 0xb27   :  { %2409 = vmatmul.msk.f32.vlgmr.msrb.gmra.mxu0 %vm1130_vm1, %v1116_v26 }
 0xb71   :  { %v972_v28 = vpop.f32.mrf.mxu2 }
 0xb72   :  { %2406 = vmatmul.msk.f32.vlgmr.msra.gmra.mxu1 %vm173_vm5, %v972_v28 }
 0xba4   :  { %v1154_v34 = vpop.f32.mrf.mxu0 }
 0xba5   :  { %v1155_v36 = vadd.f32 %v3028_v31, %v1154_v34 }
 0xba7   :  { %v1160_v10 = vadd.f32 %v1155_v36, %v1061_v52 }
 0xba9   :  { %v1164_v39 = vsel %vm64_vm0, %v1160_v10, 0.0 }
 0xbaa   :  { %1165 = vadd.xlane.f32.xlu0 %v1164_v39 }
 0xbef   :  { %v995_v43 = vpop.f32.mrf.mxu1 }
 0xbf0   :  { %v998_v1 = vadd.f32 %v995_v43, %v894_v14 }
 0xbf2   :  { %v1004_v44 = vadd.f32 %v2937_v29, %v998_v1 }
 0xbf4   :  { %v1006_v45 = vadd.f32 %v1004_v44, %v2852_v57  ;;  %v2414_v57 = vld [vmem:[%s3367_s4 + $0x38] sm:$0xff] }
 0xbf5   :  { %1246 = vmatpush.msra.mxu2 %v2414_v57 }
 0xbf6   :  { %v1012_v22 = vsel %vm64_vm0, %v1006_v45, 0.0 }
 0xbf7   :  { %1013 = vadd.xlane.f32.xlu2 %v1012_v22  ;;  %1247 = vmatpush.msra.mxu2 %v2413_v54 }
 0xbf9   :  { %1248 = vmatpush.msra.mxu2 %v2412_v56 }
 0xbfb   :  { %1249 = vmatpush.msra.mxu2 %v2411_v53 }
 0xc1d   :  { %v1166_v37 = vpop.xlane.xlu0 %1165 }
 0xc1e   :  { %v1170_v47 = vmul.f32 %v1166_v37, %v2747_v8 }
 0xc20   :  { %v1172_v32 = vsub.f32 %v1160_v10, %v1170_v47 }
 0xc22   :  { %v1174_v3 = vmul.f32 %v1172_v32, %v1172_v32 }
 0xc24   :  { %v1176_v29 = vsel %vm64_vm0, %v1174_v3, 0.0 }
 0xc6a   :  { %v1014_v38 = vpop.xlane.xlu2 %1013 }
 0xc6b   :  { %v1016_v46 = vmul.f32 %v1014_v38, %v2747_v8 }
 0xc6d   :  { %v1018_v41 = vsub.f32 %v1006_v45, %v1016_v46 }
 0xc6f   :  { %v1020_v48 = vmul.f32 %v1018_v41, %v1018_v41 }
 0xc71   :  { %v1024_v50 = vsel %vm64_vm0, %v1020_v48, 0.0 }
 0xc72   :  { %1025 = vadd.xlane.f32.xlu2 %v1024_v50 }
 0xc7a   :  { %1177 = vadd.xlane.f32.xlu2 %v1176_v29 }
 0xce5   :  { %v1026_v52 = vpop.xlane.xlu2 %1025 }
 0xce6   :  { %v1028_v55 = vmul.f32 %v1026_v52, %v2747_v8 }
 0xce8   :  { %v1030_v59 = vadd.f32 1e-12, %v1028_v55 }
 0xcea   :  { %2555 = vrsqrt.f32 %v1030_v59  ;;  %vm1047_vm3 = vweird.f32 %v1030_v59 }
 0xced   :  { %v1178_v60 = vpop.xlane.xlu2 %1177 }
 0xcee   :  { %v1182_v61 = vmul.f32 %v1178_v60, %v2747_v8 }
 0xcf0   :  { %v2556_v62 = vpop.eup %2555  ;;  %v1184_v0 = vadd.f32 1e-12, %v1182_v61 }
 0xcf1   :  { %v1042_v63 = vmul.f32 %v2556_v62, %v1030_v59  ;;  %vm1048_vm2 = vweird.f32 %v2556_v62 }
 0xcf2   :  { %2557 = vrsqrt.f32 %v1184_v0  ;;  %vm1049_vm4 = vmor %vm1047_vm3, %vm1048_vm2  ;;  %vm1192_vm7 = vweird.f32 %v1184_v0 }
 0xcf3   :  { %v1043_v27 = vmul.f32 %v2556_v62, %v1042_v63 }
 0xcf5   :  { %v1044_v30 = vmul.f32 0.5, %v1043_v27 }
 0xcf7   :  { %v1045_v2 = vsub.f32 1.5, %v1044_v30 }
 0xcf8   :  { %v2558_v4 = vpop.eup %2557 }
 0xcf9   :  { %v1046_v33 = vmul.f32 %v2556_v62, %v1045_v2  ;;  %v1187_v5 = vmul.f32 %v2558_v4, %v1184_v0  ;;  %vm1193_vm6 = vweird.f32 %v2558_v4 }
 0xcfa   :  { %vm1194_vm8 = vmor %vm1192_vm7, %vm1193_vm6 }
 0xcfb   :  { %v1050_v6 = vsel %vm1049_vm4, %v2556_v62, %v1046_v33  ;;  %v1188_v7 = vmul.f32 %v2558_v4, %v1187_v5 }
 0xcfc   :  { %v1052_v9 = vmul.f32 %v1050_v6, %v1018_v41 }
 0xcfd   :  { %v1189_v11 = vmul.f32 0.5, %v1188_v7 }
 0xcfe   :  { %v1057_v12 = vmul.f32 %v2979_v49, %v1052_v9  ;;  %v3064_v49 = vld [vmem:[%s3378_s15] ss:$0 sm:$0xff] }
 0xcff   :  { %v1190_v13 = vsub.f32 1.5, %v1189_v11 }
 0xd00   :  { %v1062_v35 = vadd.f32 %v2987_v51, %v1057_v12 }
 0xd01   :  { %v1191_v14 = vmul.f32 %v2558_v4, %v1190_v13 }
 0xd02   :  { %2408 = vmatmul.msk.f32.gmra.mxu3 %vm64_vm0, %v1062_v35 }
 0xd03   :  { %v1195_v58 = vsel %vm1194_vm8, %v2558_v4, %v1191_v14 }
 0xd04   :  { %v1206_v17 = vmul.f32 %v1195_v58, %v1172_v32 }
 0xd06   :  { %v1211_v18 = vmul.f32 %v3058_v16, %v1206_v17 }
 0xd08   :  { %v3068_v51 = vadd.f32 %v3064_v49, %v1211_v18 }
 0xd0a   :  { %2416 = vmatmul.msk.f32.vlgmr.msra.gmra.mxu2 %vm64_vm0, %v3068_v51 }
 0xd85   :  { %v1097_v19 = vpop.f32.mrf.mxu3 }
 0xd86   :  { %v1098_v20 = vadd.f32 %v3020_v15, %v1097_v19 }
 0xd88   :  { %v1101_v21 = vmul.f32 %v1098_v20, %v1098_v20 }
 0xd8a   :  { %v1103_v23 = vmul.f32 %v1101_v21, %v1098_v20 }
 0xd8c   :  { %v1105_v25 = vmul.f32 0.044715, %v1103_v23 }
 0xd8d   :  { %v1251_v26 = vpop.f32.mrf.mxu2 }
 0xd8e   :  { %v1107_v28 = vadd.f32 %v1105_v25, %v1098_v20  ;;  %v3079_v34 = vadd.f32 %v3076_v24, %v1251_v26 }
 0xd90   :  { %1469 = vrot.lane.b32.xlu0 %v3079_v34, %s2638_s2  ;;  %1341 = vrot.lane.b32.xlu1 %v3079_v34, %s2639_s23  ;;  %v1109_v15 = vmul.f32 0.7978846, %v1107_v28  ;;  %v3133_v28 = vld [vmem:[%s3369_s6 + $0x20] sm:$0xff] }
 0xd91   :  { %1343 = vrot.lane.b32.xlu2 %v3079_v34, %s2634_s0 }
 0xd92   :  { %2559 = vtanh.f32 %v1109_v15 }
 0xd98   :  { %v2560_v36 = vpop.eup %2559 }
 0xd99   :  { %1467 = vrot.lane.b32.xlu2 %v3079_v34, %s2640_s26  ;;  %v1113_v10 = vadd.f32 1.0, %v2560_v36 }
 0xd9b   :  { %v1115_v39 = vmul.f32 0.5, %v1113_v10 }
 0xd9d   :  { %v1117_v43 = vmul.f32 %v1115_v39, %v1098_v20 }
 0xd9f   :  { %2410 = vmatmul.msk.f32.gmra.mxu0 %vm1130_vm1, %v1117_v43 }
 0xda1   :  { %1263 = vrot.lane.b32.xlu2 %v3079_v34, %s2636_s19 }
 0xdeb   :  { %v1344_v1 = vpop.permute.xlu2 %1343 }
 0xdec   :  { %2425 = vmatpush.xpose.msk.msra.mxu3 %vm173_vm5, %v1344_v1 }
 0xdf0   :  { %1462 = vmatpush.msrb.mxu3 %v3133_v28 }
 0xdf3   :  { %v1468_v44 = vpop.permute.xlu2 %1467 }
 0xdfb   :  { %v1264_v45 = vpop.permute.xlu2 %1263 }
 0xdfc   :  { %2422 = vmatpush.xpose.msk.msrb.mxu1 %vm173_vm5, %v1264_v45 }
 0xdff   :  { %2423 = vmatmul.msk.f32.vlgmr.msrb.gmra.mxu1 %vm173_vm5, %v3079_v34 }
 0xe02   :  { %v1470_v22 = vpop.permute.xlu0 %1469  ;;  %v1342_v37 = vpop.permute.xlu1 %1341 }
 0xe03   :  { %2426 = vmatmul.msk.f32.vlgmr.msra.gmra.mxu3 %vm173_vm5, %v1342_v37  ;;  %2430 = vmatpush.xpose.msk.msra.mxu0 %vm173_vm5, %v1470_v22 }
 0xe06   :  { %2431 = vmatmul.msk.f32.vlgmr.msra.gmra.mxu0 %vm173_vm5, %v1468_v44 }
 0xe1c   :  { %v1157_v38 = vpop.f32.mrf.mxu0 }
 0xe1d   :  { %v1158_v46 = vadd.f32 %v3028_v31, %v1157_v38 }
 0xe1f   :  { %v1161_v47 = vadd.f32 %v1158_v46, %v1062_v35 }
 0xe21   :  { %v1167_v41 = vsel %vm64_vm0, %v1161_v47, 0.0 }
 0xe22   :  { %1168 = vadd.xlane.f32.xlu1 %v1167_v41 }
 0xe7c   :  { %v1286_v30 = vpop.f32.mrf.mxu1 }
 0xe7d   :  { %v1289_v4 = vmul.f32 0.35355338, %v1286_v30 }
 0xe7f   :  { %v1290_v7 = vadd.f32 %v1289_v4, %v2804_v42 }
 0xe81   :  { %v1291_v11 = vsel %vm173_vm5, %v1290_v7, -inf }
 0xe83   :  { %v1492_v48 = vpop.f32.mrf.mxu0 }
 0xe84   :  { %v1495_v32 = vmul.f32 0.35355338, %v1492_v48 }
 0xe86   :  { %v1366_v50 = vpop.f32.mrf.mxu3  ;;  %v1496_v3 = vadd.f32 %v1495_v32, %v2804_v42 }
 0xe87   :  { %v1369_v29 = vmul.f32 0.35355338, %v1366_v50 }
 0xe88   :  { %v1497_v57 = vsel %vm173_vm5, %v1496_v3, -inf }
 0xe89   :  { %1498 = vmax.xlane.f32.xlu0 %v1497_v57  ;;  %v1370_v52 = vadd.f32 %v1369_v29, %v2804_v42 }
 0xe8b   :  { %v1371_v54 = vsel %vm173_vm5, %v1370_v52, -inf }
 0xe8c   :  { %1372 = vmax.xlane.f32.xlu2 %v1371_v54 }
 0xe95   :  { %v1169_v55 = vpop.xlane.xlu1 %1168 }
 0xe96   :  { %v1171_v31 = vmul.f32 %v1169_v55, %v2747_v8 }
 0xe98   :  { %v1173_v56 = vsub.f32 %v1161_v47, %v1171_v31 }
 0xe9a   :  { %v1175_v53 = vmul.f32 %v1173_v56, %v1173_v56 }
 0xe9c   :  { %v1179_v59 = vsel %vm64_vm0, %v1175_v53, 0.0 }
 0xe9d   :  { %1180 = vadd.xlane.f32.xlu1 %v1179_v59 }
 0xeb6   :  { %1395 = vrot.lane.b32.xlu1 %v3079_v34, %s2637_s22 }
 0xefc   :  { %v1499_v60 = vpop.xlane.xlu0 %1498 }
 0xefd   :  { %v1500_v61 = vsub.f32 %v1496_v3, %v1499_v60 }
 0xeff   :  { %v1501_v62 = vmul.f32 1.442695, %v1500_v61  ;;  %v1373_v0 = vpop.xlane.xlu2 %1372 }
 0xf00   :  { %v1374_v63 = vsub.f32 %v1370_v52, %v1373_v0 }
 0xf01   :  { %2561 = vpow2.f32 %v1501_v62 }
 0xf02   :  { %v1375_v27 = vmul.f32 1.442695, %v1374_v63 }
 0xf04   :  { %2563 = vpow2.f32 %v1375_v27 }
 0xf07   :  { %v3109_v2 = vpop.eup %2561 }
 0xf08   :  { %v1503_v33 = vsel %vm173_vm5, %v3109_v2, 0.0 }
 0xf09   :  { %1504 = vadd.xlane.f32.xlu0 %v1503_v33 }
 0xf0a   :  { %v3113_v5 = vpop.eup %2563 }
 0xf0b   :  { %v1377_v6 = vsel %vm173_vm5, %v3113_v5, 0.0 }
 0xf0c   :  { %1378 = vadd.xlane.f32.xlu2 %v1377_v6 }
 0xf10   :  { %v1181_v9 = vpop.xlane.xlu1 %1180 }
 0xf11   :  { %v1183_v12 = vmul.f32 %v1181_v9, %v2747_v8  ;;  %1292 = vmax.xlane.f32.xlu0 %v1291_v11 }
 0xf13   :  { %v1185_v13 = vadd.f32 1e-12, %v1183_v12 }
 0xf15   :  { %2565 = vrsqrt.f32 %v1185_v13  ;;  %vm1202_vm10 = vweird.f32 %v1185_v13 }
 0xf1b   :  { %v2566_v35 = vpop.eup %2565 }
 0xf1c   :  { %v1197_v14 = vmul.f32 %v2566_v35, %v1185_v13  ;;  %vm1203_vm9 = vweird.f32 %v2566_v35  ;;  %v2419_v13 = vld [vmem:[%s3369_s6 + $0x28] sm:$0xff] }
 0xf1d   :  { %vm1204_vm11 = vmor %vm1202_vm10, %vm1203_vm9 }
 0xf1e   :  { %v1198_v58 = vmul.f32 %v2566_v35, %v1197_v14 }
 0xf20   :  { %v1199_v17 = vmul.f32 0.5, %v1198_v58 }
 0xf22   :  { %v1200_v18 = vsub.f32 1.5, %v1199_v17 }
 0xf24   :  { %v1201_v19 = vmul.f32 %v2566_v35, %v1200_v18  ;;  %1521 = vrot.lane.b32.xlu2 %v3079_v34, %s2641_s27 }
 0xf26   :  { %v1205_v20 = vsel %vm1204_vm11, %v2566_v35, %v1201_v19  ;;  %v2420_v35 = vld [vmem:[%s3369_s6 + $0x30] sm:$0xff] }
 0xf27   :  { %v1207_v21 = vmul.f32 %v1205_v20, %v1173_v56 }
 0xf28   :  { %v1396_v23 = vpop.permute.xlu1 %1395 }
 0xf29   :  { %1416 = vmatpush.msrb.mxu2 %v1396_v23  ;;  %v1212_v25 = vmul.f32 %v3058_v16, %v1207_v21 }
 0xf2b   :  { %v3124_v26 = vadd.f32 %v3064_v49, %v1212_v25 }
 0xf2c   :  { %1573 = vrot.lane.b32.xlu2 %v3079_v34, %s3397_s5 }
 0xf2d   :  { %2417 = vmatmul.msk.f32.gmra.mxu2 %vm64_vm0, %v3124_v26 }
 0xf7c   :  { %v1505_v15 = vpop.xlane.xlu0 %1504 }
 0xf7d   :  { %2567 = vrcp.f32 %v1505_v15  ;;  %v1517_v52 = vand.u32 2147483648, %v1505_v15  ;;  %vm1511_vm3 = vweird.f32 %v1505_v15  ;;  %v1515_v31 = vand.u32 2147483647, %v1505_v15 }
 0xf7f   :  { %v1379_v36 = vpop.xlane.xlu2 %1378  ;;  %v1518_v59 = vor.u32 1.1754944e-38, %v1517_v52  ;;  %vm1516_vm6 = vcmp.eq.f32.partialorder %v1515_v31, 8.507059e+37 }
 0xf80   :  { %2569 = vrcp.f32 %v1379_v36  ;;  %v1391_v38 = vand.u32 2147483648, %v1379_v36  ;;  %v1389_v41 = vand.u32 2147483647, %v1379_v36  ;;  %vm1385_vm13 = vweird.f32 %v1379_v36 }
 0xf82   :  { %v1392_v32 = vor.u32 1.1754944e-38, %v1391_v38  ;;  %vm1390_vm2 = vcmp.eq.f32.partialorder %v1389_v41, 8.507059e+37 }
 0xf83   :  { %v2568_v16 = vpop.eup %2567 }
 0xf84   :  { %v1507_v49 = vmul.f32 %v2568_v16, %v1505_v15  ;;  %v1293_v10 = vpop.xlane.xlu0 %1292  ;;  %vm1512_vm15 = vweird.f32 %v2568_v16 }
 0xf85   :  { %v1294_v39 = vsub.f32 %v1290_v7, %v1293_v10  ;;  %vm1513_vm4 = vmor %vm1511_vm3, %vm1512_vm15 }
 0xf86   :  { %v2570_v43 = vpop.eup %2569  ;;  %v1508_v1 = vsub.f32 1.0, %v1507_v49 }
 0xf87   :  { %v1381_v44 = vmul.f32 %v2570_v43, %v1379_v36  ;;  %v1295_v45 = vmul.f32 1.442695, %v1294_v39  ;;  %v1522_v22 = vpop.permute.xlu2 %1521  ;;  %vm1386_vm12 = vweird.f32 %v2570_v43 }
 0xf88   :  { %1542 = vmatpush.msra.mxu2 %v1522_v22  ;;  %v1509_v46 = vmul.f32 %v2568_v16, %v1508_v1  ;;  %vm1387_vm14 = vmor %vm1385_vm13, %vm1386_vm12 }
 0xf89   :  { %v1382_v37 = vsub.f32 1.0, %v1381_v44  ;;  %2571 = vpow2.f32 %v1295_v45 }
 0xf8a   :  { %v1510_v3 = vadd.f32 %v2568_v16, %v1509_v46 }
 0xf8b   :  { %v1383_v47 = vmul.f32 %v2570_v43, %v1382_v37 }
 0xf8c   :  { %v1514_v53 = vsel %vm1513_vm4, %v2568_v16, %v1510_v3 }
 0xf8d   :  { %v1384_v48 = vadd.f32 %v2570_v43, %v1383_v47  ;;  %v1519_v60 = vsel %vm1516_vm6, %v1518_v59, %v1514_v53 }
 0xf8e   :  { %v1520_v61 = vmul.f32 %v3109_v2, %v1519_v60 }
 0xf8f   :  { %v2572_v50 = vpop.eup %2571  ;;  %v1388_v29 = vsel %vm1387_vm14, %v2570_v43, %v1384_v48  ;;  %v1574_v57 = vpop.permute.xlu2 %1573 }
 0xf90   :  { %v1393_v54 = vsel %vm1390_vm2, %v1392_v32, %v1388_v29  ;;  %2434 = vmatpush.xpose.msk.msra.mxu3 %vm173_vm5, %v1574_v57  ;;  %v1297_v55 = vsel %vm173_vm5, %v2572_v50, 0.0 }
 0xf91   :  { %1298 = vadd.xlane.f32.xlu0 %v1297_v55  ;;  %v1394_v56 = vmul.f32 %v3113_v5, %v1393_v54 }
 0xf93   :  { %2427 = vmatmul.msk.f32.vlgmr.msrb.gmra.mxu2 %vm173_vm5, %v1394_v56 }
 0xf9b   :  { %2432 = vmatmul.msk.f32.vlgmr.msra.gmra.mxu2 %vm173_vm5, %v1520_v61 }
 0xfa5   :  { %1315 = vrot.lane.b32.xlu0 %v3079_v34, %s3398_s20 }
 0xfb0   :  { %v1254_v62 = vpop.f32.mrf.mxu2 }
 0xfb1   :  { %v3145_v0 = vadd.f32 %v3076_v24, %v1254_v62 }
 0xfb3   :  { %1676 = vrot.lane.b32.xlu1 %v3145_v0, %s2636_s19  ;;  %1728 = vrot.lane.b32.xlu0 %v3145_v0, %s3398_s20 }
 0xfbb   :  { %1571 = vrot.lane.b32.xlu1 %v3079_v34, %s3399_s3 }
0x1004   :  { %v1299_v63 = vpop.xlane.xlu0 %1298 }
0x1005   :  { %2573 = vrcp.f32 %v1299_v63  ;;  %v1311_v4 = vand.u32 2147483648, %v1299_v63  ;;  %v1309_v5 = vand.u32 2147483647, %v1299_v63  ;;  %vm1305_vm8 = vweird.f32 %v1299_v63 }
0x1007   :  { %v1312_v6 = vor.u32 1.1754944e-38, %v1311_v4  ;;  %vm1310_vm10 = vcmp.eq.f32.partialorder %v1309_v5, 8.507059e+37 }
0x100b   :  { %v2574_v27 = vpop.eup %2573 }
0x100c   :  { %v1301_v30 = vmul.f32 %v2574_v27, %v1299_v63  ;;  %vm1306_vm7 = vweird.f32 %v2574_v27 }
0x100d   :  { %vm1307_vm9 = vmor %vm1305_vm8, %vm1306_vm7 }
0x100e   :  { %v1302_v2 = vsub.f32 1.0, %v1301_v30 }
0x1010   :  { %v1303_v33 = vmul.f32 %v2574_v27, %v1302_v2 }
0x1012   :  { %v1304_v24 = vadd.f32 %v2574_v27, %v1303_v33 }
0x1014   :  { %v1308_v7 = vsel %vm1307_vm9, %v2574_v27, %v1304_v24 }
0x1015   :  { %v1313_v9 = vsel %vm1310_vm10, %v1312_v6, %v1308_v7 }
0x1016   :  { %v1314_v11 = vmul.f32 %v2572_v50, %v1313_v9  ;;  %v1418_v14 = vpop.f32.mrf.mxu2 }
0x1017   :  { %v1316_v12 = vpop.permute.xlu0 %1315 }
0x1018   :  { %1336 = vmatpush.msra.mxu1 %v1316_v12 }
0x1019   :  { %2424 = vmatmul.msk.f32.vlgmr.msra.gmra.mxu1 %vm173_vm5, %v1314_v11 }
0x101a   :  { %1439 = vmatpush.msrb.mxu1 %v2419_v13 }
0x101c   :  { %1565 = vmatpush.msra.mxu1 %v2420_v35 }
0x101e   :  { %v1544_v17 = vpop.f32.mrf.mxu2 }
0x1021   :  { %2428 = vmatmul.msk.f32.vlgmr.msrb.gmra.mxu1 %vm173_vm5, %v1418_v14  ;;  %v3206_v14 = vld [vmem:[%s3369_s6 + $0x38] sm:$0xff]  ;;  %s2646_s6 = smov 128  }
0x1022   :  { %1669 = vmatpush.msrb.mxu2 %v3206_v14 }
0x1025   :  { %v1677_v58 = vpop.permute.xlu1 %1676  ;;  %v1729_v19 = vpop.permute.xlu0 %1728 }
0x1026   :  { %2438 = vmatpush.xpose.msk.msrb.mxu1 %vm173_vm5, %v1677_v58 }
0x1029   :  { %2433 = vmatmul.msk.f32.vlgmr.msra.gmra.mxu1 %vm173_vm5, %v1544_v17 }
0x102a   :  { %1852 = vmatpush.msra.mxu1 %v2419_v13 }
0x102d   :  { %v1572_v20 = vpop.permute.xlu1 %1571 }
0x1031   :  { %2439 = vmatmul.msk.f32.vlgmr.msrb.gmra.mxu1 %vm173_vm5, %v3145_v0 }
0x1032   :  { %1978 = vmatpush.msrb.mxu1 %v2420_v35 }
0x1096   :  { %v1338_v18 = vpop.f32.mrf.mxu1 }
0x1097   :  { %2429 = vmatmul.msk.f32.vlgmr.msrb.gmra.mxu3 %vm173_vm5, %v1338_v18 }
0x1098   :  { %1749 = vmatpush.msrb.mxu3 %v1729_v19 }
0x109e   :  { %v3166_v21 = vpop.f32.mrf.mxu1 }
0x109f   :  { %2435 = vmatmul.msk.f32.vlgmr.msra.gmra.mxu3 %vm173_vm5, %v1572_v20 }
0x10a0   :  { %1875 = vmatpush.msra.mxu3 %v3133_v28 }
0x10a6   :  { %v3170_v23 = vpop.f32.mrf.mxu1 }
0x10ae   :  { %v1699_v25 = vpop.f32.mrf.mxu1 }
0x10af   :  { %v1702_v15 = vmul.f32 0.35355338, %v1699_v25 }
0x10b1   :  { %v1703_v36 = vadd.f32 %v1702_v15, %v2898_v40 }
0x10b3   :  { %v1704_v16 = vsel %vm173_vm5, %v1703_v36, -inf }
0x10b4   :  { %1705 = vmax.xlane.f32.xlu2 %v1704_v16 }
0x111a   :  { %v3174_v49 = vpop.f32.mrf.mxu3 }
0x1122   :  { %v1596_v10 = vpop.f32.mrf.mxu3 }
0x1123   :  { %v1599_v39 = vmul.f32 0.35355338, %v1596_v10 }
0x1125   :  { %v1600_v43 = vadd.f32 %v1599_v39, %v2804_v42 }
0x1127   :  { %v1706_v1 = vpop.xlane.xlu2 %1705  ;;  %v1601_v44 = vsel %vm173_vm5, %v1600_v43, -inf }
0x1128   :  { %v1707_v45 = vsub.f32 %v1703_v36, %v1706_v1  ;;  %1602 = vmax.xlane.f32.xlu0 %v1601_v44 }
0x112a   :  { %v1708_v28 = vmul.f32 1.442695, %v1707_v45 }
0x112c   :  { %2575 = vpow2.f32 %v1708_v28 }
0x1132   :  { %v2576_v22 = vpop.eup %2575 }
0x1133   :  { %v1710_v37 = vsel %vm173_vm5, %v2576_v22, 0.0 }
0x1134   :  { %1711 = vadd.xlane.f32.xlu1 %v1710_v37 }
0x113c   :  { %1754 = vrot.lane.b32.xlu0 %v3145_v0, %s2639_s23  ;;  %s2647_s23 = smov 8  }
0x1144   :  { %1882 = vrot.lane.b32.xlu0 %v3145_v0, %s2638_s2  ;;  %s2361_s2 = sshll.u32 %s3381_s18, 4  ;;  %s2362_s2 = int_to_ptr.hbm [resolvable:$true] %s2361_s2 }
0x114d   :  { %1625 = vrot.lane.b32.xlu1 %v3079_v34, %s3400_s25 }
0x1155   :  { %1986 = vrot.lane.b32.xlu1 %v3145_v0, %s3397_s5 }
0x115d   :  { %1880 = vrot.lane.b32.xlu1 %v3145_v0, %s2640_s26 }
0x119b   :  { %v1603_v42 = vpop.xlane.xlu0 %1602 }
0x119c   :  { %v1604_v38 = vsub.f32 %v1600_v43, %v1603_v42 }
0x119e   :  { %v1605_v46 = vmul.f32 1.442695, %v1604_v38 }
0x11a0   :  { %2577 = vpow2.f32 %v1605_v46 }
0x11a6   :  { %v2578_v47 = vpop.eup %2577 }
0x11a7   :  { %v1712_v41 = vpop.xlane.xlu1 %1711  ;;  %v1607_v48 = vsel %vm173_vm5, %v2578_v47, 0.0 }
0x11a8   :  { %2579 = vrcp.f32 %v1712_v41  ;;  %1608 = vadd.xlane.f32.xlu2 %v1607_v48  ;;  %v1724_v34 = vand.u32 2147483648, %v1712_v41  ;;  %v1722_v57 = vand.u32 2147483647, %v1712_v41  ;;  %vm1718_vm12 = vweird.f32 %v1712_v41 }
0x11aa   :  { %v1725_v54 = vor.u32 1.1754944e-38, %v1724_v34  ;;  %vm1723_vm14 = vcmp.eq.f32.partialorder %v1722_v57, 8.507059e+37 }
0x11ae   :  { %v2580_v32 = vpop.eup %2579  ;;  %v1755_v27 = vpop.permute.xlu0 %1754 }
0x11af   :  { %v1714_v50 = vmul.f32 %v2580_v32, %v1712_v41  ;;  %vm1719_vm11 = vweird.f32 %v2580_v32 }
0x11b0   :  { %vm1720_vm13 = vmor %vm1718_vm12, %vm1719_vm11 }
0x11b1   :  { %v1715_v3 = vsub.f32 1.0, %v1714_v50 }
0x11b3   :  { %v1716_v29 = vmul.f32 %v2580_v32, %v1715_v3 }
0x11b5   :  { %v1717_v52 = vadd.f32 %v2580_v32, %v1716_v29  ;;  %v1465_v29 = vadd.f32 %v3174_v49, %v3166_v21 }
0x11b6   :  { %v1883_v11 = vpop.permute.xlu0 %1882 }
0x11b7   :  { %v1721_v55 = vsel %vm1720_vm13, %v2580_v32, %v1717_v52  ;;  %v1570_v52 = vadd.f32 %v3170_v23, %v1465_v29 }
0x11b8   :  { %v1726_v31 = vsel %vm1723_vm14, %v1725_v54, %v1721_v55  ;;  %v3236_v55 = vld [vmem:[%s3370_s7 + $0x1] ss:$0 sm:$0xff] }
0x11b9   :  { %v1727_v56 = vmul.f32 %v2576_v22, %v1726_v31 }
0x11bb   :  { %2440 = vmatmul.msk.f32.vlgmr.msrb.gmra.mxu3 %vm173_vm5, %v1727_v56 }
0x11bf   :  { %v1626_v53 = vpop.permute.xlu1 %1625 }
0x11c0   :  { %1756 = vrot.lane.b32.xlu2 %v3145_v0, %s2634_s0  ;;  %1646 = vmatpush.msrb.mxu0 %v1626_v53 }
0x11c7   :  { %v1987_v59 = vpop.permute.xlu1 %1986 }
0x11c8   :  { %1984 = vrot.lane.b32.xlu2 %v3145_v0, %s3399_s3  ;;  %2450 = vmatpush.xpose.msk.msrb.mxu3 %vm173_vm5, %v1987_v59 }
0x11cf   :  { %v1881_v12 = vpop.permute.xlu1 %1880 }
0x121b   :  { %v1609_v60 = vpop.xlane.xlu2 %1608 }
0x121c   :  { %2581 = vrcp.f32 %v1609_v60  ;;  %v1621_v2 = vand.u32 2147483648, %v1609_v60  ;;  %v1619_v33 = vand.u32 2147483647, %v1609_v60  ;;  %vm1615_vm2 = vweird.f32 %v1609_v60 }
0x121e   :  { %v1622_v24 = vor.u32 1.1754944e-38, %v1621_v2  ;;  %vm1620_vm4 = vcmp.eq.f32.partialorder %v1619_v33, 8.507059e+37 }
0x1222   :  { %v2582_v61 = vpop.eup %2581 }
0x1223   :  { %v1611_v62 = vmul.f32 %v2582_v61, %v1609_v60  ;;  %v1757_v63 = vpop.permute.xlu2 %1756  ;;  %vm1616_vm15 = vweird.f32 %v2582_v61 }
0x1224   :  { %2441 = vmatpush.xpose.msk.msra.mxu0 %vm173_vm5, %v1757_v63  ;;  %vm1617_vm3 = vmor %vm1615_vm2, %vm1616_vm15 }
0x1225   :  { %v1612_v30 = vsub.f32 1.0, %v1611_v62 }
0x1227   :  { %v1613_v4 = vmul.f32 %v2582_v61, %v1612_v30 }
0x1229   :  { %v1614_v5 = vadd.f32 %v2582_v61, %v1613_v4 }
0x122b   :  { %v1618_v6 = vsel %vm1617_vm3, %v2582_v61, %v1614_v5  ;;  %v1985_v35 = vpop.permute.xlu2 %1984 }
0x122c   :  { %v1623_v7 = vsel %vm1620_vm4, %v1622_v24, %v1618_v6 }
0x122d   :  { %v1624_v9 = vmul.f32 %v2578_v47, %v1623_v7 }
0x122f   :  { %2436 = vmatmul.msk.f32.vlgmr.msrb.gmra.mxu0 %vm173_vm5, %v1624_v9 }
0x1230   :  { %2446 = vmatpush.xpose.msk.msrb.mxu0 %vm173_vm5, %v1883_v11 }
0x1237   :  { %2442 = vmatmul.msk.f32.vlgmr.msra.gmra.mxu0 %vm173_vm5, %v1755_v27 }
0x123e   :  { %v1751_v13 = vpop.f32.mrf.mxu3 }
0x123f   :  { %2445 = vmatmul.msk.f32.vlgmr.msra.gmra.mxu3 %vm173_vm5, %v1751_v13  ;;  %2447 = vmatmul.msk.f32.vlgmr.msrb.gmra.mxu0 %vm173_vm5, %v1881_v12 }
0x1247   :  { %2451 = vmatmul.msk.f32.vlgmr.msrb.gmra.mxu3 %vm173_vm5, %v1985_v35 }
0x12ac   :  { %v1648_v58 = vpop.f32.mrf.mxu0 }
0x12ad   :  { %2437 = vmatmul.msk.f32.vlgmr.msrb.gmra.mxu2 %vm173_vm5, %v1648_v58 }
0x12b4   :  { %v1779_v17 = vpop.f32.mrf.mxu0 }
0x12b5   :  { %v1782_v18 = vmul.f32 0.35355338, %v1779_v17 }
0x12b7   :  { %v1783_v19 = vadd.f32 %v1782_v18, %v2898_v40 }
0x12b9   :  { %v1784_v20 = vsel %vm173_vm5, %v1783_v19, -inf }
0x12ba   :  { %1785 = vmax.xlane.f32.xlu2 %v1784_v20 }
0x12bc   :  { %v1905_v25 = vpop.f32.mrf.mxu0 }
0x12bd   :  { %v1908_v15 = vmul.f32 0.35355338, %v1905_v25 }
0x12bf   :  { %v1909_v36 = vadd.f32 %v1908_v15, %v2898_v40 }
0x12c1   :  { %v1910_v16 = vsel %vm173_vm5, %v1909_v36, -inf }
0x12c2   :  { %v3214_v10 = vpop.f32.mrf.mxu3  ;;  %1911 = vmax.xlane.f32.xlu0 %v1910_v16 }
0x12ca   :  { %v2009_v39 = vpop.f32.mrf.mxu3 }
0x12cb   :  { %v2012_v43 = vmul.f32 0.35355338, %v2009_v39 }
0x12cd   :  { %v2013_v1 = vadd.f32 %v2012_v43, %v2898_v40 }
0x12cf   :  { %v2014_v44 = vsel %vm173_vm5, %v2013_v1, -inf }
0x12d0   :  { %2015 = vmax.xlane.f32.xlu1 %v2014_v44 }
0x132d   :  { %v1786_v45 = vpop.xlane.xlu2 %1785 }
0x132e   :  { %v1787_v28 = vsub.f32 %v1783_v19, %v1786_v45 }
0x1330   :  { %v1788_v22 = vmul.f32 1.442695, %v1787_v28  ;;  %v1671_v57 = vpop.f32.mrf.mxu2 }
0x1331   :  { %v1674_v54 = vadd.f32 %v1671_v57, %v1570_v52 }
0x1332   :  { %2583 = vpow2.f32 %v1788_v22 }
0x1333   :  { %v2093_v31 = vadd.f32 %v3236_v55, %v1674_v54 }
0x1335   :  { %v1912_v37 = vpop.xlane.xlu0 %1911  ;;  %v3240_v56 = vadd.f32 %v2093_v31, %v3068_v51 }
0x1336   :  { %v1913_v42 = vsub.f32 %v1909_v36, %v1912_v37 }
0x1338   :  { %v2584_v38 = vpop.eup %2583  ;;  %v1914_v46 = vmul.f32 1.442695, %v1913_v42 }
0x1339   :  { %v1790_v47 = vsel %vm173_vm5, %v2584_v38, 0.0 }
0x133a   :  { %2585 = vpow2.f32 %v1914_v46  ;;  %1791 = vadd.xlane.f32.xlu2 %v1790_v47 }
0x1340   :  { %v2586_v41 = vpop.eup %2585 }
0x1341   :  { %v1916_v48 = vsel %vm173_vm5, %v2586_v41, 0.0 }
0x1342   :  { %1917 = vadd.xlane.f32.xlu0 %v1916_v48  ;;  %v2460_v48 = vld [vmem:[%s3373_s10 + $0x38] sm:$0xff] }
0x1343   :  { %v2016_v40 = vpop.xlane.xlu1 %2015 }
0x1344   :  { %v2017_v32 = vsub.f32 %v2013_v1, %v2016_v40  ;;  %v2459_v40 = vld [vmem:[%s3373_s10 + $0x30] sm:$0xff] }
0x1346   :  { %v2018_v50 = vmul.f32 1.442695, %v2017_v32  ;;  %v2458_v32 = vld [vmem:[%s3373_s10 + $0x28] sm:$0xff] }
0x1348   :  { %2587 = vpow2.f32 %v2018_v50  ;;  %v2457_v50 = vld [vmem:[%s3373_s10 + $0x20] sm:$0xff] }
0x134e   :  { %v3220_v3 = vpop.eup %2587 }
0x134f   :  { %v2020_v34 = vsel %vm173_vm5, %v3220_v3, 0.0 }
0x1350   :  { %2021 = vadd.xlane.f32.xlu1 %v2020_v34 }
0x1352   :  { %1808 = vrot.lane.b32.xlu2 %v3145_v0, %s2637_s22 }
0x1356   :  { %1934 = vrot.lane.b32.xlu0 %v3145_v0, %s2641_s27 }
0x1369   :  { %2038 = vrot.lane.b32.xlu1 %v3145_v0, %s3400_s25  ;;  %v2101_v0 = vsel %vm64_vm0, %v3240_v56, 0.0 }
0x1380   :  { %2102 = vadd.xlane.f32.xlu0 %v2101_v0 }
0x13ad   :  { %v1792_v53 = vpop.xlane.xlu2 %1791 }
0x13ae   :  { %2589 = vrcp.f32 %v1792_v53  ;;  %v1804_v61 = vand.u32 2147483648, %v1792_v53  ;;  %v1802_v63 = vand.u32 2147483647, %v1792_v53  ;;  %vm1798_vm7 = vweird.f32 %v1792_v53 }
0x13b0   :  { %v1805_v30 = vor.u32 1.1754944e-38, %v1804_v61  ;;  %vm1803_vm9 = vcmp.eq.f32.partialorder %v1802_v63, 8.507059e+37 }
0x13b4   :  { %v2590_v21 = vpop.eup %2589 }
0x13b5   :  { %v1794_v49 = vmul.f32 %v2590_v21, %v1792_v53  ;;  %v1918_v23 = vpop.xlane.xlu0 %1917  ;;  %v1809_v59 = vpop.permute.xlu2 %1808  ;;  %vm1799_vm6 = vweird.f32 %v2590_v21  ;;  %v3271_v53 = vld [vmem:[%s3371_s8 + $0x1] ss:$0 sm:$0xff] }
0x13b6   :  { %2591 = vrcp.f32 %v1918_v23  ;;  %1829 = vmatpush.msra.mxu2 %v1809_v59  ;;  %vm1800_vm8 = vmor %vm1798_vm7, %vm1799_vm6  ;;  %v1930_v6 = vand.u32 2147483648, %v1918_v23  ;;  %v1928_v9 = vand.u32 2147483647, %v1918_v23  ;;  %vm1924_vm11 = vweird.f32 %v1918_v23 }
0x13b7   :  { %v1795_v60 = vsub.f32 1.0, %v1794_v49 }
0x13b8   :  { %v1931_v13 = vor.u32 1.1754944e-38, %v1930_v6  ;;  %vm1929_vm13 = vcmp.eq.f32.partialorder %v1928_v9, 8.507059e+37  ;;  %v2466_v6 = vld [vmem:[%s3375_s12 + $0x50] sm:$0xff]  ;;  %v2464_v9 = vld [vmem:[%s3375_s12 + $0x40] sm:$0xff] }
0x13b9   :  { %v1796_v62 = vmul.f32 %v2590_v21, %v1795_v60 }
0x13bb   :  { %v1797_v27 = vadd.f32 %v2590_v21, %v1796_v62 }
0x13bc   :  { %v2592_v51 = vpop.eup %2591 }
0x13bd   :  { %v1801_v2 = vsel %vm1800_vm8, %v2590_v21, %v1797_v27  ;;  %v1920_v4 = vmul.f32 %v2592_v51, %v1918_v23  ;;  %vm1925_vm10 = vweird.f32 %v2592_v51  ;;  %v3276_v23 = vld [vmem:[%s3372_s9 + $0x1] ss:$0 sm:$0xff] }
0x13be   :  { %v1806_v33 = vsel %vm1803_vm9, %v1805_v30, %v1801_v2  ;;  %vm1926_vm12 = vmor %vm1924_vm11, %vm1925_vm10 }
0x13bf   :  { %v1921_v5 = vsub.f32 1.0, %v1920_v4  ;;  %v1807_v24 = vmul.f32 %v2584_v38, %v1806_v33 }
0x13c1   :  { %v1922_v7 = vmul.f32 %v2592_v51, %v1921_v5  ;;  %2443 = vmatmul.msk.f32.vlgmr.msra.gmra.mxu2 %vm173_vm5, %v1807_v24  ;;  %v2471_v5 = vld [vmem:[%s3375_s12 + $0x78] sm:$0xff]  ;;  %v2470_v24 = vld [vmem:[%s3375_s12 + $0x70] sm:$0xff] }
0x13c2   :  { %2240 = vmatpush.msra.mxu3 %v2471_v5 }
0x13c3   :  { %v1923_v11 = vadd.f32 %v2592_v51, %v1922_v7  ;;  %v2022_v12 = vpop.xlane.xlu1 %2021  ;;  %v2465_v7 = vld [vmem:[%s3375_s12 + $0x48] sm:$0xff] }
0x13c4   :  { %2593 = vrcp.f32 %v2022_v12  ;;  %v2034_v16 = vand.u32 2147483648, %v2022_v12  ;;  %vm2028_vm15 = vweird.f32 %v2022_v12  ;;  %v2032_v39 = vand.u32 2147483647, %v2022_v12  ;;  %2241 = vmatpush.msra.mxu3 %v2470_v24 }
0x13c5   :  { %v1927_v35 = vsel %vm1926_vm12, %v2592_v51, %v1923_v11  ;;  %v2508_v11 = vld [vmem:[%s3374_s11 + $0x1] ss:$0 sm:$0xff]  ;;  %vm2352_vm12 = vcmask 130048  }
0x13c6   :  { %v1932_v58 = vsel %vm1929_vm13, %v1931_v13, %v1927_v35  ;;  %v2035_v1 = vor.u32 1.1754944e-38, %v2034_v16  ;;  %vm2033_vm3 = vcmp.eq.f32.partialorder %v2032_v39, 8.507059e+37 }
0x13c7   :  { %v1933_v17 = vmul.f32 %v2586_v41, %v1932_v58 }
0x13c8   :  { %v1935_v18 = vpop.permute.xlu0 %1934 }
0x13c9   :  { %1955 = vmatpush.msrb.mxu2 %v1935_v18 }
0x13ca   :  { %v2594_v19 = vpop.eup %2593  ;;  %2448 = vmatmul.msk.f32.vlgmr.msrb.gmra.mxu2 %vm173_vm5, %v1933_v17 }
0x13cb   :  { %v2024_v20 = vmul.f32 %v2594_v19, %v2022_v12  ;;  %2082 = vmatpush.msra.mxu2 %v3206_v14  ;;  %vm2029_vm14 = vweird.f32 %v2594_v19 }
0x13cc   :  { %vm2030_vm2 = vmor %vm2028_vm15, %vm2029_vm14 }
0x13cd   :  { %v2025_v25 = vsub.f32 1.0, %v2024_v20 }
0x13cf   :  { %v2026_v15 = vmul.f32 %v2594_v19, %v2025_v25 }
0x13d1   :  { %v2027_v36 = vadd.f32 %v2594_v19, %v2026_v15 }
0x13d3   :  { %v2031_v43 = vsel %vm2030_vm2, %v2594_v19, %v2027_v36 }
0x13d4   :  { %v2036_v44 = vsel %vm2033_vm3, %v2035_v1, %v2031_v43 }
0x13d5   :  { %v2037_v28 = vmul.f32 %v3220_v3, %v2036_v44 }
0x13db   :  { %v2039_v45 = vpop.permute.xlu1 %2038 }
0x13dc   :  { %2059 = vmatpush.msra.mxu0 %v2039_v45  ;;  %v3318_v45 = vld [vmem:[%s3376_s13 + $0x1] ss:$0 sm:$0xff] }
0x13dd   :  { %2452 = vmatmul.msk.f32.vlgmr.msra.gmra.mxu0 %vm173_vm5, %v2037_v28 }
0x13f3   :  { %v2103_v22 = vpop.xlane.xlu0 %2102 }
0x13f4   :  { %v2107_v14 = vmul.f32 %v2103_v22, %v2747_v8 }
0x13f6   :  { %v2109_v37 = vsub.f32 %v3240_v56, %v2107_v14 }
0x13f8   :  { %v2111_v42 = vmul.f32 %v2109_v37, %v2109_v37 }
0x13fa   :  { %v2113_v38 = vsel %vm64_vm0, %v2111_v42, 0.0 }
0x13fb   :  { %2114 = vadd.xlane.f32.xlu1 %v2113_v38 }
0x1444   :  { %v1831_v46 = vpop.f32.mrf.mxu2 }
0x1445   :  { %2444 = vmatmul.msk.f32.vlgmr.msra.gmra.mxu1 %vm173_vm5, %v1831_v46 }
0x1446   :  { %2183 = vmatpush.msra.mxu1 %v2460_v48 }
0x1448   :  { %2184 = vmatpush.msra.mxu1 %v2459_v40 }
0x144a   :  { %2185 = vmatpush.msra.mxu1 %v2458_v32 }
0x144c   :  { %2186 = vmatpush.msra.mxu1 %v2457_v50 }
0x144d   :  { %v1957_v47 = vpop.f32.mrf.mxu2 }
0x144e   :  { %2449 = vmatmul.msk.f32.vlgmr.msrb.gmra.mxu1 %vm173_vm5, %v1957_v47 }
0x145a   :  { %v2061_v41 = vpop.f32.mrf.mxu0 }
0x145b   :  { %2453 = vmatmul.msk.f32.vlgmr.msra.gmra.mxu2 %vm173_vm5, %v2061_v41 }
0x146e   :  { %v2115_v3 = vpop.xlane.xlu1 %2114 }
0x146f   :  { %v2119_v34 = vmul.f32 %v2115_v3, %v2747_v8 }
0x1471   :  { %v2121_v29 = vadd.f32 1e-12, %v2119_v34 }
0x1473   :  { %2595 = vrsqrt.f32 %v2121_v29  ;;  %vm2129_vm4 = vweird.f32 %v2121_v29 }
0x1479   :  { %v2596_v57 = vpop.eup %2595 }
0x147a   :  { %v2124_v52 = vmul.f32 %v2596_v57, %v2121_v29  ;;  %vm2130_vm5 = vweird.f32 %v2596_v57 }
0x147b   :  { %vm2131_vm6 = vmor %vm2129_vm4, %vm2130_vm5 }
0x147c   :  { %v2125_v54 = vmul.f32 %v2596_v57, %v2124_v52 }
0x147e   :  { %v2126_v31 = vmul.f32 0.5, %v2125_v54 }
0x1480   :  { %v2127_v56 = vsub.f32 1.5, %v2126_v31 }
0x1482   :  { %v2128_v0 = vmul.f32 %v2596_v57, %v2127_v56 }
0x1484   :  { %v2132_v21 = vsel %vm2131_vm6, %v2596_v57, %v2128_v0 }
0x1485   :  { %v2143_v49 = vmul.f32 %v2132_v21, %v2109_v37 }
0x1487   :  { %v2148_v59 = vmul.f32 %v3271_v53, %v2143_v49 }
0x1489   :  { %v2153_v60 = vadd.f32 %v3276_v23, %v2148_v59 }
0x148b   :  { %2462 = vmatmul.msk.f32.vlgmr.msra.gmra.mxu1 %vm64_vm0, %v2153_v60 }
0x14c2   :  { %v1854_v61 = vpop.f32.mrf.mxu1 }
0x14c3   :  { %v1878_v63 = vadd.f32 %v3214_v10, %v1854_v61  ;;  %v2469_v10 = vld [vmem:[%s3375_s12 + $0x68] sm:$0xff] }
0x14c4   :  { %2242 = vmatpush.msra.mxu3 %v2469_v10 }
0x14cb   :  { %v1980_v62 = vpop.f32.mrf.mxu1 }
0x14cc   :  { %v1983_v27 = vadd.f32 %v1980_v62, %v1878_v63 }
0x14de   :  { %v2084_v51 = vpop.f32.mrf.mxu2 }
0x14df   :  { %v2087_v30 = vadd.f32 %v2084_v51, %v1983_v27 }
0x14e1   :  { %v2094_v2 = vadd.f32 %v3236_v55, %v2087_v30  ;;  %v2467_v55 = vld [vmem:[%s3375_s12 + $0x58] sm:$0xff] }
0x14e2   :  { %v2318_v30 = vld [vmem:[%s3379_s16 + $0x18] sm:$0xff] }
0x14e3   :  { %v2096_v4 = vadd.f32 %v2094_v2, %v3124_v26  ;;  %v2468_v26 = vld [vmem:[%s3375_s12 + $0x60] sm:$0xff]  ;;  %2341 = vmatpush.msrb.mxu0 %v2318_v30  ;;  %v2317_v2 = vld [vmem:[%s3379_s16 + $0x10] sm:$0xff] }
0x14e4   :  { %2243 = vmatpush.msra.mxu3 %v2468_v26 }
0x14e5   :  { %v2104_v33 = vsel %vm64_vm0, %v2096_v4, 0.0  ;;  %2342 = vmatpush.msrb.mxu0 %v2317_v2 }
0x14e6   :  { %2105 = vadd.xlane.f32.xlu2 %v2104_v33  ;;  %2244 = vmatpush.msra.mxu3 %v2467_v55  ;;  %v2315_v33 = vld [vmem:[%s3379_s16] sm:$0xff] }
0x14e8   :  { %2245 = vmatpush.msra.mxu3 %v2466_v6 }
0x14ea   :  { %2246 = vmatpush.msra.mxu3 %v2465_v7 }
0x14ec   :  { %2247 = vmatpush.msra.mxu3 %v2464_v9 }
0x1508   :  { %v2188_v12 = vpop.f32.mrf.mxu1 }
0x1509   :  { %v2189_v13 = vadd.f32 %v2508_v11, %v2188_v12  ;;  %v2510_v12 = vld [vmem:[%s3377_s14 + $0x1] ss:$0 sm:$0xff] }
0x150b   :  { %v2194_v35 = vmul.f32 %v2189_v13, %v2189_v13 }
0x150d   :  { %v2196_v58 = vmul.f32 %v2194_v35, %v2189_v13 }
0x150f   :  { %v2198_v17 = vmul.f32 0.044715, %v2196_v58  ;;  %v2511_v58 = vld [vmem:[%s3378_s15 + $0x1] ss:$0 sm:$0xff]  ;;  %s2645_s15 = smov [#allocation2]  }
0x1511   :  { %v2200_v18 = vadd.f32 %v2198_v17, %v2189_v13 }
0x1513   :  { %v2202_v19 = vmul.f32 0.7978846, %v2200_v18 }
0x1515   :  { %2597 = vtanh.f32 %v2202_v19 }
0x151b   :  { %v2598_v20 = vpop.eup %2597 }
0x151c   :  { %v2206_v25 = vadd.f32 1.0, %v2598_v20 }
0x151e   :  { %v2208_v15 = vmul.f32 0.5, %v2206_v25 }
0x1520   :  { %v2210_v36 = vmul.f32 %v2208_v15, %v2189_v13 }
0x1522   :  { %2473 = vmatmul.msk.f32.vlgmr.msra.gmra.mxu3 %vm1130_vm1, %v2210_v36  ;;  %v2512_v36 = vld [vmem:[%s3380_s17] ss:$0 sm:$0xff]  ;;  %s2359_s17 = sshll.u32 %s2645_s15, 4  ;;  %s2360_s17 = int_to_ptr.vmem [resolvable:$true] %s2359_s17 }
0x1559   :  { %v2106_v16 = vpop.xlane.xlu2 %2105 }
0x155a   :  { %v2108_v39 = vmul.f32 %v2106_v16, %v2747_v8 }
0x155c   :  { %v2110_v43 = vsub.f32 %v2096_v4, %v2108_v39  ;;  %v2316_v4 = vld [vmem:[%s3379_s16 + $0x8] sm:$0xff] }
0x155d   :  { %2343 = vmatpush.msrb.mxu0 %v2316_v4 }
0x155e   :  { %v2112_v1 = vmul.f32 %v2110_v43, %v2110_v43 }
0x155f   :  { %2344 = vmatpush.msrb.mxu0 %v2315_v33 }
0x1560   :  { %v2116_v44 = vsel %vm64_vm0, %v2112_v1, 0.0 }
0x1561   :  { %2117 = vadd.xlane.f32.xlu2 %v2116_v44 }
0x15a5   :  { %v2249_v28 = vpop.f32.mrf.mxu3 }
0x15a6   :  { %v2250_v22 = vadd.f32 %v3318_v45, %v2249_v28 }
0x15a8   :  { %v2255_v14 = vadd.f32 %v2250_v22, %v2153_v60 }
0x15aa   :  { %v2261_v37 = vsel %vm64_vm0, %v2255_v14, 0.0 }
0x15ab   :  { %2262 = vadd.xlane.f32.xlu0 %v2261_v37 }
0x15d4   :  { %v2118_v42 = vpop.xlane.xlu2 %2117 }
0x15d5   :  { %v2120_v38 = vmul.f32 %v2118_v42, %v2747_v8 }
0x15d7   :  { %v2122_v46 = vadd.f32 1e-12, %v2120_v38 }
0x15d9   :  { %2599 = vrsqrt.f32 %v2122_v46  ;;  %vm2139_vm8 = vweird.f32 %v2122_v46 }
0x15df   :  { %v2600_v47 = vpop.eup %2599 }
0x15e0   :  { %v2134_v41 = vmul.f32 %v2600_v47, %v2122_v46  ;;  %vm2140_vm7 = vweird.f32 %v2600_v47 }
0x15e1   :  { %vm2141_vm9 = vmor %vm2139_vm8, %vm2140_vm7 }
0x15e2   :  { %v2135_v48 = vmul.f32 %v2600_v47, %v2134_v41 }
0x15e4   :  { %v2136_v40 = vmul.f32 0.5, %v2135_v48 }
0x15e6   :  { %v2137_v32 = vsub.f32 1.5, %v2136_v40 }
0x15e8   :  { %v2138_v50 = vmul.f32 %v2600_v47, %v2137_v32 }
0x15ea   :  { %v2142_v3 = vsel %vm2141_vm9, %v2600_v47, %v2138_v50 }
0x15eb   :  { %v2144_v34 = vmul.f32 %v2142_v3, %v2110_v43 }
0x15ed   :  { %v2149_v29 = vmul.f32 %v3271_v53, %v2144_v34 }
0x15ef   :  { %v2154_v57 = vadd.f32 %v3276_v23, %v2149_v29 }
0x15f1   :  { %2463 = vmatmul.msk.f32.gmra.mxu1 %vm64_vm0, %v2154_v57 }
0x161e   :  { %v2263_v52 = vpop.xlane.xlu0 %2262 }
0x161f   :  { %v2267_v54 = vmul.f32 %v2263_v52, %v2747_v8 }
0x1621   :  { %v2269_v31 = vsub.f32 %v2255_v14, %v2267_v54 }
0x1623   :  { %v2271_v56 = vmul.f32 %v2269_v31, %v2269_v31 }
0x1625   :  { %v2273_v0 = vsel %vm64_vm0, %v2271_v56, 0.0 }
0x1626   :  { %2274 = vadd.xlane.f32.xlu2 %v2273_v0 }
0x166e   :  { %v2191_v21 = vpop.f32.mrf.mxu1 }
0x166f   :  { %v2192_v49 = vadd.f32 %v2508_v11, %v2191_v21 }
0x1671   :  { %v2195_v59 = vmul.f32 %v2192_v49, %v2192_v49 }
0x1673   :  { %v2197_v60 = vmul.f32 %v2195_v59, %v2192_v49 }
0x1675   :  { %v2199_v61 = vmul.f32 0.044715, %v2197_v60 }
0x1677   :  { %v2201_v62 = vadd.f32 %v2199_v61, %v2192_v49 }
0x1679   :  { %v2203_v63 = vmul.f32 0.7978846, %v2201_v62 }
0x167b   :  { %2601 = vtanh.f32 %v2203_v63 }
0x1681   :  { %v2602_v53 = vpop.eup %2601 }
0x1682   :  { %v2207_v23 = vadd.f32 1.0, %v2602_v53 }
0x1684   :  { %v2209_v27 = vmul.f32 0.5, %v2207_v23 }
0x1686   :  { %v2211_v51 = vmul.f32 %v2209_v27, %v2192_v49 }
0x1688   :  { %2474 = vmatmul.msk.f32.gmra.mxu3 %vm1130_vm1, %v2211_v51 }
0x1699   :  { %v2275_v5 = vpop.xlane.xlu2 %2274 }
0x169a   :  { %v2279_v24 = vmul.f32 %v2275_v5, %v2747_v8 }
0x169c   :  { %v2281_v10 = vadd.f32 1e-12, %v2279_v24 }
0x169e   :  { %2603 = vrsqrt.f32 %v2281_v10  ;;  %vm2289_vm10 = vweird.f32 %v2281_v10 }
0x16a4   :  { %v2604_v26 = vpop.eup %2603 }
0x16a5   :  { %v2284_v55 = vmul.f32 %v2604_v26, %v2281_v10  ;;  %vm2290_vm1 = vweird.f32 %v2604_v26 }
0x16a6   :  { %vm2291_vm11 = vmor %vm2289_vm10, %vm2290_vm1 }
0x16a7   :  { %v2285_v6 = vmul.f32 %v2604_v26, %v2284_v55 }
0x16a9   :  { %v2286_v7 = vmul.f32 0.5, %v2285_v6 }
0x16ab   :  { %v2287_v9 = vsub.f32 1.5, %v2286_v7 }
0x16ad   :  { %v2288_v11 = vmul.f32 %v2604_v26, %v2287_v9 }
0x16af   :  { %v2292_v13 = vsel %vm2291_vm11, %v2604_v26, %v2288_v11 }
0x16b0   :  { %v2303_v35 = vmul.f32 %v2292_v13, %v2269_v31 }
0x16b2   :  { %v2308_v17 = vmul.f32 %v2510_v12, %v2303_v35 }
0x16b4   :  { %v2313_v18 = vadd.f32 %v2511_v58, %v2308_v17 }
0x16b6   :  { %2477 = vmatmul.msk.f32.vlgmr.msrb.gmra.mxu0 %vm64_vm0, %v2313_v18 }
0x170b   :  { %v2252_v19 = vpop.f32.mrf.mxu3 }
0x170c   :  { %v2253_v20 = vadd.f32 %v3318_v45, %v2252_v19 }
0x170e   :  { %v2256_v25 = vadd.f32 %v2253_v20, %v2154_v57 }
0x1710   :  { %v2264_v15 = vsel %vm64_vm0, %v2256_v25, 0.0 }
0x1711   :  { %2265 = vadd.xlane.f32.xlu1 %v2264_v15 }
0x1733   :  { %v2346_v16 = vpop.f32.mrf.mxu0 }
0x1734   :  { %v2347_v39 = vadd.f32 %v2512_v36, %v2346_v16 }
0x1736   :  { %2353 = vst.msk [vmem:[#allocation2] sm:$0xff] %vm2352_vm12, %v2347_v39 }
0x1784   :  { %v2266_v43 = vpop.xlane.xlu1 %2265 }
0x1785   :  { %v2268_v1 = vmul.f32 %v2266_v43, %v2747_v8 }
0x1787   :  { %v2270_v44 = vsub.f32 %v2256_v25, %v2268_v1 }
0x1789   :  { %v2272_v28 = vmul.f32 %v2270_v44, %v2270_v44 }
0x178b   :  { %v2276_v45 = vsel %vm64_vm0, %v2272_v28, 0.0 }
0x178c   :  { %2277 = vadd.xlane.f32.xlu0 %v2276_v45 }
0x17ff   :  { %v2278_v22 = vpop.xlane.xlu0 %2277 }
0x1800   :  { %v2280_v14 = vmul.f32 %v2278_v22, %v2747_v8 }
0x1802   :  { %v2282_v37 = vadd.f32 1e-12, %v2280_v14 }
0x1804   :  { %2605 = vrsqrt.f32 %v2282_v37  ;;  %vm2299_vm14 = vweird.f32 %v2282_v37 }
0x180a   :  { %v2606_v42 = vpop.eup %2605 }
0x180b   :  { %v2294_v38 = vmul.f32 %v2606_v42, %v2282_v37  ;;  %vm2300_vm13 = vweird.f32 %v2606_v42 }
0x180c   :  { %vm2301_vm15 = vmor %vm2299_vm14, %vm2300_vm13 }
0x180d   :  { %v2295_v46 = vmul.f32 %v2606_v42, %v2294_v38 }
0x180f   :  { %v2296_v47 = vmul.f32 0.5, %v2295_v46 }
0x1811   :  { %v2297_v41 = vsub.f32 1.5, %v2296_v47 }
0x1813   :  { %v2298_v48 = vmul.f32 %v2606_v42, %v2297_v41 }
0x1815   :  { %v2302_v40 = vsel %vm2301_vm15, %v2606_v42, %v2298_v48 }
0x1816   :  { %v2304_v32 = vmul.f32 %v2302_v40, %v2270_v44 }
0x1818   :  { %v2309_v50 = vmul.f32 %v2510_v12, %v2304_v32 }
0x181a   :  { %v2314_v3 = vadd.f32 %v2511_v58, %v2309_v50 }
0x181c   :  { %2478 = vmatmul.msk.f32.gmra.mxu0 %vm64_vm0, %v2314_v3 }
0x1899   :  { %v2349_v8 = vpop.f32.mrf.mxu0 }
0x189a   :  { %v2350_v34 = vadd.f32 %v2512_v36, %v2349_v8 }
0x189c   :  { %2354 = vst.msk [vmem:[#allocation2 + $0x8] sm:$0xff] %vm2352_vm12, %v2350_v34 }
0x189d   :  { %2367 = dma.vmem_to_hbm [thread:$0]  %s2360_s17, 256, %s2362_s2, [#allocation3], %s2646_s6, %s2646_s6, %s2647_s23  }
0x189e   :  { %2631 = dma.done.wait [#allocation3], 256  }
0x189f   :  { %2632 = vsyncadd [#allocation3], 4294967040 }
0x18a0   :  { %2372 = vsyncpa [#allocation3], 1 }

</bundles_post_ra>
